<compile_context>
chip_gen: v6e
topology: v6e:2x2x1
jax: 0.10.0
libtpu: 0.0.40
codegen_flags: <defaults>
</compile_context>

<pallas_src>
import functools
import math

import jax
import jax.numpy as jnp
from jax import lax
from jax.experimental import pallas as pl
from jax.experimental.pallas import tpu as pltpu


_LANE = 128
_CHUNK = 512  # inner lane chunk processed per matmul group


def _round_up(a, b):
    return ((a + b - 1) // b) * b


def _num_tensorcores():
    # v7x has 2 TensorCores per chip; v5e/v6e have 1. Best-effort detection;
    # defaults to 1 (single-TC-safe: no pointless grid splitting).
    try:
        kind = jax.devices()[0].device_kind.lower()
        if "v7" in kind:
            return 2
    except Exception:  # detection is best effort only
        pass
    return 1


def _choose_tiles(n, tm_req, num_tc):
    """Pick (tile, chunk): tile is the per-grid-step lane width, chunk the
    inner loop lane width. chunk always divides tile; both are multiples of 128."""
    tm_req = _round_up(max(int(tm_req), _LANE), _LANE)
    chunk = min(_CHUNK, tm_req)
    tm_req = _round_up(tm_req, chunk)
    # Single step covering the whole batch unless it exceeds the requested tile
    # (ragged edge blocks are fine, so tile may exceed n).
    tile = min(tm_req, _round_up(n, chunk))
    # Only force a multi-step ("parallel") grid when the chip actually has
    # more than one TensorCore (v7x); on v5e/v6e this is pure overhead.
    if num_tc > 1:
        per_core = _round_up(pl.cdiv(n, num_tc), chunk)
        tile = max(chunk, min(tile, per_core))
    return tile, chunk


def _mlp_kernel(xt_ref, gt_ref, w1x_ref, w1g_ref, b1_ref, w2_ref, b2_ref,
                w3_ref, b3_ref, out_ref, *, chunk):
    # Lane-dense layout: batch on lanes, features on sublanes.
    #   xt: (dx-2, tile)   gt: (dg, tile)        out: (1, tile)
    #   w1x: (64, dx-2)    w1g: (64, dg)   w2: (64, 64)   w3: (1, 64)
    #   b1/b2: (64, 1)     b3: (1, 1)      (biases stay f32)
    f32 = jnp.float32
    cdt = w2_ref.dtype  # matmul operand dtype (f32 default, optionally bf16)

    w1x = w1x_ref[...]
    w1g = w1g_ref[...]
    w2 = w2_ref[...]
    w3 = w3_ref[...]
    b1 = b1_ref[...]
    b2 = b2_ref[...]
    b3 = b3_ref[...]

    tile = out_ref.shape[-1]
    n_chunks = tile // chunk

    def body(c, carry):
        j = pl.multiple_of(c * chunk, chunk)
        xs = xt_ref[:, pl.ds(j, chunk)].astype(cdt)     # (dx-2, chunk)
        gs = gt_ref[:, pl.ds(j, chunk)].astype(cdt)     # (dg,   chunk)

        h1 = (jnp.dot(w1x, xs, preferred_element_type=f32)
              + jnp.dot(w1g, gs, preferred_element_type=f32)
              + b1)
        h1 = jnp.maximum(h1, 0.0)                       # (64, chunk) f32

        h2 = jnp.dot(w2, h1.astype(cdt), preferred_element_type=f32) + b2
        h2 = jnp.maximum(h2, 0.0)                       # (64, chunk) f32

        y = jnp.dot(w3, h2.astype(cdt), preferred_element_type=f32) + b3
        out_ref[:, pl.ds(j, chunk)] = y                 # (1, chunk)
        return carry

    lax.fori_loop(0, n_chunks, body, 0, unroll=True)


def prepare_params(params, dx, compute_dtype=jnp.float32):
    """One-time weight preparation (hoist out of the per-call path).

    fc1 is split into the part multiplying x[..., 2:] and the part multiplying
    dvdx, which fuses torch.cat into the first matmul.
    """
    f32 = jnp.float32
    dxk = dx - 2
    w1 = params["fc1_w"].astype(f32)                      # (64, 10)
    return {
        "w1x": w1[:, :dxk].astype(compute_dtype),          # (64, dx-2)
        "w1g": w1[:, dxk:].astype(compute_dtype),           # (64, dg)
        "b1": params["fc1_b"].astype(f32)[:, None],         # (64, 1)
        "w2": params["fc2_w"].astype(compute_dtype),         # (64, 64)
        "b2": params["fc2_b"].astype(f32)[:, None],          # (64, 1)
        "w3": params["fc3_w"].astype(compute_dtype),          # (1, 64)
        "b3": params["fc3_b"].astype(f32)[:, None],            # (1, 1)
    }


def hamiltonian_forward(x, dvdx, params, *, tm=2048,
                        compute_dtype=jnp.float32, num_tensorcores=None):
    """x: [..., Dx], dvdx: [..., Dg] with (Dx - 2) + Dg == 10. Returns [...].

    `params` may be the raw fc1/fc2/fc3 dict or the output of prepare_params().
    """
    f32 = jnp.float32
    lead = x.shape[:-1]
    dx = x.shape[-1]
    dg = dvdx.shape[-1]
    assert dvdx.shape[:-1] == lead
    dxk = dx - 2
    assert dxk >= 1 and dxk + dg == 10

    prep = params if "w1x" in params else prepare_params(params, dx, compute_dtype)

    n = int(math.prod(lead)) if lead else 1
    # Lane-dense kernel inputs: features on sublanes, batch on lanes.
    # TODO(synk): produce x/dvdx already transposed upstream so this (cheap,
    # few-column) XLA slice+transpose pass disappears entirely.
    xt = x[..., 2:].reshape(n, dxk).astype(f32).T        # (dx-2, n)
    gt = dvdx.reshape(n, dg).astype(f32).T               # (dg,   n)

    if num_tensorcores is None:
        num_tensorcores = _num_tensorcores()
    tile, chunk = _choose_tiles(n, tm, num_tensorcores)
    grid = (pl.cdiv(n, tile),)   # ragged last block; Pallas clamps edge blocks

    def fixed(arr):
        return pl.BlockSpec(arr.shape, lambda i: (0, 0))

    w1x, w1g, b1 = prep["w1x"], prep["w1g"], prep["b1"]
    w2, b2, w3, b3 = prep["w2"], prep["b2"], prep["w3"], prep["b3"]

    flops = 2 * n * (dxk * 64 + dg * 64 + 64 * 64 + 64)
    bytes_accessed = (n * (dxk + dg + 1) * 4
                      + sum(int(a.size) * a.dtype.itemsize
                            for a in (w1x, w1g, b1, w2, b2, w3, b3)))

    out = pl.pallas_call(
        functools.partial(_mlp_kernel, chunk=chunk),
        out_shape=jax.ShapeDtypeStruct((1, n), f32),
        grid_spec=pltpu.PrefetchScalarGridSpec(
            num_scalar_prefetch=0,
            grid=grid,
            in_specs=[
                pl.BlockSpec((dxk, tile), lambda i: (0, i)),   # x^T lane tile
                pl.BlockSpec((dg, tile), lambda i: (0, i)),    # dvdx^T lane tile
                fixed(w1x), fixed(w1g), fixed(b1),
                fixed(w2), fixed(b2), fixed(w3), fixed(b3),
            ],
            out_specs=pl.BlockSpec((1, tile), lambda i: (0, i)),
        ),
        compiler_params=pltpu.CompilerParams(
            dimension_semantics=("parallel",)),
        cost_estimate=pl.CostEstimate(
            flops=flops, transcendentals=0, bytes_accessed=bytes_accessed),
    )(xt, gt, w1x, w1g, b1, w2, b2, w3, b3)

    return out[0, :n].reshape(lead)   # squeeze(-1) + restore leading dims


def init_params(key):
    """Deterministic init matching nn.Linear shapes (out_features, in_features)."""
    ks = jax.random.split(key, 6)

    def linear(kw, kb, fan_in, fan_out):
        bound = 1.0 / jnp.sqrt(fan_in)
        w = jax.random.uniform(kw, (fan_out, fan_in), jnp.float32, -bound, bound)
        b = jax.random.uniform(kb, (fan_out,), jnp.float32, -bound, bound)
        return w, b

    w1, b1 = linear(ks[0], ks[1], 10, 64)
    w2, b2 = linear(ks[2], ks[3], 64, 64)
    w3, b3 = linear(ks[4], ks[5], 64, 1)
    return {"fc1_w": w1, "fc1_b": b1,
            "fc2_w": w2, "fc2_b": b2,
            "fc3_w": w3, "fc3_b": b3}


def reference_forward(x, dvdx, params):
    coords = jnp.concatenate([x[..., 2:], dvdx], axis=-1)
    h = jnp.maximum(coords @ params["fc1_w"].T + params["fc1_b"], 0.0)
    h = jnp.maximum(h @ params["fc2_w"].T + params["fc2_b"], 0.0)
    y = h @ params["fc3_w"].T + params["fc3_b"]
    return y[..., 0]


if __name__ == "__main__":
    key = jax.random.PRNGKey(0)
    kx, kg, kx2, kg2, kp = jax.random.split(key, 5)

    params = init_params(kp)
    prepared = prepare_params(params, dx=6)   # one-time weight prep (hoisted)

    # Test 1: N not a tile multiple -> ragged last block + (possibly) 2 steps.
    N = 2500
    x = jax.random.normal(kx, (N, 6), jnp.float32)       # batch.x     [N, 6]
    dvdx = jax.random.normal(kg, (N, 6), jnp.float32)    # batch.dvdx  [N, 6]
    out = jax.block_until_ready(hamiltonian_forward(x, dvdx, prepared))
    ref = reference_forward(x, dvdx, params)
    assert out.shape == (N,)
    assert jnp.allclose(out, ref, atol=1e-4, rtol=1e-4), (
        float(jnp.max(jnp.abs(out - ref))))

    # Test 2: leading batch dims + small ragged batch (single grid step).
    x2 = jax.random.normal(kx2, (5, 77, 6), jnp.float32)
    g2 = jax.random.normal(kg2, (5, 77, 6), jnp.float32)
    out2 = jax.block_until_ready(hamiltonian_forward(x2, g2, prepared))
    ref2 = reference_forward(x2, g2, params)
    assert out2.shape == (5, 77)
    assert jnp.allclose(out2, ref2, atol=1e-4, rtol=1e-4), (
        float(jnp.max(jnp.abs(out2 - ref2))))

    print("KERNEL_OK")
</pallas_src>

<mosaic_0001>
module attributes {stable_mosaic.version = 11 : i64} {
  func.func @_mlp_kernel(%arg0: i32, %arg1: memref<4x2048xf32, #tpu.memory_space<vmem>>, %arg2: memref<6x2048xf32, #tpu.memory_space<vmem>>, %arg3: memref<64x4xf32, #tpu.memory_space<vmem>>, %arg4: memref<64x6xf32, #tpu.memory_space<vmem>>, %arg5: memref<64x1xf32, #tpu.memory_space<vmem>>, %arg6: memref<64x64xf32, #tpu.memory_space<vmem>>, %arg7: memref<64x1xf32, #tpu.memory_space<vmem>>, %arg8: memref<1x64xf32, #tpu.memory_space<vmem>>, %arg9: memref<1x1xf32, #tpu.memory_space<vmem>>, %arg10: memref<1x2048xf32, #tpu.memory_space<vmem>>) attributes {dimension_semantics = [#tpu.dimension_semantics<parallel>], iteration_bounds = array<i64: 2>, scalar_prefetch = 0 : i64, scratch_operands = 0 : i64, tpu.core_type = #tpu.core_type<tc>, window_params = [{transform_indices = @transform_0, window_bounds = array<i64: 4, 2048>}, {transform_indices = @transform_1, window_bounds = array<i64: 6, 2048>}, {pipeline_mode = #tpu.pipeline_mode<synchronous>, transform_indices = @transform_2, window_bounds = array<i64: 64, 4>}, {pipeline_mode = #tpu.pipeline_mode<synchronous>, transform_indices = @transform_3, window_bounds = array<i64: 64, 6>}, {pipeline_mode = #tpu.pipeline_mode<synchronous>, transform_indices = @transform_4, window_bounds = array<i64: 64, 1>}, {pipeline_mode = #tpu.pipeline_mode<synchronous>, transform_indices = @transform_5, window_bounds = array<i64: 64, 64>}, {pipeline_mode = #tpu.pipeline_mode<synchronous>, transform_indices = @transform_6, window_bounds = array<i64: 64, 1>}, {pipeline_mode = #tpu.pipeline_mode<synchronous>, transform_indices = @transform_7, window_bounds = array<i64: 1, 64>}, {pipeline_mode = #tpu.pipeline_mode<synchronous>, transform_indices = @transform_8, window_bounds = array<i64: 1, 1>}, {transform_indices = @transform_9, window_bounds = array<i64: 1, 2048>}]} {
    %c0 = arith.constant 0 : index
    %c0_0 = arith.constant 0 : index
    %0 = vector.load %arg3[%c0, %c0_0] : memref<64x4xf32, #tpu.memory_space<vmem>>, vector<64x4xf32>
    %c0_1 = arith.constant 0 : index
    %c0_2 = arith.constant 0 : index
    %1 = vector.load %arg4[%c0_1, %c0_2] : memref<64x6xf32, #tpu.memory_space<vmem>>, vector<64x6xf32>
    %c0_3 = arith.constant 0 : index
    %c0_4 = arith.constant 0 : index
    %2 = vector.load %arg6[%c0_3, %c0_4] : memref<64x64xf32, #tpu.memory_space<vmem>>, vector<64x64xf32>
    %c0_5 = arith.constant 0 : index
    %c0_6 = arith.constant 0 : index
    %3 = vector.load %arg8[%c0_5, %c0_6] : memref<1x64xf32, #tpu.memory_space<vmem>>, vector<1x64xf32>
    %c0_7 = arith.constant 0 : index
    %c0_8 = arith.constant 0 : index
    %4 = vector.load %arg5[%c0_7, %c0_8] : memref<64x1xf32, #tpu.memory_space<vmem>>, vector<64x1xf32>
    %c0_9 = arith.constant 0 : index
    %c0_10 = arith.constant 0 : index
    %5 = vector.load %arg7[%c0_9, %c0_10] : memref<64x1xf32, #tpu.memory_space<vmem>>, vector<64x1xf32>
    %c0_11 = arith.constant 0 : index
    %c0_12 = arith.constant 0 : index
    %6 = vector.load %arg9[%c0_11, %c0_12] : memref<1x1xf32, #tpu.memory_space<vmem>>, vector<1x1xf32>
    %c0_i32 = arith.constant 0 : i32
    %c512_i32 = arith.constant 512 : i32
    %7 = arith.muli %c0_i32, %c512_i32 : i32
    %8 = tpu.assume_multiple %7, 512 : i32
    %c0_13 = arith.constant 0 : index
    %9 = arith.index_cast %8 : i32 to index
    %10 = vector.load %arg1[%c0_13, %9] : memref<4x2048xf32, #tpu.memory_space<vmem>>, vector<4x512xf32>
    %c0_14 = arith.constant 0 : index
    %11 = arith.index_cast %8 : i32 to index
    %12 = vector.load %arg2[%c0_14, %11] : memref<6x2048xf32, #tpu.memory_space<vmem>>, vector<6x512xf32>
    %cst = arith.constant dense<0.000000e+00> : vector<64x512xf32>
    %13 = tpu.matmul %0, %10, %cst {dimension_numbers = #tpu.dot_dimension_numbers<[1], [0], [0], [1], [0, 0, 1, 1], [], []>} : vector<64x4xf32>, vector<4x512xf32>, vector<64x512xf32> -> vector<64x512xf32>
    %cst_15 = arith.constant dense<0.000000e+00> : vector<64x512xf32>
    %14 = tpu.matmul %1, %12, %cst_15 {dimension_numbers = #tpu.dot_dimension_numbers<[1], [0], [0], [1], [0, 0, 1, 1], [], []>} : vector<64x6xf32>, vector<6x512xf32>, vector<64x512xf32> -> vector<64x512xf32>
    %15 = arith.addf %13, %14 : vector<64x512xf32>
    %16 = vector.broadcast %4 : vector<64x1xf32> to vector<64x512xf32>
    %17 = arith.addf %15, %16 : vector<64x512xf32>
    %cst_16 = arith.constant 0.000000e+00 : f32
    %18 = vector.broadcast %cst_16 : f32 to vector<64x512xf32>
    %19 = arith.maximumf %17, %18 : vector<64x512xf32>
    %cst_17 = arith.constant dense<0.000000e+00> : vector<64x512xf32>
    %20 = tpu.matmul %2, %19, %cst_17 {dimension_numbers = #tpu.dot_dimension_numbers<[1], [0], [0], [1], [0, 0, 1, 1], [], []>} : vector<64x64xf32>, vector<64x512xf32>, vector<64x512xf32> -> vector<64x512xf32>
    %21 = vector.broadcast %5 : vector<64x1xf32> to vector<64x512xf32>
    %22 = arith.addf %20, %21 : vector<64x512xf32>
    %cst_18 = arith.constant 0.000000e+00 : f32
    %23 = vector.broadcast %cst_18 : f32 to vector<64x512xf32>
    %24 = arith.maximumf %22, %23 : vector<64x512xf32>
    %cst_19 = arith.constant dense<0.000000e+00> : vector<1x512xf32>
    %25 = tpu.matmul %3, %24, %cst_19 {dimension_numbers = #tpu.dot_dimension_numbers<[1], [0], [0], [1], [0, 0, 1, 1], [], []>} : vector<1x64xf32>, vector<64x512xf32>, vector<1x512xf32> -> vector<1x512xf32>
    %26 = vector.broadcast %6 : vector<1x1xf32> to vector<1x512xf32>
    %27 = arith.addf %25, %26 : vector<1x512xf32>
    %c0_20 = arith.constant 0 : index
    %28 = arith.index_cast %8 : i32 to index
    %29 = vector.load %arg10[%c0_20, %28] : memref<1x2048xf32, #tpu.memory_space<vmem>>, vector<1x512xf32>
    tpu.vector_store %arg10[%c0_20, %28], %27 {strides = array<i32>} : memref<1x2048xf32, #tpu.memory_space<vmem>>, vector<1x512xf32>,
    %c1_i32 = arith.constant 1 : i32
    %c512_i32_21 = arith.constant 512 : i32
    %30 = arith.muli %c1_i32, %c512_i32_21 : i32
    %31 = tpu.assume_multiple %30, 512 : i32
    %c0_22 = arith.constant 0 : index
    %32 = arith.index_cast %31 : i32 to index
    %33 = vector.load %arg1[%c0_22, %32] : memref<4x2048xf32, #tpu.memory_space<vmem>>, vector<4x512xf32>
    %c0_23 = arith.constant 0 : index
    %34 = arith.index_cast %31 : i32 to index
    %35 = vector.load %arg2[%c0_23, %34] : memref<6x2048xf32, #tpu.memory_space<vmem>>, vector<6x512xf32>
    %cst_24 = arith.constant dense<0.000000e+00> : vector<64x512xf32>
    %36 = tpu.matmul %0, %33, %cst_24 {dimension_numbers = #tpu.dot_dimension_numbers<[1], [0], [0], [1], [0, 0, 1, 1], [], []>} : vector<64x4xf32>, vector<4x512xf32>, vector<64x512xf32> -> vector<64x512xf32>
    %cst_25 = arith.constant dense<0.000000e+00> : vector<64x512xf32>
    %37 = tpu.matmul %1, %35, %cst_25 {dimension_numbers = #tpu.dot_dimension_numbers<[1], [0], [0], [1], [0, 0, 1, 1], [], []>} : vector<64x6xf32>, vector<6x512xf32>, vector<64x512xf32> -> vector<64x512xf32>
    %38 = arith.addf %36, %37 : vector<64x512xf32>
    %39 = vector.broadcast %4 : vector<64x1xf32> to vector<64x512xf32>
    %40 = arith.addf %38, %39 : vector<64x512xf32>
    %cst_26 = arith.constant 0.000000e+00 : f32
    %41 = vector.broadcast %cst_26 : f32 to vector<64x512xf32>
    %42 = arith.maximumf %40, %41 : vector<64x512xf32>
    %cst_27 = arith.constant dense<0.000000e+00> : vector<64x512xf32>
    %43 = tpu.matmul %2, %42, %cst_27 {dimension_numbers = #tpu.dot_dimension_numbers<[1], [0], [0], [1], [0, 0, 1, 1], [], []>} : vector<64x64xf32>, vector<64x512xf32>, vector<64x512xf32> -> vector<64x512xf32>
    %44 = vector.broadcast %5 : vector<64x1xf32> to vector<64x512xf32>
    %45 = arith.addf %43, %44 : vector<64x512xf32>
    %cst_28 = arith.constant 0.000000e+00 : f32
    %46 = vector.broadcast %cst_28 : f32 to vector<64x512xf32>
    %47 = arith.maximumf %45, %46 : vector<64x512xf32>
    %cst_29 = arith.constant dense<0.000000e+00> : vector<1x512xf32>
    %48 = tpu.matmul %3, %47, %cst_29 {dimension_numbers = #tpu.dot_dimension_numbers<[1], [0], [0], [1], [0, 0, 1, 1], [], []>} : vector<1x64xf32>, vector<64x512xf32>, vector<1x512xf32> -> vector<1x512xf32>
    %49 = vector.broadcast %6 : vector<1x1xf32> to vector<1x512xf32>
    %50 = arith.addf %48, %49 : vector<1x512xf32>
    %c0_30 = arith.constant 0 : index
    %51 = arith.index_cast %31 : i32 to index
    %52 = vector.load %arg10[%c0_30, %51] : memref<1x2048xf32, #tpu.memory_space<vmem>>, vector<1x512xf32>
    tpu.vector_store %arg10[%c0_30, %51], %50 {strides = array<i32>} : memref<1x2048xf32, #tpu.memory_space<vmem>>, vector<1x512xf32>,
    %c2_i32 = arith.constant 2 : i32
    %c512_i32_31 = arith.constant 512 : i32
    %53 = arith.muli %c2_i32, %c512_i32_31 : i32
    %54 = tpu.assume_multiple %53, 512 : i32
    %c0_32 = arith.constant 0 : index
    %55 = arith.index_cast %54 : i32 to index
    %56 = vector.load %arg1[%c0_32, %55] : memref<4x2048xf32, #tpu.memory_space<vmem>>, vector<4x512xf32>
    %c0_33 = arith.constant 0 : index
    %57 = arith.index_cast %54 : i32 to index
    %58 = vector.load %arg2[%c0_33, %57] : memref<6x2048xf32, #tpu.memory_space<vmem>>, vector<6x512xf32>
    %cst_34 = arith.constant dense<0.000000e+00> : vector<64x512xf32>
    %59 = tpu.matmul %0, %56, %cst_34 {dimension_numbers = #tpu.dot_dimension_numbers<[1], [0], [0], [1], [0, 0, 1, 1], [], []>} : vector<64x4xf32>, vector<4x512xf32>, vector<64x512xf32> -> vector<64x512xf32>
    %cst_35 = arith.constant dense<0.000000e+00> : vector<64x512xf32>
    %60 = tpu.matmul %1, %58, %cst_35 {dimension_numbers = #tpu.dot_dimension_numbers<[1], [0], [0], [1], [0, 0, 1, 1], [], []>} : vector<64x6xf32>, vector<6x512xf32>, vector<64x512xf32> -> vector<64x512xf32>
    %61 = arith.addf %59, %60 : vector<64x512xf32>
    %62 = vector.broadcast %4 : vector<64x1xf32> to vector<64x512xf32>
    %63 = arith.addf %61, %62 : vector<64x512xf32>
    %cst_36 = arith.constant 0.000000e+00 : f32
    %64 = vector.broadcast %cst_36 : f32 to vector<64x512xf32>
    %65 = arith.maximumf %63, %64 : vector<64x512xf32>
    %cst_37 = arith.constant dense<0.000000e+00> : vector<64x512xf32>
    %66 = tpu.matmul %2, %65, %cst_37 {dimension_numbers = #tpu.dot_dimension_numbers<[1], [0], [0], [1], [0, 0, 1, 1], [], []>} : vector<64x64xf32>, vector<64x512xf32>, vector<64x512xf32> -> vector<64x512xf32>
    %67 = vector.broadcast %5 : vector<64x1xf32> to vector<64x512xf32>
    %68 = arith.addf %66, %67 : vector<64x512xf32>
    %cst_38 = arith.constant 0.000000e+00 : f32
    %69 = vector.broadcast %cst_38 : f32 to vector<64x512xf32>
    %70 = arith.maximumf %68, %69 : vector<64x512xf32>
    %cst_39 = arith.constant dense<0.000000e+00> : vector<1x512xf32>
    %71 = tpu.matmul %3, %70, %cst_39 {dimension_numbers = #tpu.dot_dimension_numbers<[1], [0], [0], [1], [0, 0, 1, 1], [], []>} : vector<1x64xf32>, vector<64x512xf32>, vector<1x512xf32> -> vector<1x512xf32>
    %72 = vector.broadcast %6 : vector<1x1xf32> to vector<1x512xf32>
    %73 = arith.addf %71, %72 : vector<1x512xf32>
    %c0_40 = arith.constant 0 : index
    %74 = arith.index_cast %54 : i32 to index
    %75 = vector.load %arg10[%c0_40, %74] : memref<1x2048xf32, #tpu.memory_space<vmem>>, vector<1x512xf32>
    tpu.vector_store %arg10[%c0_40, %74], %73 {strides = array<i32>} : memref<1x2048xf32, #tpu.memory_space<vmem>>, vector<1x512xf32>,
    %c3_i32 = arith.constant 3 : i32
    %c512_i32_41 = arith.constant 512 : i32
    %76 = arith.muli %c3_i32, %c512_i32_41 : i32
    %77 = tpu.assume_multiple %76, 512 : i32
    %c0_42 = arith.constant 0 : index
    %78 = arith.index_cast %77 : i32 to index
    %79 = vector.load %arg1[%c0_42, %78] : memref<4x2048xf32, #tpu.memory_space<vmem>>, vector<4x512xf32>
    %c0_43 = arith.constant 0 : index
    %80 = arith.index_cast %77 : i32 to index
    %81 = vector.load %arg2[%c0_43, %80] : memref<6x2048xf32, #tpu.memory_space<vmem>>, vector<6x512xf32>
    %cst_44 = arith.constant dense<0.000000e+00> : vector<64x512xf32>
    %82 = tpu.matmul %0, %79, %cst_44 {dimension_numbers = #tpu.dot_dimension_numbers<[1], [0], [0], [1], [0, 0, 1, 1], [], []>} : vector<64x4xf32>, vector<4x512xf32>, vector<64x512xf32> -> vector<64x512xf32>
    %cst_45 = arith.constant dense<0.000000e+00> : vector<64x512xf32>
    %83 = tpu.matmul %1, %81, %cst_45 {dimension_numbers = #tpu.dot_dimension_numbers<[1], [0], [0], [1], [0, 0, 1, 1], [], []>} : vector<64x6xf32>, vector<6x512xf32>, vector<64x512xf32> -> vector<64x512xf32>
    %84 = arith.addf %82, %83 : vector<64x512xf32>
    %85 = vector.broadcast %4 : vector<64x1xf32> to vector<64x512xf32>
    %86 = arith.addf %84, %85 : vector<64x512xf32>
    %cst_46 = arith.constant 0.000000e+00 : f32
    %87 = vector.broadcast %cst_46 : f32 to vector<64x512xf32>
    %88 = arith.maximumf %86, %87 : vector<64x512xf32>
    %cst_47 = arith.constant dense<0.000000e+00> : vector<64x512xf32>
    %89 = tpu.matmul %2, %88, %cst_47 {dimension_numbers = #tpu.dot_dimension_numbers<[1], [0], [0], [1], [0, 0, 1, 1], [], []>} : vector<64x64xf32>, vector<64x512xf32>, vector<64x512xf32> -> vector<64x512xf32>
    %90 = vector.broadcast %5 : vector<64x1xf32> to vector<64x512xf32>
    %91 = arith.addf %89, %90 : vector<64x512xf32>
    %cst_48 = arith.constant 0.000000e+00 : f32
    %92 = vector.broadcast %cst_48 : f32 to vector<64x512xf32>
    %93 = arith.maximumf %91, %92 : vector<64x512xf32>
    %cst_49 = arith.constant dense<0.000000e+00> : vector<1x512xf32>
    %94 = tpu.matmul %3, %93, %cst_49 {dimension_numbers = #tpu.dot_dimension_numbers<[1], [0], [0], [1], [0, 0, 1, 1], [], []>} : vector<1x64xf32>, vector<64x512xf32>, vector<1x512xf32> -> vector<1x512xf32>
    %95 = vector.broadcast %6 : vector<1x1xf32> to vector<1x512xf32>
    %96 = arith.addf %94, %95 : vector<1x512xf32>
    %c0_50 = arith.constant 0 : index
    %97 = arith.index_cast %77 : i32 to index
    %98 = vector.load %arg10[%c0_50, %97] : memref<1x2048xf32, #tpu.memory_space<vmem>>, vector<1x512xf32>
    tpu.vector_store %arg10[%c0_50, %97], %96 {strides = array<i32>} : memref<1x2048xf32, #tpu.memory_space<vmem>>, vector<1x512xf32>,
    %c4_i32 = arith.constant 4 : i32
    return
  }
  func.func @transform_0(%arg0: i32) -> (i32, i32) {
    %c0_i32 = arith.constant 0 : i32
    %c0_i32_0 = arith.constant 0 : i32
    return %c0_i32, %arg0 : i32, i32
  }
  func.func @transform_1(%arg0: i32) -> (i32, i32) {
    %c0_i32 = arith.constant 0 : i32
    %c0_i32_0 = arith.constant 0 : i32
    return %c0_i32, %arg0 : i32, i32
  }
  func.func @transform_2(%arg0: i32) -> (i32, i32) {
    %c0_i32 = arith.constant 0 : i32
    %c0_i32_0 = arith.constant 0 : i32
    %c0_i32_1 = arith.constant 0 : i32
    return %c0_i32, %c0_i32_0 : i32, i32
  }
  func.func @transform_3(%arg0: i32) -> (i32, i32) {
    %c0_i32 = arith.constant 0 : i32
    %c0_i32_0 = arith.constant 0 : i32
    %c0_i32_1 = arith.constant 0 : i32
    return %c0_i32, %c0_i32_0 : i32, i32
  }
  func.func @transform_4(%arg0: i32) -> (i32, i32) {
    %c0_i32 = arith.constant 0 : i32
    %c0_i32_0 = arith.constant 0 : i32
    %c0_i32_1 = arith.constant 0 : i32
    return %c0_i32, %c0_i32_0 : i32, i32
  }
  func.func @transform_5(%arg0: i32) -> (i32, i32) {
    %c0_i32 = arith.constant 0 : i32
    %c0_i32_0 = arith.constant 0 : i32
    %c0_i32_1 = arith.constant 0 : i32
    return %c0_i32, %c0_i32_0 : i32, i32
  }
  func.func @transform_6(%arg0: i32) -> (i32, i32) {
    %c0_i32 = arith.constant 0 : i32
    %c0_i32_0 = arith.constant 0 : i32
    %c0_i32_1 = arith.constant 0 : i32
    return %c0_i32, %c0_i32_0 : i32, i32
  }
  func.func @transform_7(%arg0: i32) -> (i32, i32) {
    %c0_i32 = arith.constant 0 : i32
    %c0_i32_0 = arith.constant 0 : i32
    %c0_i32_1 = arith.constant 0 : i32
    return %c0_i32, %c0_i32_0 : i32, i32
  }
  func.func @transform_8(%arg0: i32) -> (i32, i32) {
    %c0_i32 = arith.constant 0 : i32
    %c0_i32_0 = arith.constant 0 : i32
    %c0_i32_1 = arith.constant 0 : i32
    return %c0_i32, %c0_i32_0 : i32, i32
  }
  func.func @transform_9(%arg0: i32) -> (i32, i32) {
    %c0_i32 = arith.constant 0 : i32
    %c0_i32_0 = arith.constant 0 : i32
    return %c0_i32, %arg0 : i32, i32
  }
}

</mosaic_0001>

<bundles_post_ra>
// kernel: tpu_custom_call.1
= control target key start
LH: loop header
LB: loop body
LE: loop exit
PB: predicated region body
PF: predicated region fallthrough
CT: control target
= control target key end

     0   :  { %s6933_s0 = inlined_call_operand.vmem [shape: f32[4,2500], index: 0, kind: input, shape index: {}]   ;;  %s6934_s1 = inlined_call_operand.vmem [shape: f32[6,2500], index: 1, kind: input, shape index: {}]   ;;  %s6935_s2 = inlined_call_operand.vmem [shape: f32[64,4], index: 2, kind: input, shape index: {}]   ;;  %s6936_s3 = inlined_call_operand.vmem [shape: f32[64,6], index: 3, kind: input, shape index: {}]   ;;  %s6937_s4 = inlined_call_operand.vmem [shape: f32[64,1], index: 4, kind: input, shape index: {}]   ;;  %s6938_s5 = inlined_call_operand.hbm [shape: f32[64,64], index: 5, kind: input, shape index: {}]   ;;  %s6939_s6 = inlined_call_operand.vmem [shape: f32[64,1], index: 6, kind: input, shape index: {}]   ;;  %s6940_s7 = inlined_call_operand.vmem [shape: f32[1,64], index: 7, kind: input, shape index: {}]   ;;  %s6941_s8 = inlined_call_operand.<no memory space> [shape: f32[1,1], index: 8, kind: input, shape index: {}]   ;;  %s6942_s9 = inlined_call_operand.hbm [shape: f32[1,2500], index: 9, kind: output, shape index: {}]  }
   0x1   :  { %v14_v0 = vstv %s6941_s8 }
   0x2   :  { %15 = vst [vmem:[#allocation2] sm:$0x1] %v14_v0 }
   0x3   :  { %16 = vsyncpa [#allocation4], 0 }
   0x4   :  { %17 = vsyncpa [#allocation5], 0 }
   0x5   :  { %19 = vsyncpa [#allocation5 + $0x1], 0  ;;  %s5164_s11 = smov 0   ;;  %s5166_s12 = smov 0  }
   0x6   :  { %s5168_s13 = smov 0   ;;  %s5170_s14 = smov 0  }
   0x7 LB: > { %s5185_s8 = sadd.s32 4294967295, %s5102_s14   ;;  %s4648_s15 = sadd.s32 4294967294, %s5102_s14   ;;  %s5102_s14 = sphi %s5170_s14, %s7339_s14   ;;  %s5098_s13 = sphi %s5168_s13, %s7338_s13   ;;  %s5094_s12 = sphi %s5166_s12, %s7337_s12   ;;  %s5090_s11 = sphi %s5164_s11, %s7336_s11  }
   0x8   : > { %s5189_s16 = sadd.s32 1, %s5102_s14   ;;  %s231_s17 = sadd.s32 1, %s5098_s13 }
   0x9   : > { %s228_s18 = ssub.s32 %s5102_s14, %s5189_s16  ;;  %p241_p0 = scmp.ne.s32.totalorder %s5098_s13, %s5094_s12 }
   0xa   : > { %p229_p1 = scmp.eq.s32.totalorder %s228_s18, 0  ;;  %p242_p2 = scmp.eq.s32.totalorder %s5185_s8, 1 }
   0xb   : > { %p247_p3 = scmp.ne.s32.totalorder %s5094_s12, %s5090_s11  ;;  %p248_p4 = scmp.eq.s32.totalorder %s4648_s15, 1 }
   0xc   : > { %s5200_s19 = scalar_select %p229_p1, %s5098_s13, %s231_s17  }
   0xd   : > { %p5202_p5 = por %p242_p2, %p241_p0  ;;  %p5206_p6 = por %p248_p4, %p247_p3 }
   0xe   : > { %p4649_p7 = scmp.ge.s32.totalorder %s5102_s14, 1  ;;  %p255_p8 = scmp.lt.s32.totalorder %s5102_s14, 3 }
   0xf   : > { %s7118_s21 = scalar_select %p5206_p6, 1, 0 }
  0x10   : > { %p4933_p9 = scmp.eq.s32.totalorder %s5185_s8, 0  ;;  %p5213_p10 = pnand %p4649_p7, %p255_p8 }
  0x11   : > { %s5104_s23 = smov [#allocation3]  }
  0x12   : > { %s276_s24 = sshll.u32 %s5104_s23, 4  ;;  %p4925_p11 = pneg %p5213_p10  ;;  %s277_s24 = int_to_ptr.vmem [resolvable:$true] %s276_s24 }
  0x13   : > { %s5023_s25 = scalar_lea.vmem %s277_s24, 1024  ;;  %p5031_p3 = scmp.lt.s32.totalorder %s277_s24, %s277_s24 }
  0x14   : > { %p4926_p12 = pnand %p4933_p9, %p4925_p11  ;;  %p5024_p0 = scmp.ne.s32.totalorder %s277_s24, %s5023_s25 }
  0x15   : > { %p5032_p4 = scmp.lt.s32.totalorder %s5023_s25, %s5023_s25 }
  0x16   : > { %p5014_p13 = pneg %p4926_p12 }
  0x17   : > { %p5033_p6 = por %p5032_p4, %p5031_p3 }
  0x18   : > { %p5026_p1 = pnand %p5024_p0, %p5014_p13 }
  0x1a   : > { %p5027_p2 = pneg %p5026_p1 }
  0x1c   : > { %p5034_p7 = pnand %p5033_p6, %p5027_p2 }
  0x1e   : > { %5037 = shalt.err (!%p5034_p7)
}
  0x1f   : > { %s5105_s26 = smov 128   ;;  %s5106_s27 = smov 8  }
  0x20   : > { %4928 = dma.hbm_to_vmem [thread:$0]  (!%p4926_p12), %s6938_s5, 1024, %s277_s24, [#allocation4], %s5105_s26, %s5105_s26, %s5106_s27  }
  0x21   : > { %335 = sbr.rel (%p5213_p10) target bundleno = 2373 (0x945), region = 56 }
  0x26   : > { %5081 = dma.done.wait (%p4933_p9), [#allocation4], 1024  }
  0x27   : > { %5083 = vsyncadd (%p4933_p9), [#allocation4], 4294966272  ;;  %s5231_s30 = sshll.u32 %s5185_s8, 4  ;;  %v6943_v1 = vmov 0.0   ;;  %v5108_v2 = vmov 0   ;;  %vm490_vm0 = vcmask 1045504  }
  0x28   : > { %p389_p6 = scmp.lt.s32.totalorder %s5231_s30, 19  ;;  %567 = vmatprep.mubr.f32.mxu0 %v6943_v1  ;;  %680 = vmatprep.mubr.f32.mxu1 %v6943_v1  ;;  %vm465_vm1 = vcmask 48128   ;;  %v425_v7 = vld [vmem:[%s6936_s3] sm:$0xff]  ;;  %vm758_vm2 = vcmask 1043456   ;;  %v426_v10 = vld [vmem:[%s6936_s3 + $0x8] sm:$0xff]  ;;  %v449_v14 = vld [vmem:[%s6937_s4 + $0x38] sm:$0xff] }
  0x29   : > { %4975 = vset.pattern.permute.xlu1 %v5108_v2  ;;  %4974 = vset.pattern.permute.xlu0 %v5108_v2  ;;  %v447_v13 = vld [vmem:[%s6937_s4 + $0x28] sm:$0xff]  ;;  %v5282_v15 = vld [vmem:[%s6936_s3 + $0x10] sm:$0xff]  ;;  %v446_v16 = vld [vmem:[%s6937_s4 + $0x20] sm:$0xff]  ;;  %vm733_vm3 = vcmask 31744   ;;  %vm1137_vm4 = vcmask 523264   ;;  %s381_s29 = sand.u32 1, %s5094_s12  }
  0x2a   : > { %s390_s10 = scalar_select %p389_p6, %s5231_s30, 19  ;;  %7120 = vst [vmem:[#allocation9_spill] sm:$0xff] %v5282_v15  ;;  %1020 = vperm.xlu1 %4975, %v447_v13   ;;  %1030 = vperm.xlu0 %4974, %v449_v14   ;;  %v448_v17 = vld [vmem:[%s6937_s4 + $0x30] sm:$0xff]  ;;  %v5301_v18 = vld [vmem:[%s6936_s3 + $0x18] sm:$0xff]  ;;  %v5318_v21 = vld [vmem:[%s6936_s3 + $0x20] sm:$0xff] }
  0x2b   : > { %7121 = vst [vmem:[#allocation10_spill] sm:$0xff] %v5301_v18  ;;  %v444_v19 = vld [vmem:[%s6937_s4 + $0x10] sm:$0xff]  ;;  %v445_v20 = vld [vmem:[%s6937_s4 + $0x18] sm:$0xff]  ;;  %7122 = vst [vmem:[#allocation11_spill] sm:$0xff] %v5318_v21  ;;  %s4554_s18 = ssub.s32 (%p5202_p5), 20, %s5231_s30 }
  0x2c   : > { %s4658_s15 = sshll.u32 %s390_s10, 3  ;;  %s4656_s17 = sshll.u32 %s390_s10, 2  ;;  %v442_v22 = vld [vmem:[%s6937_s4] sm:$0xff]  ;;  %v443_v23 = vld [vmem:[%s6937_s4 + $0x8] sm:$0xff]  ;;  %v457_v25 = vld [vmem:[%s6939_s6 + $0x38] sm:$0xff] }
  0x2d   : > { %s5240_s23 = scalar_lea.vmem %s6934_s1, %s4658_s15  ;;  %s5248_s26 = scalar_lea.vmem %s6933_s0, %s4656_s17  ;;  %v5335_v24 = vld [vmem:[%s6936_s3 + $0x28] sm:$0xff]  ;;  %v456_v26 = vld [vmem:[%s6939_s6 + $0x30] sm:$0xff]  ;;  %v454_v29 = vld [vmem:[%s6939_s6 + $0x20] sm:$0xff] }
  0x2e   : > { %v462_v3 = vld [vmem:[%s5240_s23 + $0x8] sm:$0x3f]  ;;  %v464_v4 = vld [vmem:[%s5240_s23 + $0x18] sm:$0x3f]  ;;  %v461_v5 = vld [vmem:[%s5240_s23] sm:$0x3f]  ;;  %1015 = vperm.xlu1 %4975, %v446_v16   ;;  %1025 = vperm.xlu0 %4974, %v448_v17  }
  0x2f   : > { %4659 = vmatprep.subr.msk.mxu0 %vm490_vm0, %v462_v3  ;;  %4669 = vmatprep.subr.msk.mxu1 %vm490_vm0, %v464_v4  ;;  %v463_v6 = vld [vmem:[%s5240_s23 + $0x10] sm:$0x3f]  ;;  %v459_v8 = vld [vmem:[%s5248_s26] sm:$0xff]  ;;  %v460_v9 = vld [vmem:[%s5248_s26 + $0x8] sm:$0xff]  ;;  %7123 = vst [vmem:[#allocation12_spill] sm:$0xff] %v5335_v24  ;;  %s4654_s10 = sshll.u32 %s381_s29, 4 }
  0x30   : > { %4660 = vmatpush1.msk.msra.mxu0 %vm490_vm0, %v461_v5  ;;  %4670 = vmatpush1.msk.msra.mxu1 %vm490_vm0, %v463_v6  ;;  %v731_v11 = vcombine.high %v459_v8, %v459_v8  ;;  %v732_v12 = vcombine.high %v460_v9, %v460_v9  ;;  %v5352_v27 = vld [vmem:[%s6936_s3 + $0x30] sm:$0xff]  ;;  %v455_v28 = vld [vmem:[%s6939_s6 + $0x28] sm:$0xff]  ;;  %v5369_v30 = vld [vmem:[%s6936_s3 + $0x38] sm:$0xff]  ;;  %s5905_s15 = scalar_lea.vmem [#allocation6], %s4654_s10  ;;  %s6885_s17 = scalar_lea.sflag [#allocation5], %s381_s29 }
  0x31   : > { %4661 = vmatmul.mubr.msk.f32.vlgmr.msra.gmra.mxu0 %vm465_vm1, %v425_v7  ;;  %4671 = vmatmul.mubr.msk.f32.vlgmr.msra.gmra.mxu1 %vm465_vm1, %v425_v7  ;;  %7124 = vst [vmem:[#allocation13_spill] sm:$0xff] %v5352_v27  ;;  %7125 = vst [vmem:[#allocation14_spill] sm:$0xff] %v5369_v30  ;;  %v453_v31 = vld [vmem:[%s6939_s6 + $0x18] sm:$0xff]  ;;  %v452_v32 = vld [vmem:[%s6939_s6 + $0x10] sm:$0xff]  ;;  %p4555_p8 = scmp.lt.s32.totalorder (%p5202_p5), %s4554_s18, 16 }
  0x32   : > { %573 = vmatprep.mubr.f32.mxu0 %v6943_v1  ;;  %686 = vmatprep.mubr.f32.mxu1 %v6943_v1  ;;  %v5386_v33 = vld [vmem:[%s6935_s2] sm:$0xff]  ;;  %v451_v34 = vld [vmem:[%s6939_s6 + $0x8] sm:$0xff]  ;;  %v5414_v38 = vld [vmem:[%s6935_s2 + $0x10] sm:$0xff] }
  0x33   : > { %4679 = vmatprep.subr.msk.mxu0 %vm758_vm2, %v731_v11  ;;  %4689 = vmatprep.subr.msk.mxu1 %vm758_vm2, %v732_v12  ;;  %7126 = vst [vmem:[#allocation15_spill] sm:$0xff] %v5386_v33  ;;  %v450_v35 = vld [vmem:[%s6939_s6] sm:$0xff]  ;;  %v5403_v36 = vld [vmem:[%s6935_s2 + $0x8] sm:$0xff]  ;;  %7128 = vst [vmem:[#allocation17_spill] sm:$0xff] %v5414_v38 }
  0x34   : > { %4680 = vmatpush1.msk.msra.mxu0 %vm758_vm2, %v459_v8  ;;  %4690 = vmatpush1.msk.msra.mxu1 %vm758_vm2, %v460_v9  ;;  %7127 = vst [vmem:[#allocation16_spill] sm:$0xff] %v5403_v36  ;;  %v458_v37 = vld [vmem:[#allocation2] sm:$0x1]  ;;  %v5425_v39 = vld [vmem:[%s6935_s2 + $0x18] sm:$0xff]  ;;  %v5447_v41 = vld [vmem:[%s6935_s2 + $0x28] sm:$0xff] }
  0x35   : > { %4662 = vmatmul.mubr.msk.f32.gmra.mxu0 %vm465_vm1, %v426_v10  ;;  %4672 = vmatmul.mubr.msk.f32.gmra.mxu1 %vm465_vm1, %v426_v10  ;;  %7129 = vst [vmem:[#allocation18_spill] sm:$0xff] %v5425_v39  ;;  %v5436_v40 = vld [vmem:[%s6935_s2 + $0x20] sm:$0xff]  ;;  %7131 = vst [vmem:[#allocation20_spill] sm:$0xff] %v5447_v41  ;;  %v5458_v42 = vld [vmem:[%s6935_s2 + $0x30] sm:$0xff] }
  0x36   : > { %579 = vmatprep.mubr.f32.mxu0 %v6943_v1  ;;  %692 = vmatprep.mubr.f32.mxu1 %v6943_v1  ;;  %7130 = vst [vmem:[#allocation19_spill] sm:$0xff] %v5436_v40  ;;  %7132 = vst [vmem:[#allocation21_spill] sm:$0xff] %v5458_v42  ;;  %v5469_v43 = vld [vmem:[%s6935_s2 + $0x38] sm:$0xff] }
  0x37   : > { %1005 = vperm.xlu1 %4975, %v444_v19   ;;  %1010 = vperm.xlu0 %4974, %v445_v20   ;;  %7133 = vst [vmem:[#allocation22_spill] sm:$0xff] %v5469_v43 }
  0x39   : > { %4663 = vmatmul.mubr.msk.f32.gmra.mxu0 %vm465_vm1, %v5282_v15  ;;  %4673 = vmatmul.mubr.msk.f32.gmra.mxu1 %vm465_vm1, %v5282_v15 }
  0x3a   : > { %585 = vmatprep.mubr.f32.mxu0 %v6943_v1  ;;  %698 = vmatprep.mubr.f32.mxu1 %v6943_v1 }
  0x3b   : > { %995 = vperm.xlu1 %4975, %v442_v22   ;;  %1000 = vperm.xlu0 %4974, %v443_v23  }
  0x3d   : > { %4664 = vmatmul.mubr.msk.f32.gmra.mxu0 %vm465_vm1, %v5301_v18  ;;  %4674 = vmatmul.mubr.msk.f32.gmra.mxu1 %vm465_vm1, %v5301_v18 }
  0x3e   : > { %591 = vmatprep.mubr.f32.mxu0 %v6943_v1  ;;  %704 = vmatprep.mubr.f32.mxu1 %v6943_v1 }
  0x3f   : > { %1134 = vperm.xlu0 %4974, %v457_v25   ;;  %1129 = vperm.xlu1 %4975, %v456_v26  }
  0x41   : > { %4665 = vmatmul.mubr.msk.f32.gmra.mxu0 %vm465_vm1, %v5318_v21  ;;  %4675 = vmatmul.mubr.msk.f32.gmra.mxu1 %vm465_vm1, %v5318_v21 }
  0x42   : > { %597 = vmatprep.mubr.f32.mxu0 %v6943_v1  ;;  %710 = vmatprep.mubr.f32.mxu1 %v6943_v1 }
  0x43   : > { %1124 = vperm.xlu0 %4974, %v455_v28   ;;  %1119 = vperm.xlu1 %4975, %v454_v29  }
  0x45   : > { %4666 = vmatmul.mubr.msk.f32.gmra.mxu0 %vm465_vm1, %v5335_v24  ;;  %4676 = vmatmul.mubr.msk.f32.gmra.mxu1 %vm465_vm1, %v5335_v24 }
  0x46   : > { %603 = vmatprep.mubr.f32.mxu0 %v6943_v1  ;;  %716 = vmatprep.mubr.f32.mxu1 %v6943_v1 }
  0x47   : > { %1114 = vperm.xlu0 %4974, %v453_v31   ;;  %1109 = vperm.xlu1 %4975, %v452_v32  }
  0x49   : > { %4667 = vmatmul.mubr.msk.f32.gmra.mxu0 %vm465_vm1, %v5352_v27  ;;  %4677 = vmatmul.mubr.msk.f32.gmra.mxu1 %vm465_vm1, %v5352_v27 }
  0x4a   : > { %609 = vmatprep.mubr.f32.mxu0 %v6943_v1  ;;  %722 = vmatprep.mubr.f32.mxu1 %v6943_v1 }
  0x4b   : > { %1104 = vperm.xlu0 %4974, %v451_v34   ;;  %1099 = vperm.xlu1 %4975, %v450_v35  }
  0x4d   : > { %4668 = vmatmul.mubr.msk.f32.gmra.mxu0 %vm465_vm1, %v5369_v30  ;;  %4678 = vmatmul.mubr.msk.f32.gmra.mxu1 %vm465_vm1, %v5369_v30 }
  0x4e   : > { %831 = vmatprep.mubr.f32.mxu0 %v6943_v1  ;;  %944 = vmatprep.mubr.f32.mxu1 %v6943_v1 }
  0x4f   : > { %1422 = vperm.xlu0 %4974, %v458_v37  }
  0x51   : > { %4681 = vmatmul.mubr.msk.f32.vlgmr.msra.gmra.mxu0 %vm733_vm3, %v5386_v33  ;;  %4691 = vmatmul.mubr.msk.f32.vlgmr.msra.gmra.mxu1 %vm733_vm3, %v5386_v33 }
  0x52   : > { %837 = vmatprep.mubr.f32.mxu0 %v6943_v1  ;;  %950 = vmatprep.mubr.f32.mxu1 %v6943_v1 }
  0x55   : > { %4682 = vmatmul.mubr.msk.f32.gmra.mxu0 %vm733_vm3, %v5403_v36  ;;  %4692 = vmatmul.mubr.msk.f32.gmra.mxu1 %vm733_vm3, %v5403_v36 }
  0x56   : > { %843 = vmatprep.mubr.f32.mxu0 %v6943_v1  ;;  %956 = vmatprep.mubr.f32.mxu1 %v6943_v1 }
  0x59   : > { %4683 = vmatmul.mubr.msk.f32.gmra.mxu0 %vm733_vm3, %v5414_v38  ;;  %4693 = vmatmul.mubr.msk.f32.gmra.mxu1 %vm733_vm3, %v5414_v38 }
  0x5a   : > { %849 = vmatprep.mubr.f32.mxu0 %v6943_v1  ;;  %962 = vmatprep.mubr.f32.mxu1 %v6943_v1 }
  0x5d   : > { %4684 = vmatmul.mubr.msk.f32.gmra.mxu0 %vm733_vm3, %v5425_v39  ;;  %4694 = vmatmul.mubr.msk.f32.gmra.mxu1 %vm733_vm3, %v5425_v39 }
  0x5e   : > { %855 = vmatprep.mubr.f32.mxu0 %v6943_v1  ;;  %968 = vmatprep.mubr.f32.mxu1 %v6943_v1 }
  0x61   : > { %4685 = vmatmul.mubr.msk.f32.gmra.mxu0 %vm733_vm3, %v5436_v40  ;;  %4695 = vmatmul.mubr.msk.f32.gmra.mxu1 %vm733_vm3, %v5436_v40 }
  0x62   : > { %861 = vmatprep.mubr.f32.mxu0 %v6943_v1  ;;  %974 = vmatprep.mubr.f32.mxu1 %v6943_v1 }
  0x65   : > { %4686 = vmatmul.mubr.msk.f32.gmra.mxu0 %vm733_vm3, %v5447_v41  ;;  %4696 = vmatmul.mubr.msk.f32.gmra.mxu1 %vm733_vm3, %v5447_v41 }
  0x66   : > { %867 = vmatprep.mubr.f32.mxu0 %v6943_v1  ;;  %980 = vmatprep.mubr.f32.mxu1 %v6943_v1 }
  0x69   : > { %4687 = vmatmul.mubr.msk.f32.gmra.mxu0 %vm733_vm3, %v5458_v42  ;;  %4697 = vmatmul.mubr.msk.f32.gmra.mxu1 %vm733_vm3, %v5458_v42 }
  0x6a   : > { %873 = vmatprep.mubr.f32.mxu0 %v6943_v1  ;;  %986 = vmatprep.mubr.f32.mxu1 %v6943_v1 }
  0x6d   : > { %4688 = vmatmul.mubr.msk.f32.gmra.mxu0 %vm733_vm3, %v5469_v43  ;;  %4698 = vmatmul.mubr.msk.f32.gmra.mxu1 %vm733_vm3, %v5469_v43 }
  0x6e   : > { %1226 = vmatprep.mubr.f32.mxu0 %v6943_v1  ;;  %1339 = vmatprep.mubr.f32.mxu1 %v6943_v1 }
  0xa5   : > { %v5497_v36 = vpop.permute.xlu0 %1030  ;;  %v5499_v27 = vpop.permute.xlu1 %1020 }
  0xa6   : > { %7140 = vst [vmem:[#allocation29_spill] sm:$0xff] %v5497_v36  ;;  %7141 = vst [vmem:[#allocation30_spill] sm:$0xff] %v5499_v27 }
  0xf1   : > { %v569_v44 = vpop.f32.mrf.mxu0  ;;  %v682_v45 = vpop.f32.mrf.mxu1 }
  0xf3   : > { %v571_v46 = vpop.f32.mrf.mxu0  ;;  %v684_v47 = vpop.f32.mrf.mxu1 }
  0xf5   : > { %v575_v48 = vpop.f32.mrf.mxu0  ;;  %v688_v49 = vpop.f32.mrf.mxu1 }
  0xf7   : > { %v577_v50 = vpop.f32.mrf.mxu0  ;;  %v690_v51 = vpop.f32.mrf.mxu1 }
  0xf9   : > { %v581_v52 = vpop.f32.mrf.mxu0  ;;  %v694_v53 = vpop.f32.mrf.mxu1 }
  0xfb   : > { %v583_v54 = vpop.f32.mrf.mxu0  ;;  %v696_v55 = vpop.f32.mrf.mxu1 }
  0xfd   : > { %v587_v56 = vpop.f32.mrf.mxu0  ;;  %v700_v57 = vpop.f32.mrf.mxu1 }
  0xff   : > { %v589_v58 = vpop.f32.mrf.mxu0  ;;  %v702_v59 = vpop.f32.mrf.mxu1 }
 0x101   : > { %v5477_v60 = vpop.f32.mrf.mxu0  ;;  %v5479_v61 = vpop.f32.mrf.mxu1 }
 0x102   : > { %7134 = vst [vmem:[#allocation23_spill] sm:$0xff] %v5477_v60  ;;  %7135 = vst [vmem:[#allocation24_spill] sm:$0xff] %v5479_v61 }
 0x103   : > { %v5481_v62 = vpop.f32.mrf.mxu0  ;;  %v5483_v63 = vpop.f32.mrf.mxu1 }
 0x105   : > { %v5485_v0 = vpop.f32.mrf.mxu0  ;;  %v5487_v2 = vpop.f32.mrf.mxu1 }
 0x106   : > { %7136 = vst [vmem:[#allocation25_spill] sm:$0xff] %v5485_v0  ;;  %7137 = vst [vmem:[#allocation26_spill] sm:$0xff] %v5487_v2 }
 0x107   : > { %v5489_v3 = vpop.f32.mrf.mxu0  ;;  %v5491_v4 = vpop.f32.mrf.mxu1 }
 0x109   : > { %v605_v5 = vpop.f32.mrf.mxu0  ;;  %v718_v6 = vpop.f32.mrf.mxu1 }
 0x10b   : > { %v607_v7 = vpop.f32.mrf.mxu0  ;;  %v720_v8 = vpop.f32.mrf.mxu1 }
 0x10d   : > { %v611_v9 = vpop.f32.mrf.mxu0  ;;  %v724_v10 = vpop.f32.mrf.mxu1 }
 0x10f   : > { %v5493_v11 = vpop.f32.mrf.mxu0  ;;  %v5495_v12 = vpop.f32.mrf.mxu1 }
 0x110   : > { %7138 = vst [vmem:[#allocation27_spill] sm:$0xff] %v5493_v11  ;;  %7139 = vst [vmem:[#allocation28_spill] sm:$0xff] %v5495_v12 }
 0x111   : > { %v833_v13 = vpop.f32.mrf.mxu0  ;;  %v946_v14 = vpop.f32.mrf.mxu1 }
 0x112   : > { %v5501_v24 = vadd.f32 %v833_v13, %v569_v44  ;;  %v5503_v21 = vadd.f32 %v946_v14, %v682_v45 }
 0x113   : > { %v835_v16 = vpop.f32.mrf.mxu0  ;;  %v948_v17 = vpop.f32.mrf.mxu1 }
 0x114   : > { %v5505_v18 = vadd.f32 %v835_v16, %v571_v46  ;;  %v5507_v15 = vadd.f32 %v948_v17, %v684_v47 }
 0x115   : > { %v839_v19 = vpop.f32.mrf.mxu0  ;;  %v952_v20 = vpop.f32.mrf.mxu1 }
 0x116   : > { %v5509_v61 = vadd.f32 %v839_v19, %v575_v48  ;;  %v5511_v60 = vadd.f32 %v952_v20, %v688_v49 }
 0x117   : > { %v841_v22 = vpop.f32.mrf.mxu0  ;;  %v954_v23 = vpop.f32.mrf.mxu1 }
 0x118   : > { %v5513_v2 = vadd.f32 %v841_v22, %v577_v50  ;;  %v5515_v0 = vadd.f32 %v954_v23, %v690_v51  ;;  %v5525_v50 = vpop.permute.xlu0 %1025 }
 0x119   : > { %v845_v25 = vpop.f32.mrf.mxu0  ;;  %v958_v26 = vpop.f32.mrf.mxu1  ;;  %7142 = vst [vmem:[#allocation31_spill] sm:$0xff] %v5525_v50 }
 0x11a   : > { %v5517_v11 = vadd.f32 %v845_v25, %v581_v52  ;;  %v5519_v44 = vadd.f32 %v958_v26, %v694_v53  ;;  %v7145_v26 = vld [vmem:[#allocation28_spill] sm:$0xff] }
 0x11b   : > { %v847_v28 = vpop.f32.mrf.mxu0  ;;  %v960_v29 = vpop.f32.mrf.mxu1 }
 0x11c   : > { %v5521_v45 = vadd.f32 %v847_v28, %v583_v54  ;;  %v5523_v46 = vadd.f32 %v960_v29, %v696_v55 }
 0x11d   : > { %v851_v31 = vpop.f32.mrf.mxu0  ;;  %v964_v32 = vpop.f32.mrf.mxu1 }
 0x11e   : > { %v852_v47 = vadd.f32 %v851_v31, %v587_v56  ;;  %v965_v13 = vadd.f32 %v964_v32, %v700_v57  ;;  %v5529_v56 = vpop.permute.xlu1 %1015 }
 0x11f   : > { %v853_v34 = vpop.f32.mrf.mxu0  ;;  %v966_v35 = vpop.f32.mrf.mxu1  ;;  %7143 = vst [vmem:[#allocation32_spill] sm:$0xff] %v5529_v56 }
 0x120   : > { %v854_v48 = vadd.f32 %v853_v34, %v589_v58  ;;  %v967_v14 = vadd.f32 %v966_v35, %v702_v59  ;;  %v7144_v59 = vld [vmem:[#allocation27_spill] sm:$0xff] }
 0x121   : > { %v857_v37 = vpop.f32.mrf.mxu0  ;;  %v970_v1 = vpop.f32.mrf.mxu1 }
 0x123   : > { %v859_v43 = vpop.f32.mrf.mxu0  ;;  %v972_v42 = vpop.f32.mrf.mxu1 }
 0x124   : > { %v860_v51 = vadd.f32 %v859_v43, %v5481_v62  ;;  %v973_v17 = vadd.f32 %v972_v42, %v5483_v63  ;;  %v7146_v62 = vld [vmem:[#allocation25_spill] sm:$0xff] }
 0x125   : > { %v863_v41 = vpop.f32.mrf.mxu0  ;;  %v976_v40 = vpop.f32.mrf.mxu1 }
 0x126   : > { %v864_v42 = vadd.f32 %v863_v41, %v7146_v62 }
 0x127   : > { %v865_v39 = vpop.f32.mrf.mxu0  ;;  %v978_v38 = vpop.f32.mrf.mxu1 }
 0x128   : > { %v866_v57 = vadd.f32 %v865_v39, %v5489_v3  ;;  %v979_v58 = vadd.f32 %v978_v38, %v5491_v4  ;;  %v7149_v3 = vld [vmem:[#allocation23_spill] sm:$0xff]  ;;  %v1053_v32 = vadd.f32 %v5499_v27, %v864_v42 }
 0x129   : > { %v869_v33 = vpop.f32.mrf.mxu0  ;;  %v982_v30 = vpop.f32.mrf.mxu1  ;;  %v858_v4 = vadd.f32 %v857_v37, %v7149_v3 }
 0x12a   : > { %v870_v53 = vadd.f32 %v869_v33, %v605_v5  ;;  %v983_v20 = vadd.f32 %v982_v30, %v718_v6  ;;  %v7148_v33 = vld [vmem:[#allocation29_spill] sm:$0xff]  ;;  %v1056_v28 = vadd.f32 %v5499_v27, %v979_v58 }
 0x12b   : > { %v871_v36 = vpop.f32.mrf.mxu0  ;;  %v984_v12 = vpop.f32.mrf.mxu1 }
 0x12c   : > { %v872_v52 = vadd.f32 %v871_v36, %v607_v7  ;;  %v985_v19 = vadd.f32 %v984_v12, %v720_v8  ;;  %v7147_v36 = vld [vmem:[#allocation26_spill] sm:$0xff]  ;;  %v7150_v8 = vld [vmem:[#allocation24_spill] sm:$0xff]  ;;  %v1057_v41 = vadd.f32 %v5525_v50, %v870_v53  ;;  %v1054_v12 = vadd.f32 %v5499_v27, %v866_v57 }
 0x12d   : > { %v875_v49 = vpop.f32.mrf.mxu0  ;;  %v988_v16 = vpop.f32.mrf.mxu1  ;;  %v977_v63 = vadd.f32 %v976_v40, %v7147_v36  ;;  %v1059_v40 = vadd.f32 %v5525_v50, %v983_v20  ;;  %v1049_v53 = vadd.f32 %v5529_v56, %v858_v4 }
 0x12e   : > { %v876_v54 = vadd.f32 %v875_v49, %v611_v9  ;;  %v989_v22 = vadd.f32 %v988_v16, %v724_v10  ;;  %v1058_v6 = vadd.f32 %v5525_v50, %v872_v52  ;;  %v1060_v7 = vadd.f32 %v5525_v50, %v985_v19  ;;  %v5547_v10 = vpop.permute.xlu0 %1010  ;;  %v5553_v49 = vpop.permute.xlu1 %1005 }
 0x12f   : > { %v877_v55 = vpop.f32.mrf.mxu0  ;;  %v990_v23 = vpop.f32.mrf.mxu1  ;;  %v971_v9 = vadd.f32 %v970_v1, %v7150_v8  ;;  %7151 = vst [vmem:[#allocation27_spill] sm:$0xff] %v5547_v10  ;;  %v1055_v34 = vadd.f32 %v5499_v27, %v977_v63  ;;  %7152 = vst [vmem:[#allocation28_spill] sm:$0xff] %v5553_v49  ;;  %v1050_v1 = vadd.f32 %v5529_v56, %v860_v51  ;;  %v1086_v51 = vmax.f32 %v1054_v12, 0.0 }
 0x130   : > { %v878_v25 = vadd.f32 %v877_v55, %v7144_v59  ;;  %v991_v43 = vadd.f32 %v990_v23, %v7145_v26  ;;  %v1061_v30 = vadd.f32 %v7148_v33, %v876_v54  ;;  %v1063_v5 = vadd.f32 %v7148_v33, %v989_v22 }
 0x131   : > { %v1052_v16 = vadd.f32 %v5529_v56, %v973_v17  ;;  %v1090_v52 = vmax.f32 %v1058_v6, 0.0  ;;  %v1092_v19 = vmax.f32 %v1060_v7, 0.0  ;;  %v1051_v20 = vadd.f32 %v5529_v56, %v971_v9 }
 0x132   : > { %v1062_v39 = vadd.f32 %v7148_v33, %v878_v25  ;;  %v1064_v38 = vadd.f32 %v7148_v33, %v991_v43  ;;  %v1093_v35 = vmax.f32 %v1061_v30, 0.0  ;;  %v1095_v37 = vmax.f32 %v1063_v5, 0.0  ;;  %v5563_v26 = vpop.permute.xlu0 %1000  ;;  %v5573_v63 = vpop.permute.xlu1 %995 }
 0x133   : > { %v1089_v54 = vmax.f32 %v1057_v41, 0.0  ;;  %v1091_v22 = vmax.f32 %v1059_v40, 0.0  ;;  %v1046_v55 = vadd.f32 %v5547_v10, %v854_v48  ;;  %v1048_v23 = vadd.f32 %v5547_v10, %v967_v14  ;;  %7153 = vst [vmem:[#allocation25_spill] sm:$0xff] %v5563_v26  ;;  %7154 = vst [vmem:[#allocation26_spill] sm:$0xff] %v5573_v63 }
 0x134   : > { %v1094_v29 = vmax.f32 %v1062_v39, 0.0  ;;  %v1096_v31 = vmax.f32 %v1064_v38, 0.0  ;;  %v1088_v17 = vmax.f32 %v1056_v28, 0.0  ;;  %v1045_v57 = vadd.f32 %v5547_v10, %v852_v47 }
 0x135   : > { %v1047_v58 = vadd.f32 %v5547_v10, %v965_v13  ;;  %v1085_v59 = vmax.f32 %v1053_v32, 0.0  ;;  %v1087_v25 = vmax.f32 %v1055_v34, 0.0  ;;  %v1042_v43 = vadd.f32 %v5553_v49, %v5521_v45  ;;  %v5615_v32 = vld [vmem:[#allocation3 + $0x18] sm:$0xff]  ;;  %v5623_v34 = vld [vmem:[#allocation3 + $0x20] sm:$0xff] }
 0x136   : > { %1178 = vmatprep.subr.mxu0 %v1094_v29  ;;  %1291 = vmatprep.subr.mxu1 %v1096_v31  ;;  %v1044_v48 = vadd.f32 %v5553_v49, %v5523_v46  ;;  %v1082_v14 = vmax.f32 %v1050_v1, 0.0  ;;  %v1084_v62 = vmax.f32 %v1052_v16, 0.0  ;;  %v1041_v47 = vadd.f32 %v5553_v49, %v5517_v11  ;;  %v5599_v29 = vld [vmem:[#allocation3 + $0x8] sm:$0xff]  ;;  %v5607_v31 = vld [vmem:[#allocation3 + $0x10] sm:$0xff]  ;;  %7159 = vst [vmem:[#allocation34_spill] sm:$0xff] %v5615_v32  ;;  %v5647_v1 = vld [vmem:[#allocation3 + $0x38] sm:$0xff] }
 0x137   : > { %1179 = vmatpush1.msra.mxu0 %v1093_v35  ;;  %1292 = vmatpush1.msra.mxu1 %v1095_v37  ;;  %v1043_v13 = vadd.f32 %v5553_v49, %v5519_v44  ;;  %v1081_v42 = vmax.f32 %v1049_v53, 0.0  ;;  %v1083_v36 = vmax.f32 %v1051_v20, 0.0  ;;  %v1038_v45 = vadd.f32 %v5563_v26, %v5513_v2  ;;  %7157 = vst [vmem:[#allocation24_spill] sm:$0xff] %v5599_v29  ;;  %v5631_v35 = vld [vmem:[#allocation3 + $0x28] sm:$0xff]  ;;  %v5639_v37 = vld [vmem:[#allocation3 + $0x30] sm:$0xff] }
 0x138   : > { %1180 = vmatprep.subr.mxu0 %v1090_v52  ;;  %1293 = vmatprep.subr.mxu1 %v1092_v19  ;;  %v1040_v46 = vadd.f32 %v5563_v26, %v5515_v0  ;;  %v1078_v30 = vmax.f32 %v1046_v55, 0.0  ;;  %v1080_v5 = vmax.f32 %v1048_v23, 0.0  ;;  %v1077_v11 = vmax.f32 %v1045_v57, 0.0  ;;  %7158 = vst [vmem:[#allocation33_spill] sm:$0xff] %v5607_v31  ;;  %7160 = vst [vmem:[#allocation35_spill] sm:$0xff] %v5623_v34 }
 0x139   : > { %1181 = vmatpush1.msra.mxu0 %v1089_v54  ;;  %1294 = vmatpush1.msra.mxu1 %v1091_v22  ;;  %v1079_v6 = vmax.f32 %v1047_v58, 0.0  ;;  %v1037_v44 = vadd.f32 %v5563_v26, %v5509_v61  ;;  %v1039_v7 = vadd.f32 %v5563_v26, %v5511_v60  ;;  %v1034_v2 = vadd.f32 %v5573_v63, %v5505_v18 }
 0x13a   : > { %1182 = vmatprep.subr.mxu0 %v1086_v51  ;;  %1295 = vmatprep.subr.mxu1 %v1088_v17  ;;  %v1036_v0 = vadd.f32 %v5573_v63, %v5507_v15  ;;  %v1074_v39 = vmax.f32 %v1042_v43, 0.0  ;;  %v1076_v38 = vmax.f32 %v1044_v48, 0.0  ;;  %v1073_v3 = vmax.f32 %v1041_v47, 0.0  ;;  %7161 = vst [vmem:[#allocation36_spill] sm:$0xff] %v5631_v35  ;;  %7162 = vst [vmem:[#allocation37_spill] sm:$0xff] %v5639_v37 }
 0x13b   : > { %1183 = vmatpush1.msra.mxu0 %v1085_v59  ;;  %1296 = vmatpush1.msra.mxu1 %v1087_v25  ;;  %v1075_v4 = vmax.f32 %v1043_v13, 0.0  ;;  %v1033_v61 = vadd.f32 %v5573_v63, %v5501_v24  ;;  %v1035_v60 = vadd.f32 %v5573_v63, %v5503_v21  ;;  %v1070_v18 = vmax.f32 %v1038_v45, 0.0  ;;  %v5591_v24 = vld [vmem:[#allocation3] sm:$0xff]  ;;  %7163 = vst [vmem:[#allocation38_spill] sm:$0xff] %v5647_v1 }
 0x13c   : > { %1184 = vmatprep.subr.mxu0 %v1082_v14  ;;  %1297 = vmatprep.subr.mxu1 %v1084_v62  ;;  %v1072_v8 = vmax.f32 %v1040_v46, 0.0  ;;  %v1069_v15 = vmax.f32 %v1037_v44, 0.0  ;;  %v1071_v9 = vmax.f32 %v1039_v7, 0.0  ;;  %v1066_v41 = vmax.f32 %v1034_v2, 0.0  ;;  %7155 = vst [vmem:[#allocation23_spill] sm:$0xff] %v5591_v24 }
 0x13d   : > { %1185 = vmatpush1.msra.mxu0 %v1081_v42  ;;  %1298 = vmatpush1.msra.mxu1 %v1083_v36  ;;  %v1068_v40 = vmax.f32 %v1036_v0, 0.0  ;;  %v1065_v12 = vmax.f32 %v1033_v61, 0.0  ;;  %v1067_v28 = vmax.f32 %v1035_v60, 0.0  ;;  %v7156_v21 = vmov 0.0   ;;  %v5679_v36 = vpop.permute.xlu0 %1134 }
 0x13e   : > { %1186 = vmatprep.subr.mxu0 %v1078_v30  ;;  %1299 = vmatprep.subr.mxu1 %v1080_v5  ;;  %7164 = vst [vmem:[#allocation39_spill] sm:$0xff] %v5679_v36  ;;  %v5681_v30 = vpop.permute.xlu1 %1129 }
 0x13f   : > { %1187 = vmatpush1.msra.mxu0 %v1077_v11  ;;  %1300 = vmatpush1.msra.mxu1 %v1079_v6  ;;  %7165 = vst [vmem:[#allocation40_spill] sm:$0xff] %v5681_v30 }
 0x140   : > { %1188 = vmatprep.subr.mxu0 %v1074_v39  ;;  %1301 = vmatprep.subr.mxu1 %v1076_v38 }
 0x141   : > { %1189 = vmatpush1.msra.mxu0 %v1073_v3  ;;  %1302 = vmatpush1.msra.mxu1 %v1075_v4  ;;  %v5683_v7 = vpop.permute.xlu0 %1124 }
 0x142   : > { %1190 = vmatprep.subr.mxu0 %v1070_v18  ;;  %1303 = vmatprep.subr.mxu1 %v1072_v8  ;;  %7166 = vst [vmem:[#allocation41_spill] sm:$0xff] %v5683_v7  ;;  %v5685_v39 = vpop.permute.xlu1 %1119 }
 0x143   : > { %1191 = vmatpush1.msra.mxu0 %v1069_v15  ;;  %1304 = vmatpush1.msra.mxu1 %v1071_v9  ;;  %7167 = vst [vmem:[#allocation42_spill] sm:$0xff] %v5685_v39 }
 0x144   : > { %1192 = vmatprep.subr.mxu0 %v1066_v41  ;;  %1305 = vmatprep.subr.mxu1 %v1068_v40 }
 0x145   : > { %1193 = vmatpush1.msra.mxu0 %v1065_v12  ;;  %1306 = vmatpush1.msra.mxu1 %v1067_v28 }
 0x146   : > { %4699 = vmatmul.mubr.msk.f32.vlgmr.msra.gmra.mxu0 %vm1137_vm4, %v5591_v24  ;;  %4707 = vmatmul.mubr.msk.f32.vlgmr.msra.gmra.mxu1 %vm1137_vm4, %v5591_v24 }
 0x147   : > { %1232 = vmatprep.mubr.f32.mxu0 %v7156_v21  ;;  %1345 = vmatprep.mubr.f32.mxu1 %v7156_v21 }
 0x14a   : > { %4700 = vmatmul.mubr.msk.f32.gmra.mxu0 %vm1137_vm4, %v5599_v29  ;;  %4708 = vmatmul.mubr.msk.f32.gmra.mxu1 %vm1137_vm4, %v5599_v29 }
 0x14b   : > { %1238 = vmatprep.mubr.f32.mxu0 %v7156_v21  ;;  %1351 = vmatprep.mubr.f32.mxu1 %v7156_v21 }
 0x14e   : > { %4701 = vmatmul.mubr.msk.f32.gmra.mxu0 %vm1137_vm4, %v5607_v31  ;;  %4709 = vmatmul.mubr.msk.f32.gmra.mxu1 %vm1137_vm4, %v5607_v31 }
 0x14f   : > { %1244 = vmatprep.mubr.f32.mxu0 %v7156_v21  ;;  %1357 = vmatprep.mubr.f32.mxu1 %v7156_v21 }
 0x152   : > { %4702 = vmatmul.mubr.msk.f32.gmra.mxu0 %vm1137_vm4, %v5615_v32  ;;  %4710 = vmatmul.mubr.msk.f32.gmra.mxu1 %vm1137_vm4, %v5615_v32 }
 0x153   : > { %1250 = vmatprep.mubr.f32.mxu0 %v7156_v21  ;;  %1363 = vmatprep.mubr.f32.mxu1 %v7156_v21 }
 0x156   : > { %4703 = vmatmul.mubr.msk.f32.gmra.mxu0 %vm1137_vm4, %v5623_v34  ;;  %4711 = vmatmul.mubr.msk.f32.gmra.mxu1 %vm1137_vm4, %v5623_v34 }
 0x157   : > { %1256 = vmatprep.mubr.f32.mxu0 %v7156_v21  ;;  %1369 = vmatprep.mubr.f32.mxu1 %v7156_v21 }
 0x15a   : > { %4704 = vmatmul.mubr.msk.f32.gmra.mxu0 %vm1137_vm4, %v5631_v35  ;;  %4712 = vmatmul.mubr.msk.f32.gmra.mxu1 %vm1137_vm4, %v5631_v35 }
 0x15b   : > { %1262 = vmatprep.mubr.f32.mxu0 %v7156_v21  ;;  %1375 = vmatprep.mubr.f32.mxu1 %v7156_v21 }
 0x15e   : > { %4705 = vmatmul.mubr.msk.f32.gmra.mxu0 %vm1137_vm4, %v5639_v37  ;;  %4713 = vmatmul.mubr.msk.f32.gmra.mxu1 %vm1137_vm4, %v5639_v37 }
 0x15f   : > { %1268 = vmatprep.mubr.f32.mxu0 %v7156_v21  ;;  %1381 = vmatprep.mubr.f32.mxu1 %v7156_v21 }
 0x162   : > { %4706 = vmatmul.mubr.msk.f32.gmra.mxu0 %vm1137_vm4, %v5647_v1  ;;  %4714 = vmatmul.mubr.msk.f32.gmra.mxu1 %vm1137_vm4, %v5647_v1 }
 0x163   : > { %1496 = vmatprep.mubr.f32.mxu0 %v7156_v21  ;;  %1567 = vmatprep.mubr.f32.mxu1 %v7156_v21 }
 0x206   : > { %v5655_v16 = vpop.f32.mrf.mxu0  ;;  %v5657_v52 = vpop.f32.mrf.mxu1 }
 0x208   : > { %v5659_v19 = vpop.f32.mrf.mxu0  ;;  %v5661_v53 = vpop.f32.mrf.mxu1 }
 0x20a   : > { %v5663_v20 = vpop.f32.mrf.mxu0  ;;  %v5665_v54 = vpop.f32.mrf.mxu1 }
 0x20c   : > { %v5667_v22 = vpop.f32.mrf.mxu0  ;;  %v5669_v55 = vpop.f32.mrf.mxu1 }
 0x20e   : > { %v5671_v23 = vpop.f32.mrf.mxu0  ;;  %v5673_v51 = vpop.f32.mrf.mxu1 }
 0x210   : > { %v5675_v17 = vpop.f32.mrf.mxu0  ;;  %v5677_v57 = vpop.f32.mrf.mxu1 }
 0x212   : > { %v1246_v58 = vpop.f32.mrf.mxu0  ;;  %v1359_v59 = vpop.f32.mrf.mxu1 }
 0x214   : > { %v1248_v25 = vpop.f32.mrf.mxu0  ;;  %v1361_v43 = vpop.f32.mrf.mxu1 }
 0x216   : > { %v1252_v48 = vpop.f32.mrf.mxu0  ;;  %v1365_v14 = vpop.f32.mrf.mxu1 }
 0x218   : > { %v1254_v62 = vpop.f32.mrf.mxu0  ;;  %v1367_v47 = vpop.f32.mrf.mxu1 }
 0x21a   : > { %v1258_v13 = vpop.f32.mrf.mxu0  ;;  %v1371_v42 = vpop.f32.mrf.mxu1 }
 0x21c   : > { %v1260_v45 = vpop.f32.mrf.mxu0  ;;  %v1373_v46 = vpop.f32.mrf.mxu1 }
 0x21d   : > { %v1261_v40 = vadd.f32 %v1260_v45, %v5683_v7  ;;  %v1374_v12 = vadd.f32 %v1373_v46, %v5683_v7  ;;  %v5703_v45 = vpop.permute.xlu1 %1109  ;;  %v1253_v46 = vadd.f32 %v1252_v48, %v5685_v39 }
 0x21e   : > { %v1264_v5 = vpop.f32.mrf.mxu0  ;;  %v1377_v11 = vpop.f32.mrf.mxu1  ;;  %7169 = vst [vmem:[#allocation44_spill] sm:$0xff] %v5703_v45 }
 0x21f   : > { %v1265_v9 = vadd.f32 %v1264_v5, %v5681_v30  ;;  %v1378_v41 = vadd.f32 %v1377_v11, %v5681_v30  ;;  %v1368_v5 = vadd.f32 %v1367_v47, %v5685_v39  ;;  %v1411_v47 = vmax.f32 %v1374_v12, 0.0 }
 0x220   : > { %v1266_v6 = vpop.f32.mrf.mxu0  ;;  %v1379_v44 = vpop.f32.mrf.mxu1 }
 0x221   : > { %v1267_v60 = vadd.f32 %v1266_v6, %v5681_v30  ;;  %v1380_v18 = vadd.f32 %v1379_v44, %v5681_v30  ;;  %v1259_v6 = vadd.f32 %v1258_v13, %v5683_v7  ;;  %v1372_v44 = vadd.f32 %v1371_v42, %v5683_v7 }
 0x222   : > { %v1270_v2 = vpop.f32.mrf.mxu0  ;;  %v1383_v0 = vpop.f32.mrf.mxu1  ;;  %v1414_v13 = vmax.f32 %v1378_v41, 0.0 }
 0x223   : > { %v1271_v38 = vadd.f32 %v1270_v2, %v5679_v36  ;;  %v1384_v3 = vadd.f32 %v1383_v0, %v5679_v36  ;;  %v5697_v0 = vpop.permute.xlu0 %1114  ;;  %v1415_v11 = vmax.f32 %v1380_v18, 0.0  ;;  %v1408_v18 = vmax.f32 %v1259_v6, 0.0 }
 0x224   : > { %v1272_v4 = vpop.f32.mrf.mxu0  ;;  %v1385_v61 = vpop.f32.mrf.mxu1  ;;  %7168 = vst [vmem:[#allocation43_spill] sm:$0xff] %v5697_v0  ;;  %v1249_v42 = vadd.f32 %v1248_v25, %v5697_v0  ;;  %v1410_v48 = vmax.f32 %v1372_v44, 0.0  ;;  %v1356_v25 = vadd.f32 %v5677_v57, %v5703_v45 }
 0x225   : > { %v1273_v8 = vadd.f32 %v1272_v4, %v5679_v36  ;;  %v1386_v15 = vadd.f32 %v1385_v61, %v5679_v36  ;;  %v1416_v1 = vmax.f32 %v1271_v38, 0.0  ;;  %v1418_v4 = vmax.f32 %v1384_v3, 0.0 }
 0x226   : > { %v1255_v61 = vadd.f32 %v1254_v62, %v5685_v39  ;;  %v1413_v36 = vmax.f32 %v1267_v60, 0.0  ;;  %v1362_v62 = vadd.f32 %v1361_v43, %v5697_v0  ;;  %v1409_v38 = vmax.f32 %v1261_v40, 0.0 }
 0x227   : > { %v1417_v28 = vmax.f32 %v1273_v8, 0.0  ;;  %v1419_v2 = vmax.f32 %v1386_v15, 0.0  ;;  %v1366_v8 = vadd.f32 %v1365_v14, %v5685_v39  ;;  %v1412_v15 = vmax.f32 %v1265_v9, 0.0 }
 0x228   : > { %v1247_v3 = vadd.f32 %v1246_v58, %v5697_v0  ;;  %v1360_v60 = vadd.f32 %v1359_v59, %v5697_v0  ;;  %v1405_v14 = vmax.f32 %v1255_v61, 0.0  ;;  %v1407_v43 = vmax.f32 %v1368_v5, 0.0 }
 0x229   : > { %1448 = vmatprep.subr.mxu0 %v1417_v28  ;;  %1519 = vmatprep.subr.mxu1 %v1419_v2  ;;  %v1241_v58 = vadd.f32 %v5671_v23, %v5703_v45  ;;  %v1354_v59 = vadd.f32 %v5673_v51, %v5703_v45  ;;  %v1404_v9 = vmax.f32 %v1253_v46, 0.0  ;;  %v1406_v41 = vmax.f32 %v1366_v8, 0.0  ;;  %v5725_v28 = vpop.permute.xlu1 %1099 }
 0x22a   : > { %1449 = vmatpush1.msra.mxu0 %v1416_v1  ;;  %1520 = vmatpush1.msra.mxu1 %v1418_v4  ;;  %v1243_v1 = vadd.f32 %v5675_v17, %v5703_v45  ;;  %v1401_v40 = vmax.f32 %v1249_v42, 0.0  ;;  %v1403_v12 = vmax.f32 %v1362_v62, 0.0  ;;  %7171 = vst [vmem:[#allocation46_spill] sm:$0xff] %v5725_v28  ;;  %v1400_v2 = vmax.f32 %v1247_v3, 0.0  ;;  %v4720_v42 = vld [vmem:[%s5240_s23 + $0x28] sm:$0x3f] }
 0x22b   : > { %1450 = vmatprep.subr.mxu0 %v1413_v36  ;;  %1521 = vmatprep.subr.mxu1 %v1415_v11  ;;  %v5715_v36 = vpop.permute.xlu0 %1104  ;;  %v1402_v6 = vmax.f32 %v1360_v60, 0.0  ;;  %v1399_v4 = vmax.f32 %v1356_v25, 0.0  ;;  %v1396_v61 = vmax.f32 %v1241_v58, 0.0  ;;  %v1398_v5 = vmax.f32 %v1354_v59, 0.0  ;;  %v4722_v62 = vld [vmem:[%s5240_s23 + $0x38] sm:$0x3f] }
 0x22c   : > { %1451 = vmatpush1.msra.mxu0 %v1412_v15  ;;  %1522 = vmatpush1.msra.mxu1 %v1414_v13  ;;  %7170 = vst [vmem:[#allocation45_spill] sm:$0xff] %v5715_v36  ;;  %v1237_v17 = vadd.f32 %v5667_v22, %v5715_v36  ;;  %v1350_v57 = vadd.f32 %v5669_v55, %v5715_v36  ;;  %v1397_v44 = vmax.f32 %v1243_v1, 0.0  ;;  %v5742_v13 = vld [vmem:[%s6940_s7] sm:$0x1]  ;;  %v4718_v3 = vld [vmem:[%s5248_s26 + $0x18] sm:$0xff]  ;;  %v5778_v25 = vld [vmem:[%s6936_s3 + $0x8] sm:$0xff] }
 0x22d   : > { %1452 = vmatprep.subr.mxu0 %v1409_v38  ;;  %1523 = vmatprep.subr.mxu1 %v1411_v47  ;;  %v1235_v23 = vadd.f32 %v5663_v20, %v5715_v36  ;;  %v1348_v51 = vadd.f32 %v5665_v54, %v5715_v36  ;;  %v1231_v22 = vadd.f32 %v5659_v19, %v5725_v28  ;;  %v4719_v38 = vld [vmem:[%s5240_s23 + $0x20] sm:$0x3f]  ;;  %v4717_v47 = vld [vmem:[%s5248_s26 + $0x10] sm:$0xff] }
 0x22e   : > { %1453 = vmatpush1.msra.mxu0 %v1408_v18  ;;  %1524 = vmatpush1.msra.mxu1 %v1410_v48  ;;  %v1344_v55 = vadd.f32 %v5661_v53, %v5725_v28  ;;  %v1229_v20 = vadd.f32 %v5655_v16, %v5725_v28  ;;  %v1342_v54 = vadd.f32 %v5657_v52, %v5725_v28  ;;  %v1393_v11 = vmax.f32 %v1237_v17, 0.0  ;;  %v4721_v60 = vld [vmem:[%s5240_s23 + $0x30] sm:$0x3f]  ;;  %v5763_v1 = vld [vmem:[%s6936_s3] sm:$0xff] }
 0x22f   : > { %1454 = vmatprep.subr.mxu0 %v1405_v14  ;;  %1525 = vmatprep.subr.mxu1 %v1407_v43  ;;  %v1395_v46 = vmax.f32 %v1350_v57, 0.0  ;;  %v1392_v19 = vmax.f32 %v1235_v23, 0.0  ;;  %v1394_v53 = vmax.f32 %v1348_v51, 0.0  ;;  %v1389_v8 = vmax.f32 %v1231_v22, 0.0  ;;  %7172 = vst [vmem:[#allocation47_spill] sm:$0xff] %v5742_v13  ;;  %7173 = vst [vmem:[#allocation48_spill] sm:$0xff] %v5763_v1 }
 0x230   : > { %1455 = vmatpush1.msra.mxu0 %v1404_v9  ;;  %1526 = vmatpush1.msra.mxu1 %v1406_v41  ;;  %v1391_v16 = vmax.f32 %v1344_v55, 0.0  ;;  %v1388_v52 = vmax.f32 %v1229_v20, 0.0  ;;  %v1390_v15 = vmax.f32 %v1342_v54, 0.0  ;;  %v1856_v18 = vcombine.high %v4717_v47, %v4717_v47  ;;  %7174 = vst [vmem:[#allocation49_spill] sm:$0xff] %v5778_v25  ;;  %v7175_v14 = vld [vmem:[#allocation9_spill] sm:$0xff]  ;;  %v5791_v43 = vld [vmem:[%s6936_s3 + $0x10] sm:$0xff] }
 0x231   : > { %1456 = vmatprep.subr.mxu0 %v1401_v40  ;;  %1527 = vmatprep.subr.mxu1 %v1403_v12  ;;  %v1857_v48 = vcombine.high %v4718_v3, %v4718_v3  ;;  %7176 = vst [vmem:[#allocation9_spill] sm:$0xff] %v5791_v43  ;;  %v7177_v58 = vld [vmem:[#allocation10_spill] sm:$0xff]  ;;  %v7178_v59 = vld [vmem:[#allocation11_spill] sm:$0xff]  ;;  %v7179_v9 = vld [vmem:[#allocation12_spill] sm:$0xff]  ;;  %v1425_v55 = vlaneseq }
 0x232   : > { %1457 = vmatpush1.msra.mxu0 %v1400_v2  ;;  %1528 = vmatpush1.msra.mxu1 %v1402_v6  ;;  %v7180_v41 = vld [vmem:[#allocation13_spill] sm:$0xff]  ;;  %v7181_v17 = vld [vmem:[#allocation14_spill] sm:$0xff]  ;;  %v7182_v57 = vld [vmem:[#allocation15_spill] sm:$0xff] }
 0x233   : > { %1458 = vmatprep.subr.mxu0 %v1397_v44  ;;  %1529 = vmatprep.subr.mxu1 %v1399_v4  ;;  %v7183_v40 = vld [vmem:[#allocation16_spill] sm:$0xff]  ;;  %v7184_v12 = vld [vmem:[#allocation17_spill] sm:$0xff]  ;;  %v7185_v23 = vld [vmem:[#allocation18_spill] sm:$0xff]  ;;  %v1426_v44 = vshrl.u32 %v1425_v55, 7  ;;  %v5109_v4 = vmov 1966171168  }
 0x234   : > { %1459 = vmatpush1.msra.mxu0 %v1396_v61  ;;  %1530 = vmatpush1.msra.mxu1 %v1398_v5  ;;  %v7186_v51 = vld [vmem:[#allocation19_spill] sm:$0xff]  ;;  %v7187_v2 = vld [vmem:[#allocation20_spill] sm:$0xff]  ;;  %v7188_v6 = vld [vmem:[#allocation21_spill] sm:$0xff]  ;;  %v1581_v20 = vunpack.c.l.s4 %v5109_v4  ;;  %v1423_v5 = vpop.permute.xlu0 %1422  ;;  %vm5900_vm5 = vcmp.lt.s32.totalorder %v1425_v55, 512 }
 0x235   : > { %1460 = vmatprep.subr.mxu0 %v1393_v11  ;;  %1531 = vmatprep.subr.mxu1 %v1395_v46  ;;  %v7189_v22 = vld [vmem:[#allocation22_spill] sm:$0xff]  ;;  %v1427_v54 = vsub.s32 0, %v1426_v44 }
 0x236   : > { %1461 = vmatpush1.msra.mxu0 %v1392_v19  ;;  %1532 = vmatpush1.msra.mxu1 %v1394_v53  ;;  %v1582_v61 = vunpack.c.0.s8 %v1581_v20 }
 0x237   : > { %1462 = vmatprep.subr.mxu0 %v1389_v8  ;;  %1533 = vmatprep.subr.mxu1 %v1391_v16  ;;  %v5876_v19 = vrot.slane %v1423_v5, %v1427_v54 }
 0x238   : > { %1463 = vmatpush1.msra.mxu0 %v1388_v52  ;;  %1534 = vmatpush1.msra.mxu1 %v1390_v15  ;;  %v5878_v53 = vsub.s32 %v1582_v61, %v1426_v44 }
 0x239   : > { %4715 = vmatmul.mubr.msk.f32.vlgmr.msra.gmra.mxu0 %vm1137_vm4, %v5742_v13  ;;  %4716 = vmatmul.mubr.msk.f32.vlgmr.msra.gmra.mxu1 %vm1137_vm4, %v5742_v13  ;;  %7190 = vst [vmem:[#allocation10_spill] sm:$0xff] %v5876_v19 }
 0x23a   : > { %4723 = vmatprep.subr.msk.mxu0 %vm490_vm0, %v4720_v42  ;;  %4733 = vmatprep.subr.msk.mxu1 %vm490_vm0, %v4722_v62  ;;  %7191 = vst [vmem:[#allocation11_spill] sm:$0xff] %v5878_v53 }
 0x23b   : > { %4724 = vmatpush1.msk.msra.mxu0 %vm490_vm0, %v4719_v38  ;;  %1692 = vmatprep.mubr.f32.mxu0 %v7156_v21 }
 0x23c   : > { %4734 = vmatpush1.msk.msra.mxu1 %vm490_vm0, %v4721_v60  ;;  %1805 = vmatprep.mubr.f32.mxu1 %v7156_v21 }
 0x23d   : > { %4725 = vmatmul.mubr.msk.f32.vlgmr.msra.gmra.mxu0 %vm465_vm1, %v5763_v1  ;;  %4735 = vmatmul.mubr.msk.f32.vlgmr.msra.gmra.mxu1 %vm465_vm1, %v5763_v1 }
 0x23e   : > { %1698 = vmatprep.mubr.f32.mxu0 %v7156_v21  ;;  %1811 = vmatprep.mubr.f32.mxu1 %v7156_v21 }
 0x23f   : > { %4743 = vmatprep.subr.msk.mxu0 %vm758_vm2, %v1856_v18  ;;  %4753 = vmatprep.subr.msk.mxu1 %vm758_vm2, %v1857_v48 }
 0x240   : > { %4744 = vmatpush1.msk.msra.mxu0 %vm758_vm2, %v4717_v47  ;;  %4754 = vmatpush1.msk.msra.mxu1 %vm758_vm2, %v4718_v3 }
 0x241   : > { %4726 = vmatmul.mubr.msk.f32.gmra.mxu0 %vm465_vm1, %v5778_v25  ;;  %4736 = vmatmul.mubr.msk.f32.gmra.mxu1 %vm465_vm1, %v5778_v25 }
 0x242   : > { %1704 = vmatprep.mubr.f32.mxu0 %v7156_v21  ;;  %1817 = vmatprep.mubr.f32.mxu1 %v7156_v21 }
 0x245   : > { %4727 = vmatmul.mubr.msk.f32.gmra.mxu0 %vm465_vm1, %v7175_v14  ;;  %4737 = vmatmul.mubr.msk.f32.gmra.mxu1 %vm465_vm1, %v5791_v43 }
 0x246   : > { %1710 = vmatprep.mubr.f32.mxu0 %v7156_v21  ;;  %1823 = vmatprep.mubr.f32.mxu1 %v7156_v21 }
 0x249   : > { %4728 = vmatmul.mubr.msk.f32.gmra.mxu0 %vm465_vm1, %v7177_v58  ;;  %4738 = vmatmul.mubr.msk.f32.gmra.mxu1 %vm465_vm1, %v7177_v58 }
 0x24a   : > { %1716 = vmatprep.mubr.f32.mxu0 %v7156_v21  ;;  %1829 = vmatprep.mubr.f32.mxu1 %v7156_v21 }
 0x24d   : > { %4729 = vmatmul.mubr.msk.f32.gmra.mxu0 %vm465_vm1, %v7178_v59  ;;  %4739 = vmatmul.mubr.msk.f32.gmra.mxu1 %vm465_vm1, %v7178_v59 }
 0x24e   : > { %1722 = vmatprep.mubr.f32.mxu0 %v7156_v21  ;;  %1835 = vmatprep.mubr.f32.mxu1 %v7156_v21 }
 0x251   : > { %4730 = vmatmul.mubr.msk.f32.gmra.mxu0 %vm465_vm1, %v7179_v9  ;;  %4740 = vmatmul.mubr.msk.f32.gmra.mxu1 %vm465_vm1, %v7179_v9 }
 0x252   : > { %1728 = vmatprep.mubr.f32.mxu0 %v7156_v21  ;;  %1841 = vmatprep.mubr.f32.mxu1 %v7156_v21 }
 0x255   : > { %4731 = vmatmul.mubr.msk.f32.gmra.mxu0 %vm465_vm1, %v7180_v41  ;;  %4741 = vmatmul.mubr.msk.f32.gmra.mxu1 %vm465_vm1, %v7180_v41 }
 0x256   : > { %1734 = vmatprep.mubr.f32.mxu0 %v7156_v21  ;;  %1847 = vmatprep.mubr.f32.mxu1 %v7156_v21 }
 0x259   : > { %4732 = vmatmul.mubr.msk.f32.gmra.mxu0 %vm465_vm1, %v7181_v17  ;;  %4742 = vmatmul.mubr.msk.f32.gmra.mxu1 %vm465_vm1, %v7181_v17  ;;  %v7192_v17 = vmov 0 }
 0x25a   : > { %1930 = vmatprep.mubr.f32.mxu0 %v7156_v21  ;;  %2043 = vmatprep.mubr.f32.mxu1 %v7156_v21  ;;  %v7193_v17 = vsel %vm5900_vm5, 4294967295, %v7192_v17 }
 0x25b   : > { %7194 = vst [vmem:[#allocation12_spill] sm:$0xff] %v7193_v17 }
 0x25d   : > { %4745 = vmatmul.mubr.msk.f32.vlgmr.msra.gmra.mxu0 %vm733_vm3, %v7182_v57  ;;  %4755 = vmatmul.mubr.msk.f32.vlgmr.msra.gmra.mxu1 %vm733_vm3, %v7182_v57 }
 0x25e   : > { %1936 = vmatprep.mubr.f32.mxu0 %v7156_v21  ;;  %2049 = vmatprep.mubr.f32.mxu1 %v7156_v21 }
 0x261   : > { %4746 = vmatmul.mubr.msk.f32.gmra.mxu0 %vm733_vm3, %v7183_v40  ;;  %4756 = vmatmul.mubr.msk.f32.gmra.mxu1 %vm733_vm3, %v7183_v40 }
 0x262   : > { %1942 = vmatprep.mubr.f32.mxu0 %v7156_v21  ;;  %2055 = vmatprep.mubr.f32.mxu1 %v7156_v21 }
 0x265   : > { %4747 = vmatmul.mubr.msk.f32.gmra.mxu0 %vm733_vm3, %v7184_v12  ;;  %4757 = vmatmul.mubr.msk.f32.gmra.mxu1 %vm733_vm3, %v7184_v12 }
 0x266   : > { %1948 = vmatprep.mubr.f32.mxu0 %v7156_v21  ;;  %2061 = vmatprep.mubr.f32.mxu1 %v7156_v21 }
 0x269   : > { %4748 = vmatmul.mubr.msk.f32.gmra.mxu0 %vm733_vm3, %v7185_v23  ;;  %4758 = vmatmul.mubr.msk.f32.gmra.mxu1 %vm733_vm3, %v7185_v23 }
 0x26a   : > { %1954 = vmatprep.mubr.f32.mxu0 %v7156_v21  ;;  %2067 = vmatprep.mubr.f32.mxu1 %v7156_v21 }
 0x26d   : > { %4749 = vmatmul.mubr.msk.f32.gmra.mxu0 %vm733_vm3, %v7186_v51  ;;  %4759 = vmatmul.mubr.msk.f32.gmra.mxu1 %vm733_vm3, %v7186_v51 }
 0x26e   : > { %1960 = vmatprep.mubr.f32.mxu0 %v7156_v21  ;;  %2073 = vmatprep.mubr.f32.mxu1 %v7156_v21 }
 0x271   : > { %4750 = vmatmul.mubr.msk.f32.gmra.mxu0 %vm733_vm3, %v7187_v2  ;;  %4760 = vmatmul.mubr.msk.f32.gmra.mxu1 %vm733_vm3, %v7187_v2 }
 0x272   : > { %1966 = vmatprep.mubr.f32.mxu0 %v7156_v21  ;;  %2079 = vmatprep.mubr.f32.mxu1 %v7156_v21 }
 0x275   : > { %4751 = vmatmul.mubr.msk.f32.gmra.mxu0 %vm733_vm3, %v7188_v6  ;;  %4761 = vmatmul.mubr.msk.f32.gmra.mxu1 %vm733_vm3, %v7188_v6 }
 0x276   : > { %1972 = vmatprep.mubr.f32.mxu0 %v7156_v21  ;;  %2085 = vmatprep.mubr.f32.mxu1 %v7156_v21 }
 0x279   : > { %4752 = vmatmul.mubr.msk.f32.gmra.mxu0 %vm733_vm3, %v7189_v22  ;;  %4762 = vmatmul.mubr.msk.f32.gmra.mxu1 %vm733_vm3, %v7189_v22 }
 0x27a   : > { %2220 = vmatprep.mubr.f32.mxu0 %v7156_v21  ;;  %2333 = vmatprep.mubr.f32.mxu1 %v7156_v21 }
 0x2f9   : > { %v1498_v11 = vpop.f32.mrf.mxu0  ;;  %v1569_v46 = vpop.f32.mrf.mxu1 }
 0x2fa   : > { %v1499_v52 = vadd.f32 %v1498_v11, %v5876_v19  ;;  %v1570_v15 = vadd.f32 %v1569_v46, %v5876_v19 }
 0x2fb   : > { %v1500_v8 = vpop.f32.mrf.mxu0  ;;  %v1571_v16 = vpop.f32.mrf.mxu1 }
 0x2fc   : > { %v1501_v42 = vadd.f32 %v1500_v8, %v5876_v19  ;;  %v1572_v62 = vadd.f32 %v1571_v16, %v5876_v19 }
 0x2fd   : > { %v5884_v38 = vpop.f32.mrf.mxu0  ;;  %v5886_v47 = vpop.f32.mrf.mxu1 }
 0x2fe   : > { %v1578_v3 = vcombine.low %v1499_v52, %v1501_v42  ;;  %v1579_v60 = vcombine.low %v1570_v15, %v1572_v62 }
 0x2ff   : > { %v5888_v18 = vpop.f32.mrf.mxu0  ;;  %v5890_v48 = vpop.f32.mrf.mxu1 }
 0x300   : > { %v1586_v14 = vrot.slane %v1578_v3, %v5878_v53  ;;  %v1593_v58 = vrot.slane %v1579_v60, %v5878_v53 }
 0x301   : > { %v5896_v59 = vpop.f32.mrf.mxu0  ;;  %v5898_v9 = vpop.f32.mrf.mxu1 }
 0x302   : > { %v1594_v41 = vcombine.low %v1586_v14, %v1593_v58 }
 0x303   : > { %v1702_v57 = vpop.f32.mrf.mxu0  ;;  %v1815_v40 = vpop.f32.mrf.mxu1 }
 0x304   : > { %v1601_v12 = vrot.slane %v1594_v41, %v5878_v53 }
 0x305   : > { %v1706_v23 = vpop.f32.mrf.mxu0  ;;  %v1819_v51 = vpop.f32.mrf.mxu1 }
 0x306   : > { %1607 = vst.msk [vmem:[%s5905_s15] sm:$0xf] %vm5900_vm5, %v1601_v12 }
 0x307   : > { %v1708_v2 = vpop.f32.mrf.mxu0  ;;  %v1821_v6 = vpop.f32.mrf.mxu1 }
 0x309   : > { %v1712_v22 = vpop.f32.mrf.mxu0  ;;  %v1825_v44 = vpop.f32.mrf.mxu1 }
 0x30b   : > { %v1714_v55 = vpop.f32.mrf.mxu0  ;;  %v1827_v4 = vpop.f32.mrf.mxu1 }
 0x30d   : > { %v5910_v20 = vpop.f32.mrf.mxu0  ;;  %v5912_v54 = vpop.f32.mrf.mxu1 }
 0x30e   : > { %7195 = vst [vmem:[#allocation13_spill] sm:$0xff] %v5910_v20  ;;  %7196 = vst [vmem:[#allocation14_spill] sm:$0xff] %v5912_v54 }
 0x30f   : > { %v1720_v61 = vpop.f32.mrf.mxu0  ;;  %v1833_v5 = vpop.f32.mrf.mxu1 }
 0x311   : > { %v5914_v11 = vpop.f32.mrf.mxu0  ;;  %v5916_v46 = vpop.f32.mrf.mxu1 }
 0x313   : > { %v5918_v8 = vpop.f32.mrf.mxu0  ;;  %v5920_v16 = vpop.f32.mrf.mxu1 }
 0x315   : > { %v1730_v52 = vpop.f32.mrf.mxu0  ;;  %v1843_v15 = vpop.f32.mrf.mxu1 }
 0x317   : > { %v1732_v42 = vpop.f32.mrf.mxu0  ;;  %v1845_v62 = vpop.f32.mrf.mxu1 }
 0x319   : > { %v1736_v3 = vpop.f32.mrf.mxu0  ;;  %v1849_v60 = vpop.f32.mrf.mxu1 }
 0x31b   : > { %v1738_v14 = vpop.f32.mrf.mxu0  ;;  %v1851_v58 = vpop.f32.mrf.mxu1 }
 0x31d   : > { %v1932_v41 = vpop.f32.mrf.mxu0  ;;  %v2045_v12 = vpop.f32.mrf.mxu1 }
 0x31e   : > { %v5923_v49 = vadd.f32 %v1932_v41, %v5884_v38  ;;  %v5926_v10 = vadd.f32 %v2045_v12, %v5886_v47 }
 0x31f   : > { %v1934_v17 = vpop.f32.mrf.mxu0  ;;  %v2047_v53 = vpop.f32.mrf.mxu1 }
 0x320   : > { %7197 = vst [vmem:[#allocation15_spill] sm:$0xff] %v5923_v49  ;;  %7198 = vst [vmem:[#allocation16_spill] sm:$0xff] %v5926_v10  ;;  %v5929_v56 = vadd.f32 %v1934_v17, %v5888_v18  ;;  %v5932_v27 = vadd.f32 %v2047_v53, %v5890_v48 }
 0x321   : > { %v1938_v19 = vpop.f32.mrf.mxu0  ;;  %v2051_v43 = vpop.f32.mrf.mxu1 }
 0x322   : > { %v5935_v54 = vadd.f32 %v1938_v19, %v5896_v59  ;;  %v5938_v20 = vadd.f32 %v2051_v43, %v5898_v9 }
 0x323   : > { %v1940_v25 = vpop.f32.mrf.mxu0  ;;  %v2053_v1 = vpop.f32.mrf.mxu1 }
 0x324   : > { %v5940_v50 = vadd.f32 %v1940_v25, %v1702_v57  ;;  %v5942_v33 = vadd.f32 %v2053_v1, %v1815_v40 }
 0x325   : > { %v1944_v13 = vpop.f32.mrf.mxu0  ;;  %v2057_v28 = vpop.f32.mrf.mxu1 }
 0x326   : > { %v5944_v47 = vadd.f32 %v1944_v13, %v1706_v23  ;;  %v5946_v12 = vadd.f32 %v2057_v28, %v1819_v51 }
 0x327   : > { %v1946_v36 = vpop.f32.mrf.mxu0  ;;  %v2059_v45 = vpop.f32.mrf.mxu1 }
 0x328   : > { %v5948_v18 = vadd.f32 %v1946_v36, %v1708_v2  ;;  %v5950_v53 = vadd.f32 %v2059_v45, %v1821_v6 }
 0x329   : > { %v1950_v0 = vpop.f32.mrf.mxu0  ;;  %v2063_v39 = vpop.f32.mrf.mxu1 }
 0x32a   : > { %v1951_v48 = vadd.f32 %v1950_v0, %v1712_v22  ;;  %v2064_v19 = vadd.f32 %v2063_v39, %v1825_v44  ;;  %v7201_v44 = vld [vmem:[#allocation13_spill] sm:$0xff] }
 0x32b   : > { %v1952_v7 = vpop.f32.mrf.mxu0  ;;  %v2065_v30 = vpop.f32.mrf.mxu1 }
 0x32c   : > { %v1953_v59 = vadd.f32 %v1952_v7, %v1714_v55  ;;  %v2066_v17 = vadd.f32 %v2065_v30, %v1827_v4  ;;  %v7202_v55 = vld [vmem:[#allocation14_spill] sm:$0xff] }
 0x32d   : > { %v1956_v37 = vpop.f32.mrf.mxu0  ;;  %v2069_v35 = vpop.f32.mrf.mxu1 }
 0x32e   : > { %v2070_v4 = vadd.f32 %v2069_v35, %v7202_v55 }
 0x32f   : > { %v1958_v34 = vpop.f32.mrf.mxu0  ;;  %v2071_v32 = vpop.f32.mrf.mxu1 }
 0x330   : > { %v1959_v25 = vadd.f32 %v1958_v34, %v1720_v61  ;;  %v2072_v57 = vadd.f32 %v2071_v32, %v1833_v5  ;;  %v7199_v34 = vld [vmem:[#allocation29_spill] sm:$0xff]  ;;  %v7203_v61 = vld [vmem:[#allocation30_spill] sm:$0xff] }
 0x331   : > { %v1962_v31 = vpop.f32.mrf.mxu0  ;;  %v2075_v29 = vpop.f32.mrf.mxu1 }
 0x332   : > { %v1963_v30 = vadd.f32 %v1962_v31, %v5914_v11  ;;  %v2076_v7 = vadd.f32 %v2075_v29, %v5916_v46 }
 0x333   : > { %v1964_v21 = vpop.f32.mrf.mxu0  ;;  %v2077_v24 = vpop.f32.mrf.mxu1 }
 0x334   : > { %v1965_v36 = vadd.f32 %v1964_v21, %v5918_v8  ;;  %v2078_v45 = vadd.f32 %v2077_v24, %v5920_v16  ;;  %v1957_v24 = vadd.f32 %v1956_v37, %v7201_v44  ;;  %v2112_v16 = vadd.f32 %v1963_v30, %v7203_v61 }
 0x335   : > { %v1968_v63 = vpop.f32.mrf.mxu0  ;;  %v2081_v26 = vpop.f32.mrf.mxu1 }
 0x336   : > { %v1969_v10 = vadd.f32 %v1968_v63, %v1730_v52  ;;  %v2082_v49 = vadd.f32 %v2081_v26, %v1843_v15  ;;  %v7200_v63 = vld [vmem:[#allocation31_spill] sm:$0xff]  ;;  %v2113_v5 = vadd.f32 %v1965_v36, %v7203_v61  ;;  %v2115_v11 = vadd.f32 %v2078_v45, %v7203_v61 }
 0x337   : > { %v1970_v38 = vpop.f32.mrf.mxu0  ;;  %v2083_v41 = vpop.f32.mrf.mxu1  ;;  %v2114_v52 = vadd.f32 %v2076_v7, %v7203_v61 }
 0x338   : > { %v1971_v1 = vadd.f32 %v1970_v38, %v1732_v42  ;;  %v2084_v40 = vadd.f32 %v2083_v41, %v1845_v62  ;;  %v2116_v31 = vadd.f32 %v1969_v10, %v7200_v63  ;;  %v2118_v29 = vadd.f32 %v2082_v49, %v7200_v63  ;;  %v7204_v62 = vld [vmem:[#allocation32_spill] sm:$0xff]  ;;  %v7205_v38 = vld [vmem:[#allocation27_spill] sm:$0xff] }
 0x339   : > { %v1974_v43 = vpop.f32.mrf.mxu0  ;;  %v2087_v9 = vpop.f32.mrf.mxu1  ;;  %v2109_v37 = vadd.f32 %v1959_v25, %v7204_v62  ;;  %v2111_v35 = vadd.f32 %v2072_v57, %v7204_v62  ;;  %v2105_v41 = vadd.f32 %v1953_v59, %v7205_v38  ;;  %v2147_v25 = vmax.f32 %v2115_v11, 0.0 }
 0x33a   : > { %v1975_v13 = vadd.f32 %v1974_v43, %v1736_v3  ;;  %v2088_v23 = vadd.f32 %v2087_v9, %v1849_v60  ;;  %v2117_v26 = vadd.f32 %v1971_v1, %v7200_v63  ;;  %v2119_v6 = vadd.f32 %v2084_v40, %v7200_v63 }
 0x33b   : > { %v1976_v28 = vpop.f32.mrf.mxu0  ;;  %v2089_v51 = vpop.f32.mrf.mxu1  ;;  %v2108_v3 = vadd.f32 %v1957_v24, %v7204_v62  ;;  %v2110_v60 = vadd.f32 %v2070_v4, %v7204_v62  ;;  %v2107_v43 = vadd.f32 %v2066_v17, %v7205_v38  ;;  %v2145_v9 = vmax.f32 %v2113_v5, 0.0 }
 0x33c   : > { %v1977_v0 = vadd.f32 %v1976_v28, %v1738_v14  ;;  %v2090_v39 = vadd.f32 %v2089_v51, %v1851_v58  ;;  %v2120_v32 = vadd.f32 %v1975_v13, %v7199_v34  ;;  %v2122_v2 = vadd.f32 %v2088_v23, %v7199_v34  ;;  %v7206_v23 = vld [vmem:[#allocation28_spill] sm:$0xff] }
 0x33d   : > { %v2149_v10 = vmax.f32 %v2117_v26, 0.0  ;;  %v2151_v49 = vmax.f32 %v2119_v6, 0.0  ;;  %v2148_v14 = vmax.f32 %v2116_v31, 0.0  ;;  %v2150_v58 = vmax.f32 %v2118_v29, 0.0 }
 0x33e   : > { %v2121_v22 = vadd.f32 %v1977_v0, %v7199_v34  ;;  %v2123_v21 = vadd.f32 %v2090_v39, %v7199_v34  ;;  %v2152_v15 = vmax.f32 %v2120_v32, 0.0  ;;  %v2154_v42 = vmax.f32 %v2122_v2, 0.0  ;;  %v7207_v0 = vld [vmem:[#allocation25_spill] sm:$0xff]  ;;  %v7208_v2 = vld [vmem:[#allocation26_spill] sm:$0xff] }
 0x33f   : > { %v2104_v57 = vadd.f32 %v1951_v48, %v7205_v38  ;;  %v2106_v1 = vadd.f32 %v2064_v19, %v7205_v38  ;;  %v2144_v40 = vmax.f32 %v2112_v16, 0.0  ;;  %v2146_v13 = vmax.f32 %v2114_v52, 0.0  ;;  %v7213_v16 = vld [vmem:[#allocation24_spill] sm:$0xff]  ;;  %v7214_v52 = vld [vmem:[#allocation33_spill] sm:$0xff] }
 0x340   : > { %v2153_v46 = vmax.f32 %v2121_v22, 0.0  ;;  %v2155_v8 = vmax.f32 %v2123_v21, 0.0  ;;  %v2101_v28 = vadd.f32 %v5948_v18, %v7206_v23  ;;  %v2103_v59 = vadd.f32 %v5950_v53, %v7206_v23  ;;  %v7209_v22 = vld [vmem:[#allocation15_spill] sm:$0xff]  ;;  %v7210_v21 = vld [vmem:[#allocation16_spill] sm:$0xff] }
 0x341   : > { %v2141_v17 = vmax.f32 %v2109_v37, 0.0  ;;  %v2143_v51 = vmax.f32 %v2111_v35, 0.0  ;;  %v2100_v36 = vadd.f32 %v5944_v47, %v7206_v23  ;;  %v2102_v48 = vadd.f32 %v5946_v12, %v7206_v23  ;;  %v7217_v37 = vld [vmem:[#allocation36_spill] sm:$0xff]  ;;  %v7218_v35 = vld [vmem:[#allocation37_spill] sm:$0xff] }
 0x342   : > { %2172 = vmatprep.subr.mxu0 %v2153_v46  ;;  %2285 = vmatprep.subr.mxu1 %v2155_v8  ;;  %v2140_v19 = vmax.f32 %v2108_v3, 0.0  ;;  %v2142_v45 = vmax.f32 %v2110_v60, 0.0  ;;  %v2097_v18 = vadd.f32 %v5940_v50, %v7207_v0  ;;  %v2099_v53 = vadd.f32 %v5942_v33, %v7207_v0  ;;  %v7211_v46 = vld [vmem:[#allocation23_spill] sm:$0xff] }
 0x343   : > { %2173 = vmatpush1.msra.mxu0 %v2152_v15  ;;  %2286 = vmatpush1.msra.mxu1 %v2154_v42  ;;  %v2137_v39 = vmax.f32 %v2105_v41, 0.0  ;;  %v2139_v30 = vmax.f32 %v2107_v43, 0.0  ;;  %v2096_v47 = vadd.f32 %v5935_v54, %v7207_v0  ;;  %v2098_v12 = vadd.f32 %v5938_v20, %v7207_v0  ;;  %v7215_v15 = vld [vmem:[#allocation34_spill] sm:$0xff]  ;;  %v7216_v42 = vld [vmem:[#allocation35_spill] sm:$0xff] }
 0x344   : > { %2174 = vmatprep.subr.mxu0 %v2149_v10  ;;  %2287 = vmatprep.subr.mxu1 %v2151_v49  ;;  %v2136_v7 = vmax.f32 %v2104_v57, 0.0  ;;  %v2138_v32 = vmax.f32 %v2106_v1, 0.0  ;;  %v2093_v50 = vadd.f32 %v5929_v56, %v7208_v2  ;;  %v2095_v33 = vadd.f32 %v5932_v27, %v7208_v2  ;;  %v7219_v10 = vld [vmem:[#allocation38_spill] sm:$0xff] }
 0x345   : > { %2175 = vmatpush1.msra.mxu0 %v2148_v14  ;;  %2288 = vmatpush1.msra.mxu1 %v2150_v58  ;;  %v2133_v26 = vmax.f32 %v2101_v28, 0.0  ;;  %v2135_v6 = vmax.f32 %v2103_v59, 0.0  ;;  %v2092_v54 = vadd.f32 %v7209_v22, %v7208_v2  ;;  %v2094_v20 = vadd.f32 %v7210_v21, %v7208_v2  ;;  %v7221_v21 = vld [vmem:[#allocation40_spill] sm:$0xff] }
 0x346   : > { %2176 = vmatprep.subr.mxu0 %v2145_v9  ;;  %2289 = vmatprep.subr.mxu1 %v2147_v25  ;;  %v2132_v44 = vmax.f32 %v2100_v36, 0.0  ;;  %v2134_v24 = vmax.f32 %v2102_v48, 0.0  ;;  %v2129_v56 = vmax.f32 %v2097_v18, 0.0  ;;  %v2131_v55 = vmax.f32 %v2099_v53, 0.0 }
 0x347   : > { %2177 = vmatpush1.msra.mxu0 %v2144_v40  ;;  %2290 = vmatpush1.msra.mxu1 %v2146_v13  ;;  %v2128_v4 = vmax.f32 %v2096_v47, 0.0  ;;  %v2130_v27 = vmax.f32 %v2098_v12, 0.0  ;;  %v2125_v31 = vmax.f32 %v2093_v50, 0.0  ;;  %v2127_v29 = vmax.f32 %v2095_v33, 0.0  ;;  %v7220_v33 = vld [vmem:[#allocation39_spill] sm:$0xff] }
 0x348   : > { %2178 = vmatprep.subr.mxu0 %v2141_v17  ;;  %2291 = vmatprep.subr.mxu1 %v2143_v51  ;;  %v2124_v5 = vmax.f32 %v2092_v54, 0.0  ;;  %v2126_v11 = vmax.f32 %v2094_v20, 0.0  ;;  %v7212_v8 = vmov 0.0  }
 0x349   : > { %2179 = vmatpush1.msra.mxu0 %v2140_v19  ;;  %2292 = vmatpush1.msra.mxu1 %v2142_v45 }
 0x34a   : > { %2180 = vmatprep.subr.mxu0 %v2137_v39  ;;  %2293 = vmatprep.subr.mxu1 %v2139_v30 }
 0x34b   : > { %2181 = vmatpush1.msra.mxu0 %v2136_v7  ;;  %2294 = vmatpush1.msra.mxu1 %v2138_v32 }
 0x34c   : > { %2182 = vmatprep.subr.mxu0 %v2133_v26  ;;  %2295 = vmatprep.subr.mxu1 %v2135_v6 }
 0x34d   : > { %2183 = vmatpush1.msra.mxu0 %v2132_v44  ;;  %2296 = vmatpush1.msra.mxu1 %v2134_v24 }
 0x34e   : > { %2184 = vmatprep.subr.mxu0 %v2129_v56  ;;  %2297 = vmatprep.subr.mxu1 %v2131_v55 }
 0x34f   : > { %2185 = vmatpush1.msra.mxu0 %v2128_v4  ;;  %2298 = vmatpush1.msra.mxu1 %v2130_v27  ;;  %v7222_v27 = vld [vmem:[#allocation41_spill] sm:$0xff] }
 0x350   : > { %2186 = vmatprep.subr.mxu0 %v2125_v31  ;;  %2299 = vmatprep.subr.mxu1 %v2127_v29 }
 0x351   : > { %2187 = vmatpush1.msra.mxu0 %v2124_v5  ;;  %2300 = vmatpush1.msra.mxu1 %v2126_v11 }
 0x352   : > { %4763 = vmatmul.mubr.msk.f32.vlgmr.msra.gmra.mxu0 %vm1137_vm4, %v7211_v46  ;;  %4771 = vmatmul.mubr.msk.f32.vlgmr.msra.gmra.mxu1 %vm1137_vm4, %v7211_v46 }
 0x353   : > { %2226 = vmatprep.mubr.f32.mxu0 %v7212_v8  ;;  %2339 = vmatprep.mubr.f32.mxu1 %v7212_v8 }
 0x356   : > { %4764 = vmatmul.mubr.msk.f32.gmra.mxu0 %vm1137_vm4, %v7213_v16  ;;  %4772 = vmatmul.mubr.msk.f32.gmra.mxu1 %vm1137_vm4, %v7213_v16 }
 0x357   : > { %2232 = vmatprep.mubr.f32.mxu0 %v7212_v8  ;;  %2345 = vmatprep.mubr.f32.mxu1 %v7212_v8 }
 0x35a   : > { %4765 = vmatmul.mubr.msk.f32.gmra.mxu0 %vm1137_vm4, %v7214_v52  ;;  %4773 = vmatmul.mubr.msk.f32.gmra.mxu1 %vm1137_vm4, %v7214_v52 }
 0x35b   : > { %2238 = vmatprep.mubr.f32.mxu0 %v7212_v8  ;;  %2351 = vmatprep.mubr.f32.mxu1 %v7212_v8 }
 0x35e   : > { %4766 = vmatmul.mubr.msk.f32.gmra.mxu0 %vm1137_vm4, %v7215_v15  ;;  %4774 = vmatmul.mubr.msk.f32.gmra.mxu1 %vm1137_vm4, %v7215_v15 }
 0x35f   : > { %2244 = vmatprep.mubr.f32.mxu0 %v7212_v8  ;;  %2357 = vmatprep.mubr.f32.mxu1 %v7212_v8 }
 0x362   : > { %4767 = vmatmul.mubr.msk.f32.gmra.mxu0 %vm1137_vm4, %v7216_v42  ;;  %4775 = vmatmul.mubr.msk.f32.gmra.mxu1 %vm1137_vm4, %v7216_v42  ;;  %v7223_v42 = vld [vmem:[#allocation42_spill] sm:$0xff] }
 0x363   : > { %2250 = vmatprep.mubr.f32.mxu0 %v7212_v8  ;;  %2363 = vmatprep.mubr.f32.mxu1 %v7212_v8 }
 0x366   : > { %4768 = vmatmul.mubr.msk.f32.gmra.mxu0 %vm1137_vm4, %v7217_v37  ;;  %4776 = vmatmul.mubr.msk.f32.gmra.mxu1 %vm1137_vm4, %v7217_v37 }
 0x367   : > { %2256 = vmatprep.mubr.f32.mxu0 %v7212_v8  ;;  %2369 = vmatprep.mubr.f32.mxu1 %v7212_v8 }
 0x36a   : > { %4769 = vmatmul.mubr.msk.f32.gmra.mxu0 %vm1137_vm4, %v7218_v35  ;;  %4777 = vmatmul.mubr.msk.f32.gmra.mxu1 %vm1137_vm4, %v7218_v35 }
 0x36b   : > { %2262 = vmatprep.mubr.f32.mxu0 %v7212_v8  ;;  %2375 = vmatprep.mubr.f32.mxu1 %v7212_v8 }
 0x36e   : > { %4770 = vmatmul.mubr.msk.f32.gmra.mxu0 %vm1137_vm4, %v7219_v10  ;;  %4778 = vmatmul.mubr.msk.f32.gmra.mxu1 %vm1137_vm4, %v7219_v10 }
 0x36f   : > { %2478 = vmatprep.mubr.f32.mxu0 %v7212_v8  ;;  %2549 = vmatprep.mubr.f32.mxu1 %v7212_v8 }
 0x412   : > { %v6050_v49 = vpop.f32.mrf.mxu0  ;;  %v6052_v3 = vpop.f32.mrf.mxu1 }
 0x414   : > { %v6054_v60 = vpop.f32.mrf.mxu0  ;;  %v6056_v14 = vpop.f32.mrf.mxu1 }
 0x416   : > { %v6058_v58 = vpop.f32.mrf.mxu0  ;;  %v6060_v41 = vpop.f32.mrf.mxu1 }
 0x418   : > { %v6062_v43 = vpop.f32.mrf.mxu0  ;;  %v6064_v9 = vpop.f32.mrf.mxu1 }
 0x41a   : > { %v6066_v25 = vpop.f32.mrf.mxu0  ;;  %v6068_v57 = vpop.f32.mrf.mxu1 }
 0x41c   : > { %v2236_v1 = vpop.f32.mrf.mxu0  ;;  %v2349_v40 = vpop.f32.mrf.mxu1 }
 0x41e   : > { %v2240_v13 = vpop.f32.mrf.mxu0  ;;  %v2353_v28 = vpop.f32.mrf.mxu1 }
 0x420   : > { %v2242_v59 = vpop.f32.mrf.mxu0  ;;  %v2355_v17 = vpop.f32.mrf.mxu1 }
 0x422   : > { %v2246_v51 = vpop.f32.mrf.mxu0  ;;  %v2359_v36 = vpop.f32.mrf.mxu1 }
 0x424   : > { %v2248_v48 = vpop.f32.mrf.mxu0  ;;  %v2361_v19 = vpop.f32.mrf.mxu1 }
 0x425   : > { %v2249_v37 = vadd.f32 %v2248_v48, %v7223_v42  ;;  %v2362_v35 = vadd.f32 %v2361_v19, %v7223_v42 }
 0x426   : > { %v2252_v45 = vpop.f32.mrf.mxu0  ;;  %v2365_v18 = vpop.f32.mrf.mxu1 }
 0x427   : > { %v2253_v46 = vadd.f32 %v2252_v45, %v7222_v27  ;;  %v2366_v16 = vadd.f32 %v2365_v18, %v7222_v27  ;;  %v7224_v45 = vld [vmem:[#allocation43_spill] sm:$0xff] }
 0x428   : > { %v2254_v53 = vpop.f32.mrf.mxu0  ;;  %v2367_v39 = vpop.f32.mrf.mxu1  ;;  %v2243_v18 = vadd.f32 %v2242_v59, %v7224_v45  ;;  %v2241_v19 = vadd.f32 %v2240_v13, %v7224_v45  ;;  %v2401_v59 = vmax.f32 %v2362_v35, 0.0  ;;  %v4785_v35 = vld [vmem:[%s5240_s23 + $0x48] sm:$0x3f] }
 0x429   : > { %v2255_v31 = vadd.f32 %v2254_v53, %v7222_v27  ;;  %v2368_v29 = vadd.f32 %v2367_v39, %v7222_v27  ;;  %v2247_v53 = vadd.f32 %v2246_v51, %v7223_v42  ;;  %v2360_v39 = vadd.f32 %v2359_v36, %v7223_v42  ;;  %v7225_v36 = vld [vmem:[#allocation44_spill] sm:$0xff] }
 0x42a   : > { %v2258_v30 = vpop.f32.mrf.mxu0  ;;  %v2371_v47 = vpop.f32.mrf.mxu1  ;;  %v2404_v51 = vmax.f32 %v2366_v16, 0.0  ;;  %v2348_v13 = vadd.f32 %v6068_v57, %v7225_v36 }
 0x42b   : > { %v2259_v55 = vadd.f32 %v2258_v30, %v7221_v21  ;;  %v2372_v4 = vadd.f32 %v2371_v47, %v7221_v21  ;;  %v2405_v48 = vmax.f32 %v2368_v29, 0.0 }
 0x42c   : > { %v2260_v12 = vpop.f32.mrf.mxu0  ;;  %v2373_v7 = vpop.f32.mrf.mxu1 }
 0x42d   : > { %v2261_v20 = vadd.f32 %v2260_v12, %v7221_v21  ;;  %v2374_v44 = vadd.f32 %v2373_v7, %v7221_v21  ;;  %v2406_v47 = vmax.f32 %v2259_v55, 0.0  ;;  %v2408_v12 = vmax.f32 %v2372_v4, 0.0 }
 0x42e   : > { %v2264_v32 = vpop.f32.mrf.mxu0  ;;  %v2377_v50 = vpop.f32.mrf.mxu1  ;;  %v2356_v7 = vadd.f32 %v2355_v17, %v7224_v45  ;;  %v2235_v17 = vadd.f32 %v6066_v25, %v7225_v36  ;;  %v2394_v55 = vmax.f32 %v2241_v19, 0.0  ;;  %v7231_v19 = vld [vmem:[#allocation9_spill] sm:$0xff] }
 0x42f   : > { %v2265_v26 = vadd.f32 %v2264_v32, %v7220_v33  ;;  %v2378_v6 = vadd.f32 %v2377_v50, %v7220_v33  ;;  %v2407_v10 = vmax.f32 %v2261_v20, 0.0  ;;  %v2409_v30 = vmax.f32 %v2374_v44, 0.0  ;;  %v7226_v44 = vld [vmem:[#allocation45_spill] sm:$0xff] }
 0x430   : > { %v2266_v22 = vpop.f32.mrf.mxu0  ;;  %v2379_v54 = vpop.f32.mrf.mxu1  ;;  %v2403_v32 = vmax.f32 %v2255_v31, 0.0  ;;  %v2354_v50 = vadd.f32 %v2353_v28, %v7224_v45  ;;  %v2398_v20 = vmax.f32 %v2247_v53, 0.0  ;;  %v2400_v28 = vmax.f32 %v2360_v39, 0.0  ;;  %v7227_v31 = vld [vmem:[#allocation46_spill] sm:$0xff]  ;;  %v4782_v53 = vld [vmem:[%s5248_s26 + $0x20] sm:$0xff] }
 0x431   : > { %v2267_v24 = vadd.f32 %v2266_v22, %v7220_v33  ;;  %v2380_v56 = vadd.f32 %v2379_v54, %v7220_v33  ;;  %v2410_v52 = vmax.f32 %v2265_v26, 0.0  ;;  %v2412_v15 = vmax.f32 %v2378_v6, 0.0  ;;  %v4783_v39 = vld [vmem:[%s5248_s26 + $0x28] sm:$0xff] }
 0x432   : > { %v2402_v26 = vmax.f32 %v2253_v46, 0.0  ;;  %v2237_v6 = vadd.f32 %v2236_v1, %v7225_v36  ;;  %v2350_v22 = vadd.f32 %v2349_v40, %v7225_v36  ;;  %v2399_v54 = vmax.f32 %v2249_v37, 0.0 }
 0x433   : > { %v2411_v5 = vmax.f32 %v2267_v24, 0.0  ;;  %v2413_v11 = vmax.f32 %v2380_v56, 0.0  ;;  %v2231_v24 = vadd.f32 %v6062_v43, %v7226_v44  ;;  %v2344_v1 = vadd.f32 %v6064_v9, %v7226_v44 }
 0x434   : > { %v2395_v40 = vmax.f32 %v2243_v18, 0.0  ;;  %v2397_v56 = vmax.f32 %v2356_v7, 0.0  ;;  %v2229_v25 = vadd.f32 %v6058_v58, %v7226_v44  ;;  %v2342_v57 = vadd.f32 %v6060_v41, %v7226_v44 }
 0x435   : > { %2430 = vmatprep.subr.mxu0 %v2411_v5  ;;  %2501 = vmatprep.subr.mxu1 %v2413_v11  ;;  %v2396_v4 = vmax.f32 %v2354_v50, 0.0  ;;  %v2225_v43 = vadd.f32 %v6054_v60, %v7227_v31  ;;  %v2338_v9 = vadd.f32 %v6056_v14, %v7227_v31  ;;  %v2391_v29 = vmax.f32 %v2237_v6, 0.0  ;;  %v6153_v50 = vld [vmem:[%s6936_s3 + $0x18] sm:$0xff]  ;;  %v6186_v6 = vld [vmem:[%s6936_s3 + $0x30] sm:$0xff] }
 0x436   : > { %2431 = vmatpush1.msra.mxu0 %v2410_v52  ;;  %2502 = vmatpush1.msra.mxu1 %v2412_v15  ;;  %v2393_v5 = vmax.f32 %v2350_v22, 0.0  ;;  %v2223_v58 = vadd.f32 %v6050_v49, %v7227_v31  ;;  %v2336_v41 = vadd.f32 %v6052_v3, %v7227_v31  ;;  %v2390_v11 = vmax.f32 %v2235_v17, 0.0  ;;  %7232 = vst [vmem:[#allocation17_spill] sm:$0xff] %v6153_v50  ;;  %v6197_v22 = vld [vmem:[%s6936_s3 + $0x38] sm:$0xff]  ;;  %v6230_v17 = vld [vmem:[%s6935_s2 + $0x10] sm:$0xff] }
 0x437   : > { %2432 = vmatprep.subr.mxu0 %v2407_v10  ;;  %2503 = vmatprep.subr.mxu1 %v2409_v30  ;;  %v2392_v46 = vmax.f32 %v2348_v13, 0.0  ;;  %v2387_v16 = vmax.f32 %v2231_v24, 0.0  ;;  %v2389_v52 = vmax.f32 %v2344_v1, 0.0  ;;  %v2386_v60 = vmax.f32 %v2229_v25, 0.0  ;;  %v4787_v10 = vld [vmem:[%s5240_s23 + $0x58] sm:$0x3f] }
 0x438   : > { %2433 = vmatpush1.msra.mxu0 %v2406_v47  ;;  %2504 = vmatpush1.msra.mxu1 %v2408_v12  ;;  %v2388_v14 = vmax.f32 %v2342_v57, 0.0  ;;  %v2383_v49 = vmax.f32 %v2225_v43, 0.0  ;;  %v2385_v15 = vmax.f32 %v2338_v9, 0.0  ;;  %v2382_v3 = vmax.f32 %v2223_v58, 0.0  ;;  %v4784_v30 = vld [vmem:[%s5240_s23 + $0x40] sm:$0x3f] }
 0x439   : > { %2434 = vmatprep.subr.mxu0 %v2403_v32  ;;  %2505 = vmatprep.subr.mxu1 %v2405_v48  ;;  %v2384_v37 = vmax.f32 %v2336_v41, 0.0  ;;  %v7228_v47 = vld [vmem:[#allocation47_spill] sm:$0xff]  ;;  %v2835_v18 = vcombine.high %v4782_v53, %v4782_v53  ;;  %v2836_v7 = vcombine.high %v4783_v39, %v4783_v39  ;;  %v7229_v32 = vld [vmem:[#allocation48_spill] sm:$0xff]  ;;  %v7230_v48 = vld [vmem:[#allocation49_spill] sm:$0xff]  ;;  %7235 = vst [vmem:[#allocation20_spill] sm:$0xff] %v6186_v6 }
 0x43a   : > { %2435 = vmatpush1.msra.mxu0 %v2402_v26  ;;  %2506 = vmatpush1.msra.mxu1 %v2404_v51  ;;  %v4786_v12 = vld [vmem:[%s5240_s23 + $0x50] sm:$0x3f]  ;;  %v6164_v26 = vld [vmem:[%s6936_s3 + $0x20] sm:$0xff]  ;;  %v6175_v51 = vld [vmem:[%s6936_s3 + $0x28] sm:$0xff]  ;;  %7236 = vst [vmem:[#allocation21_spill] sm:$0xff] %v6197_v22 }
 0x43b   : > { %2436 = vmatprep.subr.mxu0 %v2399_v54  ;;  %2507 = vmatprep.subr.mxu1 %v2401_v59  ;;  %7233 = vst [vmem:[#allocation18_spill] sm:$0xff] %v6164_v26  ;;  %7234 = vst [vmem:[#allocation19_spill] sm:$0xff] %v6175_v51  ;;  %v6208_v54 = vld [vmem:[%s6935_s2] sm:$0xff]  ;;  %v6219_v59 = vld [vmem:[%s6935_s2 + $0x8] sm:$0xff] }
 0x43c   : > { %2437 = vmatpush1.msra.mxu0 %v2398_v20  ;;  %2508 = vmatpush1.msra.mxu1 %v2400_v28  ;;  %7237 = vst [vmem:[#allocation22_spill] sm:$0xff] %v6208_v54  ;;  %7238 = vst [vmem:[#allocation13_spill] sm:$0xff] %v6219_v59  ;;  %v6241_v13 = vld [vmem:[%s6935_s2 + $0x18] sm:$0xff]  ;;  %v6252_v20 = vld [vmem:[%s6935_s2 + $0x20] sm:$0xff] }
 0x43d   : > { %2438 = vmatprep.subr.mxu0 %v2395_v40  ;;  %2509 = vmatprep.subr.mxu1 %v2397_v56  ;;  %7239 = vst [vmem:[#allocation14_spill] sm:$0xff] %v6230_v17  ;;  %7240 = vst [vmem:[#allocation15_spill] sm:$0xff] %v6241_v13  ;;  %v6263_v28 = vld [vmem:[%s6935_s2 + $0x28] sm:$0xff]  ;;  %v6274_v24 = vld [vmem:[%s6935_s2 + $0x30] sm:$0xff] }
 0x43e   : > { %2439 = vmatpush1.msra.mxu0 %v2394_v55  ;;  %2510 = vmatpush1.msra.mxu1 %v2396_v4  ;;  %7241 = vst [vmem:[#allocation16_spill] sm:$0xff] %v6252_v20  ;;  %7242 = vst [vmem:[#allocation23_spill] sm:$0xff] %v6263_v28  ;;  %v6285_v1 = vld [vmem:[%s6935_s2 + $0x38] sm:$0xff]  ;;  %v7245_v55 = vld [vmem:[#allocation10_spill] sm:$0xff] }
 0x43f   : > { %2440 = vmatprep.subr.mxu0 %v2391_v29  ;;  %2511 = vmatprep.subr.mxu1 %v2393_v5  ;;  %7243 = vst [vmem:[#allocation24_spill] sm:$0xff] %v6274_v24  ;;  %7244 = vst [vmem:[#allocation33_spill] sm:$0xff] %v6285_v1 }
 0x440   : > { %2441 = vmatpush1.msra.mxu0 %v2390_v11  ;;  %2512 = vmatpush1.msra.mxu1 %v2392_v46 }
 0x441   : > { %2442 = vmatprep.subr.mxu0 %v2387_v16  ;;  %2513 = vmatprep.subr.mxu1 %v2389_v52  ;;  %v7246_v52 = vld [vmem:[#allocation11_spill] sm:$0xff] }
 0x442   : > { %2443 = vmatpush1.msra.mxu0 %v2386_v60  ;;  %2514 = vmatpush1.msra.mxu1 %v2388_v14 }
 0x443   : > { %2444 = vmatprep.subr.mxu0 %v2383_v49  ;;  %2515 = vmatprep.subr.mxu1 %v2385_v15 }
 0x444   : > { %2445 = vmatpush1.msra.mxu0 %v2382_v3  ;;  %2516 = vmatpush1.msra.mxu1 %v2384_v37 }
 0x445   : > { %4779 = vmatmul.mubr.msk.f32.vlgmr.msra.gmra.mxu0 %vm1137_vm4, %v7228_v47  ;;  %4780 = vmatmul.mubr.msk.f32.vlgmr.msra.gmra.mxu1 %vm1137_vm4, %v7228_v47 }
 0x446   : > { %4788 = vmatprep.subr.msk.mxu0 %vm490_vm0, %v4785_v35  ;;  %4798 = vmatprep.subr.msk.mxu1 %vm490_vm0, %v4787_v10 }
 0x447   : > { %4789 = vmatpush1.msk.msra.mxu0 %vm490_vm0, %v4784_v30  ;;  %2671 = vmatprep.mubr.f32.mxu0 %v7212_v8 }
 0x448   : > { %4799 = vmatpush1.msk.msra.mxu1 %vm490_vm0, %v4786_v12  ;;  %2784 = vmatprep.mubr.f32.mxu1 %v7212_v8 }
 0x449   : > { %4790 = vmatmul.mubr.msk.f32.vlgmr.msra.gmra.mxu0 %vm465_vm1, %v7229_v32  ;;  %4800 = vmatmul.mubr.msk.f32.vlgmr.msra.gmra.mxu1 %vm465_vm1, %v7229_v32 }
 0x44a   : > { %2677 = vmatprep.mubr.f32.mxu0 %v7212_v8  ;;  %2790 = vmatprep.mubr.f32.mxu1 %v7212_v8 }
 0x44b   : > { %4808 = vmatprep.subr.msk.mxu0 %vm758_vm2, %v2835_v18  ;;  %4818 = vmatprep.subr.msk.mxu1 %vm758_vm2, %v2836_v7 }
 0x44c   : > { %4809 = vmatpush1.msk.msra.mxu0 %vm758_vm2, %v4782_v53  ;;  %4819 = vmatpush1.msk.msra.mxu1 %vm758_vm2, %v4783_v39 }
 0x44d   : > { %4791 = vmatmul.mubr.msk.f32.gmra.mxu0 %vm465_vm1, %v7230_v48  ;;  %4801 = vmatmul.mubr.msk.f32.gmra.mxu1 %vm465_vm1, %v7230_v48 }
 0x44e   : > { %2683 = vmatprep.mubr.f32.mxu0 %v7212_v8  ;;  %2796 = vmatprep.mubr.f32.mxu1 %v7212_v8 }
 0x451   : > { %4792 = vmatmul.mubr.msk.f32.gmra.mxu0 %vm465_vm1, %v7231_v19  ;;  %4802 = vmatmul.mubr.msk.f32.gmra.mxu1 %vm465_vm1, %v7231_v19 }
 0x452   : > { %2689 = vmatprep.mubr.f32.mxu0 %v7212_v8  ;;  %2802 = vmatprep.mubr.f32.mxu1 %v7212_v8 }
 0x455   : > { %4793 = vmatmul.mubr.msk.f32.gmra.mxu0 %vm465_vm1, %v6153_v50  ;;  %4803 = vmatmul.mubr.msk.f32.gmra.mxu1 %vm465_vm1, %v6153_v50 }
 0x456   : > { %2695 = vmatprep.mubr.f32.mxu0 %v7212_v8  ;;  %2808 = vmatprep.mubr.f32.mxu1 %v7212_v8 }
 0x459   : > { %4794 = vmatmul.mubr.msk.f32.gmra.mxu0 %vm465_vm1, %v6164_v26  ;;  %4804 = vmatmul.mubr.msk.f32.gmra.mxu1 %vm465_vm1, %v6164_v26 }
 0x45a   : > { %2701 = vmatprep.mubr.f32.mxu0 %v7212_v8  ;;  %2814 = vmatprep.mubr.f32.mxu1 %v7212_v8 }
 0x45d   : > { %4795 = vmatmul.mubr.msk.f32.gmra.mxu0 %vm465_vm1, %v6175_v51  ;;  %4805 = vmatmul.mubr.msk.f32.gmra.mxu1 %vm465_vm1, %v6175_v51 }
 0x45e   : > { %2707 = vmatprep.mubr.f32.mxu0 %v7212_v8  ;;  %2820 = vmatprep.mubr.f32.mxu1 %v7212_v8 }
 0x461   : > { %4796 = vmatmul.mubr.msk.f32.gmra.mxu0 %vm465_vm1, %v6186_v6  ;;  %4806 = vmatmul.mubr.msk.f32.gmra.mxu1 %vm465_vm1, %v6186_v6 }
 0x462   : > { %2713 = vmatprep.mubr.f32.mxu0 %v7212_v8  ;;  %2826 = vmatprep.mubr.f32.mxu1 %v7212_v8 }
 0x465   : > { %4797 = vmatmul.mubr.msk.f32.gmra.mxu0 %vm465_vm1, %v6197_v22  ;;  %4807 = vmatmul.mubr.msk.f32.gmra.mxu1 %vm465_vm1, %v6197_v22 }
 0x466   : > { %2909 = vmatprep.mubr.f32.mxu0 %v7212_v8  ;;  %3022 = vmatprep.mubr.f32.mxu1 %v7212_v8 }
 0x469   : > { %4810 = vmatmul.mubr.msk.f32.vlgmr.msra.gmra.mxu0 %vm733_vm3, %v6208_v54  ;;  %4820 = vmatmul.mubr.msk.f32.vlgmr.msra.gmra.mxu1 %vm733_vm3, %v6208_v54 }
 0x46a   : > { %2915 = vmatprep.mubr.f32.mxu0 %v7212_v8  ;;  %3028 = vmatprep.mubr.f32.mxu1 %v7212_v8 }
 0x46d   : > { %4811 = vmatmul.mubr.msk.f32.gmra.mxu0 %vm733_vm3, %v6219_v59  ;;  %4821 = vmatmul.mubr.msk.f32.gmra.mxu1 %vm733_vm3, %v6219_v59 }
 0x46e   : > { %2921 = vmatprep.mubr.f32.mxu0 %v7212_v8  ;;  %3034 = vmatprep.mubr.f32.mxu1 %v7212_v8 }
 0x471   : > { %4812 = vmatmul.mubr.msk.f32.gmra.mxu0 %vm733_vm3, %v6230_v17  ;;  %4822 = vmatmul.mubr.msk.f32.gmra.mxu1 %vm733_vm3, %v6230_v17 }
 0x472   : > { %2927 = vmatprep.mubr.f32.mxu0 %v7212_v8  ;;  %3040 = vmatprep.mubr.f32.mxu1 %v7212_v8 }
 0x475   : > { %4813 = vmatmul.mubr.msk.f32.gmra.mxu0 %vm733_vm3, %v6241_v13  ;;  %4823 = vmatmul.mubr.msk.f32.gmra.mxu1 %vm733_vm3, %v6241_v13 }
 0x476   : > { %2933 = vmatprep.mubr.f32.mxu0 %v7212_v8  ;;  %3046 = vmatprep.mubr.f32.mxu1 %v7212_v8 }
 0x479   : > { %4814 = vmatmul.mubr.msk.f32.gmra.mxu0 %vm733_vm3, %v6252_v20  ;;  %4824 = vmatmul.mubr.msk.f32.gmra.mxu1 %vm733_vm3, %v6252_v20 }
 0x47a   : > { %2939 = vmatprep.mubr.f32.mxu0 %v7212_v8  ;;  %3052 = vmatprep.mubr.f32.mxu1 %v7212_v8 }
 0x47d   : > { %4815 = vmatmul.mubr.msk.f32.gmra.mxu0 %vm733_vm3, %v6263_v28  ;;  %4825 = vmatmul.mubr.msk.f32.gmra.mxu1 %vm733_vm3, %v6263_v28 }
 0x47e   : > { %2945 = vmatprep.mubr.f32.mxu0 %v7212_v8  ;;  %3058 = vmatprep.mubr.f32.mxu1 %v7212_v8 }
 0x481   : > { %4816 = vmatmul.mubr.msk.f32.gmra.mxu0 %vm733_vm3, %v6274_v24  ;;  %4826 = vmatmul.mubr.msk.f32.gmra.mxu1 %vm733_vm3, %v6274_v24 }
 0x482   : > { %2951 = vmatprep.mubr.f32.mxu0 %v7212_v8  ;;  %3064 = vmatprep.mubr.f32.mxu1 %v7212_v8 }
 0x485   : > { %4817 = vmatmul.mubr.msk.f32.gmra.mxu0 %vm733_vm3, %v6285_v1  ;;  %4827 = vmatmul.mubr.msk.f32.gmra.mxu1 %vm733_vm3, %v6285_v1 }
 0x486   : > { %3199 = vmatprep.mubr.f32.mxu0 %v7212_v8  ;;  %3312 = vmatprep.mubr.f32.mxu1 %v7212_v8 }
 0x505   : > { %v2480_v40 = vpop.f32.mrf.mxu0  ;;  %v2551_v56 = vpop.f32.mrf.mxu1 }
 0x506   : > { %v2481_v4 = vadd.f32 %v2480_v40, %v7245_v55  ;;  %v2552_v43 = vadd.f32 %v2551_v56, %v7245_v55 }
 0x507   : > { %v2482_v25 = vpop.f32.mrf.mxu0  ;;  %v2553_v57 = vpop.f32.mrf.mxu1 }
 0x508   : > { %v2483_v9 = vadd.f32 %v2482_v25, %v7245_v55  ;;  %v2554_v29 = vadd.f32 %v2553_v57, %v7245_v55 }
 0x509   : > { %v6297_v5 = vpop.f32.mrf.mxu0  ;;  %v6299_v58 = vpop.f32.mrf.mxu1 }
 0x50a   : > { %v2560_v41 = vcombine.low %v2481_v4, %v2483_v9  ;;  %v2561_v11 = vcombine.low %v2552_v43, %v2554_v29 }
 0x50b   : > { %v6301_v46 = vpop.f32.mrf.mxu0  ;;  %v6303_v16 = vpop.f32.mrf.mxu1 }
 0x50c   : > { %v2568_v60 = vrot.slane %v2560_v41, %v7246_v52  ;;  %v2575_v14 = vrot.slane %v2561_v11, %v7246_v52 }
 0x50d   : > { %v2679_v49 = vpop.f32.mrf.mxu0  ;;  %v2792_v15 = vpop.f32.mrf.mxu1 }
 0x50e   : > { %v2576_v3 = vcombine.low %v2568_v60, %v2575_v14 }
 0x50f   : > { %v2681_v37 = vpop.f32.mrf.mxu0  ;;  %v2794_v35 = vpop.f32.mrf.mxu1 }
 0x510   : > { %v2583_v10 = vrot.slane %v2576_v3, %v7246_v52 }
 0x511   : > { %v2685_v30 = vpop.f32.mrf.mxu0  ;;  %v2798_v53 = vpop.f32.mrf.mxu1 }
 0x512   : > { %4781 = vst.msk [vmem:[%s5905_s15 + $0x4] sm:$0xf] %vm5900_vm5, %v2583_v10 }
 0x513   : > { %v2687_v47 = vpop.f32.mrf.mxu0  ;;  %v2800_v12 = vpop.f32.mrf.mxu1 }
 0x515   : > { %v2691_v18 = vpop.f32.mrf.mxu0  ;;  %v2804_v7 = vpop.f32.mrf.mxu1 }
 0x517   : > { %v2693_v32 = vpop.f32.mrf.mxu0  ;;  %v2806_v48 = vpop.f32.mrf.mxu1 }
 0x519   : > { %v6311_v19 = vpop.f32.mrf.mxu0  ;;  %v6313_v40 = vpop.f32.mrf.mxu1 }
 0x51a   : > { %7248 = vst [vmem:[#allocation34_spill] sm:$0xff] %v6311_v19  ;;  %7249 = vst [vmem:[#allocation35_spill] sm:$0xff] %v6313_v40 }
 0x51b   : > { %v2699_v56 = vpop.f32.mrf.mxu0  ;;  %v2812_v25 = vpop.f32.mrf.mxu1 }
 0x51d   : > { %v6315_v57 = vpop.f32.mrf.mxu0  ;;  %v6317_v4 = vpop.f32.mrf.mxu1 }
 0x51e   : > { %7250 = vst [vmem:[#allocation36_spill] sm:$0xff] %v6317_v4 }
 0x51f   : > { %v6319_v43 = vpop.f32.mrf.mxu0  ;;  %v6321_v9 = vpop.f32.mrf.mxu1 }
 0x521   : > { %v2709_v29 = vpop.f32.mrf.mxu0  ;;  %v2822_v41 = vpop.f32.mrf.mxu1 }
 0x523   : > { %v2711_v11 = vpop.f32.mrf.mxu0  ;;  %v2824_v60 = vpop.f32.mrf.mxu1 }
 0x525   : > { %v2715_v14 = vpop.f32.mrf.mxu0  ;;  %v2828_v3 = vpop.f32.mrf.mxu1 }
 0x527   : > { %v2717_v10 = vpop.f32.mrf.mxu0  ;;  %v2830_v39 = vpop.f32.mrf.mxu1 }
 0x529   : > { %v2911_v52 = vpop.f32.mrf.mxu0  ;;  %v3024_v55 = vpop.f32.mrf.mxu1 }
 0x52a   : > { %v6324_v23 = vadd.f32 %v2911_v52, %v6297_v5  ;;  %v6327_v38 = vadd.f32 %v3024_v55, %v6299_v58 }
 0x52b   : > { %v2913_v1 = vpop.f32.mrf.mxu0  ;;  %v3026_v24 = vpop.f32.mrf.mxu1 }
 0x52c   : > { %7251 = vst [vmem:[#allocation37_spill] sm:$0xff] %v6327_v38  ;;  %v6330_v62 = vadd.f32 %v2913_v1, %v6301_v46  ;;  %v6333_v61 = vadd.f32 %v3026_v24, %v6303_v16 }
 0x52d   : > { %v2917_v28 = vpop.f32.mrf.mxu0  ;;  %v3030_v20 = vpop.f32.mrf.mxu1 }
 0x52e   : > { %v6335_v40 = vadd.f32 %v2917_v28, %v2679_v49  ;;  %v6337_v19 = vadd.f32 %v3030_v20, %v2792_v15 }
 0x52f   : > { %v2919_v13 = vpop.f32.mrf.mxu0  ;;  %v3032_v17 = vpop.f32.mrf.mxu1 }
 0x530   : > { %v6339_v63 = vadd.f32 %v2919_v13, %v2681_v37  ;;  %v6341_v34 = vadd.f32 %v3032_v17, %v2794_v35 }
 0x531   : > { %v2923_v59 = vpop.f32.mrf.mxu0  ;;  %v3036_v54 = vpop.f32.mrf.mxu1 }
 0x532   : > { %v6343_v52 = vadd.f32 %v2923_v59, %v2685_v30  ;;  %v6345_v55 = vadd.f32 %v3036_v54, %v2798_v53 }
 0x533   : > { %v2925_v22 = vpop.f32.mrf.mxu0  ;;  %v3038_v6 = vpop.f32.mrf.mxu1 }
 0x534   : > { %v6347_v58 = vadd.f32 %v2925_v22, %v2687_v47  ;;  %v6349_v1 = vadd.f32 %v3038_v6, %v2800_v12 }
 0x535   : > { %v2929_v51 = vpop.f32.mrf.mxu0  ;;  %v3042_v26 = vpop.f32.mrf.mxu1 }
 0x536   : > { %v2930_v24 = vadd.f32 %v2929_v51, %v2691_v18  ;;  %v3043_v46 = vadd.f32 %v3042_v26, %v2804_v7 }
 0x537   : > { %v2931_v50 = vpop.f32.mrf.mxu0  ;;  %v3044_v31 = vpop.f32.mrf.mxu1 }
 0x538   : > { %v2932_v28 = vadd.f32 %v2931_v50, %v2693_v32  ;;  %v3045_v16 = vadd.f32 %v3044_v31, %v2806_v48  ;;  %v7252_v50 = vld [vmem:[#allocation36_spill] sm:$0xff]  ;;  %v7255_v32 = vld [vmem:[#allocation34_spill] sm:$0xff]  ;;  %v7256_v48 = vld [vmem:[#allocation35_spill] sm:$0xff] }
 0x539   : > { %v2935_v44 = vpop.f32.mrf.mxu0  ;;  %v3048_v36 = vpop.f32.mrf.mxu1 }
 0x53b   : > { %v2937_v45 = vpop.f32.mrf.mxu0  ;;  %v3050_v42 = vpop.f32.mrf.mxu1 }
 0x53c   : > { %v2938_v13 = vadd.f32 %v2937_v45, %v2699_v56  ;;  %v3051_v15 = vadd.f32 %v3050_v42, %v2812_v25  ;;  %v7253_v45 = vld [vmem:[#allocation29_spill] sm:$0xff]  ;;  %v7257_v56 = vld [vmem:[#allocation30_spill] sm:$0xff] }
 0x53d   : > { %v2941_v27 = vpop.f32.mrf.mxu0  ;;  %v3054_v21 = vpop.f32.mrf.mxu1 }
 0x53e   : > { %v2942_v31 = vadd.f32 %v2941_v27, %v6315_v57  ;;  %v3055_v47 = vadd.f32 %v3054_v21, %v7252_v50 }
 0x53f   : > { %v2943_v33 = vpop.f32.mrf.mxu0  ;;  %v3056_v8 = vpop.f32.mrf.mxu1 }
 0x540   : > { %v2944_v22 = vadd.f32 %v2943_v33, %v6319_v43  ;;  %v3057_v6 = vadd.f32 %v3056_v8, %v6321_v9  ;;  %v2936_v8 = vadd.f32 %v2935_v44, %v7255_v32  ;;  %v3091_v9 = vadd.f32 %v2942_v31, %v7257_v56  ;;  %v7261_v31 = vld [vmem:[#allocation25_spill] sm:$0xff] }
 0x541   : > { %v2947_v2 = vpop.f32.mrf.mxu0  ;;  %v3060_v0 = vpop.f32.mrf.mxu1 }
 0x542   : > { %v2948_v35 = vadd.f32 %v2947_v2, %v2709_v29  ;;  %v3061_v38 = vadd.f32 %v3060_v0, %v2822_v41  ;;  %v7254_v2 = vld [vmem:[#allocation31_spill] sm:$0xff]  ;;  %v3092_v25 = vadd.f32 %v2944_v22, %v7257_v56  ;;  %v3094_v57 = vadd.f32 %v3057_v6, %v7257_v56 }
 0x543   : > { %v2949_v4 = vpop.f32.mrf.mxu0  ;;  %v3062_v5 = vpop.f32.mrf.mxu1  ;;  %v3093_v29 = vadd.f32 %v3055_v47, %v7257_v56 }
 0x544   : > { %v2950_v17 = vadd.f32 %v2949_v4, %v2711_v11  ;;  %v3063_v37 = vadd.f32 %v3062_v5, %v2824_v60  ;;  %v3095_v27 = vadd.f32 %v2948_v35, %v7254_v2  ;;  %v3097_v21 = vadd.f32 %v3061_v38, %v7254_v2  ;;  %v7258_v60 = vld [vmem:[#allocation32_spill] sm:$0xff] }
 0x545   : > { %v2953_v20 = vpop.f32.mrf.mxu0  ;;  %v3066_v49 = vpop.f32.mrf.mxu1  ;;  %v3088_v44 = vadd.f32 %v2938_v13, %v7258_v60  ;;  %v3087_v38 = vadd.f32 %v2936_v8, %v7258_v60  ;;  %v3124_v35 = vmax.f32 %v3092_v25, 0.0  ;;  %v3126_v13 = vmax.f32 %v3094_v57, 0.0  ;;  %v6401_v57 = vld [vmem:[#allocation3] sm:$0xff] }
 0x546   : > { %v2954_v59 = vadd.f32 %v2953_v20, %v2715_v14  ;;  %v3067_v30 = vadd.f32 %v3066_v49, %v2828_v3  ;;  %v3096_v0 = vadd.f32 %v2950_v17, %v7254_v2  ;;  %v3098_v18 = vadd.f32 %v3063_v37, %v7254_v2  ;;  %v7259_v49 = vld [vmem:[#allocation27_spill] sm:$0xff]  ;;  %7264 = vst [vmem:[#allocation38_spill] sm:$0xff] %v6401_v57 }
 0x547   : > { %v2955_v54 = vpop.f32.mrf.mxu0  ;;  %v3068_v53 = vpop.f32.mrf.mxu1  ;;  %v3127_v5 = vmax.f32 %v3095_v27, 0.0  ;;  %v3129_v20 = vmax.f32 %v3097_v21, 0.0  ;;  %v3084_v17 = vadd.f32 %v2932_v28, %v7259_v49  ;;  %v3086_v37 = vadd.f32 %v3045_v16, %v7259_v49 }
 0x548   : > { %v2956_v51 = vadd.f32 %v2955_v54, %v2717_v10  ;;  %v3069_v26 = vadd.f32 %v3068_v53, %v2830_v39  ;;  %v3099_v42 = vadd.f32 %v2954_v59, %v7253_v45  ;;  %v3101_v12 = vadd.f32 %v3067_v30, %v7253_v45  ;;  %v7260_v53 = vld [vmem:[#allocation28_spill] sm:$0xff] }
 0x549   : > { %v3049_v39 = vadd.f32 %v3048_v36, %v7256_v48  ;;  %v3090_v36 = vadd.f32 %v3051_v15, %v7258_v60  ;;  %v3128_v14 = vmax.f32 %v3096_v0, 0.0  ;;  %v3130_v3 = vmax.f32 %v3098_v18, 0.0  ;;  %v7262_v0 = vld [vmem:[#allocation26_spill] sm:$0xff] }
 0x54a   : > { %v3100_v7 = vadd.f32 %v2956_v51, %v7253_v45  ;;  %v3102_v33 = vadd.f32 %v3069_v26, %v7253_v45  ;;  %v3131_v41 = vmax.f32 %v3099_v42, 0.0  ;;  %v3133_v11 = vmax.f32 %v3101_v12, 0.0 }
 0x54b   : > { %v3089_v10 = vadd.f32 %v3049_v39, %v7258_v60  ;;  %v3083_v15 = vadd.f32 %v2930_v24, %v7259_v49  ;;  %v3085_v59 = vadd.f32 %v3043_v46, %v7259_v49  ;;  %v3123_v30 = vmax.f32 %v3091_v9, 0.0  ;;  %v6417_v9 = vld [vmem:[#allocation3 + $0x10] sm:$0xff] }
 0x54c   : > { %v3132_v4 = vmax.f32 %v3100_v7, 0.0  ;;  %v3134_v43 = vmax.f32 %v3102_v33, 0.0  ;;  %v3125_v54 = vmax.f32 %v3093_v29, 0.0  ;;  %v3080_v22 = vadd.f32 %v6347_v58, %v7260_v53  ;;  %v7263_v33 = vld [vmem:[#allocation37_spill] sm:$0xff]  ;;  %7267 = vst [vmem:[#allocation48_spill] sm:$0xff] %v6417_v9  ;;  %v6425_v29 = vld [vmem:[#allocation3 + $0x18] sm:$0xff] }
 0x54d   : > { %v3082_v28 = vadd.f32 %v6349_v1, %v7260_v53  ;;  %v3120_v6 = vmax.f32 %v3088_v44, 0.0  ;;  %v3122_v16 = vmax.f32 %v3090_v36, 0.0  ;;  %v3079_v51 = vadd.f32 %v6343_v52, %v7260_v53  ;;  %7268 = vst [vmem:[#allocation49_spill] sm:$0xff] %v6425_v29  ;;  %v6449_v44 = vld [vmem:[#allocation3 + $0x30] sm:$0xff]  ;;  %v6457_v36 = vld [vmem:[#allocation3 + $0x38] sm:$0xff] }
 0x54e   : > { %3151 = vmatprep.subr.mxu0 %v3132_v4  ;;  %3264 = vmatprep.subr.mxu1 %v3134_v43  ;;  %v3081_v24 = vadd.f32 %v6345_v55, %v7260_v53  ;;  %v3119_v46 = vmax.f32 %v3087_v38, 0.0  ;;  %v3121_v26 = vmax.f32 %v3089_v10, 0.0  ;;  %v3076_v58 = vadd.f32 %v6339_v63, %v7261_v31  ;;  %v6409_v43 = vld [vmem:[#allocation3 + $0x8] sm:$0xff]  ;;  %7271 = vst [vmem:[#allocation34_spill] sm:$0xff] %v6449_v44 }
 0x54f   : > { %3152 = vmatpush1.msra.mxu0 %v3131_v41  ;;  %3265 = vmatpush1.msra.mxu1 %v3133_v11  ;;  %v3078_v1 = vadd.f32 %v6341_v34, %v7261_v31  ;;  %v3116_v50 = vmax.f32 %v3084_v17, 0.0  ;;  %v3118_v47 = vmax.f32 %v3086_v37, 0.0  ;;  %v3075_v52 = vadd.f32 %v6335_v40, %v7261_v31  ;;  %7266 = vst [vmem:[#allocation47_spill] sm:$0xff] %v6409_v43  ;;  %v6433_v41 = vld [vmem:[#allocation3 + $0x20] sm:$0xff]  ;;  %v6441_v11 = vld [vmem:[#allocation3 + $0x28] sm:$0xff] }
 0x550   : > { %3153 = vmatprep.subr.mxu0 %v3128_v14  ;;  %3266 = vmatprep.subr.mxu1 %v3130_v3  ;;  %v3077_v55 = vadd.f32 %v6337_v19, %v7261_v31  ;;  %v3115_v42 = vmax.f32 %v3083_v15, 0.0  ;;  %v3117_v12 = vmax.f32 %v3085_v59, 0.0  ;;  %v3072_v63 = vadd.f32 %v6330_v62, %v7262_v0  ;;  %7269 = vst [vmem:[#allocation9_spill] sm:$0xff] %v6433_v41 }
 0x551   : > { %3154 = vmatpush1.msra.mxu0 %v3127_v5  ;;  %3267 = vmatpush1.msra.mxu1 %v3129_v20  ;;  %v3074_v34 = vadd.f32 %v6333_v61, %v7262_v0  ;;  %v3112_v18 = vmax.f32 %v3080_v22, 0.0  ;;  %v3114_v7 = vmax.f32 %v3082_v28, 0.0  ;;  %v3071_v40 = vadd.f32 %v6324_v23, %v7262_v0  ;;  %7270 = vst [vmem:[#allocation36_spill] sm:$0xff] %v6441_v11 }
 0x552   : > { %3155 = vmatprep.subr.mxu0 %v3124_v35  ;;  %3268 = vmatprep.subr.mxu1 %v3126_v13  ;;  %v3073_v19 = vadd.f32 %v7263_v33, %v7262_v0  ;;  %v3111_v32 = vmax.f32 %v3079_v51, 0.0  ;;  %v3113_v8 = vmax.f32 %v3081_v24, 0.0  ;;  %v3108_v48 = vmax.f32 %v3076_v58, 0.0  ;;  %7272 = vst [vmem:[#allocation35_spill] sm:$0xff] %v6457_v36  ;;  %v7274_v33 = vld [vmem:[#allocation40_spill] sm:$0xff] }
 0x553   : > { %3156 = vmatpush1.msra.mxu0 %v3123_v30  ;;  %3269 = vmatpush1.msra.mxu1 %v3125_v54  ;;  %v3110_v39 = vmax.f32 %v3078_v1, 0.0  ;;  %v3107_v62 = vmax.f32 %v3075_v52, 0.0  ;;  %v3109_v61 = vmax.f32 %v3077_v55, 0.0  ;;  %v3104_v27 = vmax.f32 %v3072_v63, 0.0  ;;  %v7273_v63 = vld [vmem:[#allocation39_spill] sm:$0xff] }
 0x554   : > { %3157 = vmatprep.subr.mxu0 %v3120_v6  ;;  %3270 = vmatprep.subr.mxu1 %v3122_v16  ;;  %v3106_v21 = vmax.f32 %v3074_v34, 0.0  ;;  %v3103_v23 = vmax.f32 %v3071_v40, 0.0  ;;  %v3105_v25 = vmax.f32 %v3073_v19, 0.0  ;;  %v7265_v4 = vmov 0.0  }
 0x555   : > { %3158 = vmatpush1.msra.mxu0 %v3119_v46  ;;  %3271 = vmatpush1.msra.mxu1 %v3121_v26 }
 0x556   : > { %3159 = vmatprep.subr.mxu0 %v3116_v50  ;;  %3272 = vmatprep.subr.mxu1 %v3118_v47 }
 0x557   : > { %3160 = vmatpush1.msra.mxu0 %v3115_v42  ;;  %3273 = vmatpush1.msra.mxu1 %v3117_v12 }
 0x558   : > { %3161 = vmatprep.subr.mxu0 %v3112_v18  ;;  %3274 = vmatprep.subr.mxu1 %v3114_v7 }
 0x559   : > { %3162 = vmatpush1.msra.mxu0 %v3111_v32  ;;  %3275 = vmatpush1.msra.mxu1 %v3113_v8 }
 0x55a   : > { %3163 = vmatprep.subr.mxu0 %v3108_v48  ;;  %3276 = vmatprep.subr.mxu1 %v3110_v39 }
 0x55b   : > { %3164 = vmatpush1.msra.mxu0 %v3107_v62  ;;  %3277 = vmatpush1.msra.mxu1 %v3109_v61  ;;  %v7275_v61 = vld [vmem:[#allocation41_spill] sm:$0xff] }
 0x55c   : > { %3165 = vmatprep.subr.mxu0 %v3104_v27  ;;  %3278 = vmatprep.subr.mxu1 %v3106_v21 }
 0x55d   : > { %3166 = vmatpush1.msra.mxu0 %v3103_v23  ;;  %3279 = vmatpush1.msra.mxu1 %v3105_v25 }
 0x55e   : > { %4828 = vmatmul.mubr.msk.f32.vlgmr.msra.gmra.mxu0 %vm1137_vm4, %v6401_v57  ;;  %4836 = vmatmul.mubr.msk.f32.vlgmr.msra.gmra.mxu1 %vm1137_vm4, %v6401_v57 }
 0x55f   : > { %3205 = vmatprep.mubr.f32.mxu0 %v7265_v4  ;;  %3318 = vmatprep.mubr.f32.mxu1 %v7265_v4 }
 0x562   : > { %4829 = vmatmul.mubr.msk.f32.gmra.mxu0 %vm1137_vm4, %v6409_v43  ;;  %4837 = vmatmul.mubr.msk.f32.gmra.mxu1 %vm1137_vm4, %v6409_v43 }
 0x563   : > { %3211 = vmatprep.mubr.f32.mxu0 %v7265_v4  ;;  %3324 = vmatprep.mubr.f32.mxu1 %v7265_v4 }
 0x566   : > { %4830 = vmatmul.mubr.msk.f32.gmra.mxu0 %vm1137_vm4, %v6417_v9  ;;  %4838 = vmatmul.mubr.msk.f32.gmra.mxu1 %vm1137_vm4, %v6417_v9 }
 0x567   : > { %3217 = vmatprep.mubr.f32.mxu0 %v7265_v4  ;;  %3330 = vmatprep.mubr.f32.mxu1 %v7265_v4 }
 0x56a   : > { %4831 = vmatmul.mubr.msk.f32.gmra.mxu0 %vm1137_vm4, %v6425_v29  ;;  %4839 = vmatmul.mubr.msk.f32.gmra.mxu1 %vm1137_vm4, %v6425_v29 }
 0x56b   : > { %3223 = vmatprep.mubr.f32.mxu0 %v7265_v4  ;;  %3336 = vmatprep.mubr.f32.mxu1 %v7265_v4 }
 0x56e   : > { %4832 = vmatmul.mubr.msk.f32.gmra.mxu0 %vm1137_vm4, %v6433_v41  ;;  %4840 = vmatmul.mubr.msk.f32.gmra.mxu1 %vm1137_vm4, %v6433_v41 }
 0x56f   : > { %3229 = vmatprep.mubr.f32.mxu0 %v7265_v4  ;;  %3342 = vmatprep.mubr.f32.mxu1 %v7265_v4 }
 0x572   : > { %4833 = vmatmul.mubr.msk.f32.gmra.mxu0 %vm1137_vm4, %v6441_v11  ;;  %4841 = vmatmul.mubr.msk.f32.gmra.mxu1 %vm1137_vm4, %v6441_v11 }
 0x573   : > { %3235 = vmatprep.mubr.f32.mxu0 %v7265_v4  ;;  %3348 = vmatprep.mubr.f32.mxu1 %v7265_v4 }
 0x576   : > { %4834 = vmatmul.mubr.msk.f32.gmra.mxu0 %vm1137_vm4, %v6449_v44  ;;  %4842 = vmatmul.mubr.msk.f32.gmra.mxu1 %vm1137_vm4, %v6449_v44 }
 0x577   : > { %3241 = vmatprep.mubr.f32.mxu0 %v7265_v4  ;;  %3354 = vmatprep.mubr.f32.mxu1 %v7265_v4 }
 0x57a   : > { %4835 = vmatmul.mubr.msk.f32.gmra.mxu0 %vm1137_vm4, %v6457_v36  ;;  %4843 = vmatmul.mubr.msk.f32.gmra.mxu1 %vm1137_vm4, %v6457_v36  ;;  %v7276_v36 = vld [vmem:[#allocation42_spill] sm:$0xff] }
 0x57b   : > { %3457 = vmatprep.mubr.f32.mxu0 %v7265_v4  ;;  %3528 = vmatprep.mubr.f32.mxu1 %v7265_v4 }
 0x61e   : > { %v6465_v14 = vpop.f32.mrf.mxu0  ;;  %v6467_v3 = vpop.f32.mrf.mxu1 }
 0x620   : > { %v6469_v38 = vpop.f32.mrf.mxu0  ;;  %v6471_v10 = vpop.f32.mrf.mxu1 }
 0x622   : > { %v6473_v5 = vpop.f32.mrf.mxu0  ;;  %v6475_v20 = vpop.f32.mrf.mxu1 }
 0x624   : > { %v6477_v17 = vpop.f32.mrf.mxu0  ;;  %v6479_v37 = vpop.f32.mrf.mxu1 }
 0x626   : > { %v6481_v35 = vpop.f32.mrf.mxu0  ;;  %v6483_v13 = vpop.f32.mrf.mxu1 }
 0x628   : > { %v3215_v15 = vpop.f32.mrf.mxu0  ;;  %v3328_v59 = vpop.f32.mrf.mxu1 }
 0x62a   : > { %v3219_v30 = vpop.f32.mrf.mxu0  ;;  %v3332_v54 = vpop.f32.mrf.mxu1 }
 0x62c   : > { %v3221_v22 = vpop.f32.mrf.mxu0  ;;  %v3334_v28 = vpop.f32.mrf.mxu1 }
 0x62e   : > { %v3225_v6 = vpop.f32.mrf.mxu0  ;;  %v3338_v16 = vpop.f32.mrf.mxu1 }
 0x630   : > { %v3227_v51 = vpop.f32.mrf.mxu0  ;;  %v3340_v24 = vpop.f32.mrf.mxu1 }
 0x632   : > { %v3231_v46 = vpop.f32.mrf.mxu0  ;;  %v3344_v26 = vpop.f32.mrf.mxu1 }
 0x634   : > { %v3233_v58 = vpop.f32.mrf.mxu0  ;;  %v3346_v1 = vpop.f32.mrf.mxu1 }
 0x635   : > { %v3234_v27 = vadd.f32 %v3233_v58, %v7275_v61  ;;  %v3347_v21 = vadd.f32 %v3346_v1, %v7275_v61  ;;  %v3226_v58 = vadd.f32 %v3225_v6, %v7276_v36  ;;  %v3339_v1 = vadd.f32 %v3338_v16, %v7276_v36  ;;  %v7278_v16 = vld [vmem:[#allocation44_spill] sm:$0xff] }
 0x636   : > { %v3237_v50 = vpop.f32.mrf.mxu0  ;;  %v3350_v47 = vpop.f32.mrf.mxu1 }
 0x637   : > { %v3238_v39 = vadd.f32 %v3237_v50, %v7274_v33  ;;  %v3351_v62 = vadd.f32 %v3350_v47, %v7274_v33 }
 0x638   : > { %v3239_v52 = vpop.f32.mrf.mxu0  ;;  %v3352_v55 = vpop.f32.mrf.mxu1 }
 0x639   : > { %v3240_v19 = vadd.f32 %v3239_v52, %v7274_v33  ;;  %v3353_v32 = vadd.f32 %v3352_v55, %v7274_v33  ;;  %v3345_v52 = vadd.f32 %v3344_v26, %v7275_v61  ;;  %v3385_v47 = vmax.f32 %v3238_v39, 0.0 }
 0x63a   : > { %v3243_v42 = vpop.f32.mrf.mxu0  ;;  %v3356_v12 = vpop.f32.mrf.mxu1  ;;  %v3329_v39 = vadd.f32 %v3328_v59, %v7278_v16 }
 0x63b   : > { %v3244_v34 = vadd.f32 %v3243_v42, %v7273_v63  ;;  %v3357_v18 = vadd.f32 %v3356_v12, %v7273_v63  ;;  %v3232_v42 = vadd.f32 %v3231_v46, %v7275_v61  ;;  %v3388_v50 = vmax.f32 %v3353_v32, 0.0  ;;  %v7277_v46 = vld [vmem:[#allocation43_spill] sm:$0xff] }
 0x63c   : > { %v3245_v7 = vpop.f32.mrf.mxu0  ;;  %v3358_v40 = vpop.f32.mrf.mxu1  ;;  %v3222_v26 = vadd.f32 %v3221_v22, %v7277_v46  ;;  %v3383_v6 = vmax.f32 %v3345_v52, 0.0  ;;  %v7280_v52 = vld [vmem:[#allocation46_spill] sm:$0xff] }
 0x63d   : > { %v3246_v8 = vadd.f32 %v3245_v7, %v7273_v63  ;;  %v3359_v48 = vadd.f32 %v3358_v40, %v7273_v63  ;;  %v3389_v12 = vmax.f32 %v3244_v34, 0.0  ;;  %v3391_v55 = vmax.f32 %v3357_v18, 0.0 }
 0x63e   : > { %v3228_v7 = vadd.f32 %v3227_v51, %v7276_v36  ;;  %v3341_v40 = vadd.f32 %v3340_v24, %v7276_v36  ;;  %v3386_v63 = vmax.f32 %v3240_v19, 0.0  ;;  %v3335_v34 = vadd.f32 %v3334_v28, %v7277_v46 }
 0x63f   : > { %v3390_v23 = vmax.f32 %v3246_v8, 0.0  ;;  %v3392_v25 = vmax.f32 %v3359_v48, 0.0  ;;  %v3387_v8 = vmax.f32 %v3351_v62, 0.0  ;;  %v3382_v18 = vmax.f32 %v3234_v27, 0.0  ;;  %v7279_v27 = vld [vmem:[#allocation45_spill] sm:$0xff] }
 0x640   : > { %v3384_v51 = vmax.f32 %v3347_v21, 0.0  ;;  %v3220_v24 = vadd.f32 %v3219_v30, %v7277_v46  ;;  %v3333_v19 = vadd.f32 %v3332_v54, %v7277_v46  ;;  %v3381_v32 = vmax.f32 %v3232_v42, 0.0 }
 0x641   : > { %3409 = vmatprep.subr.mxu0 %v3390_v23  ;;  %3480 = vmatprep.subr.mxu1 %v3392_v25  ;;  %v3216_v48 = vadd.f32 %v3215_v15, %v7278_v16  ;;  %v3378_v62 = vmax.f32 %v3228_v7, 0.0  ;;  %v3380_v22 = vmax.f32 %v3341_v40, 0.0  ;;  %v3214_v28 = vadd.f32 %v6481_v35, %v7278_v16 }
 0x642   : > { %3410 = vmatpush1.msra.mxu0 %v3389_v12  ;;  %3481 = vmatpush1.msra.mxu1 %v3391_v55  ;;  %v3327_v30 = vadd.f32 %v6483_v13, %v7278_v16  ;;  %v3379_v54 = vmax.f32 %v3339_v1, 0.0  ;;  %v3210_v21 = vadd.f32 %v6477_v17, %v7279_v27  ;;  %v3323_v15 = vadd.f32 %v6479_v37, %v7279_v27 }
 0x643   : > { %3411 = vmatprep.subr.mxu0 %v3386_v63  ;;  %3482 = vmatprep.subr.mxu1 %v3388_v50  ;;  %v3377_v63 = vmax.f32 %v3226_v58, 0.0  ;;  %v3374_v59 = vmax.f32 %v3222_v26, 0.0  ;;  %v3376_v23 = vmax.f32 %v3335_v34, 0.0  ;;  %v3208_v35 = vadd.f32 %v6473_v5, %v7279_v27  ;;  %v4852_v26 = vld [vmem:[%s5240_s23 + $0x78] sm:$0x3f] }
 0x644   : > { %3412 = vmatpush1.msra.mxu0 %v3385_v47  ;;  %3483 = vmatpush1.msra.mxu1 %v3387_v8  ;;  %v3321_v13 = vadd.f32 %v6475_v20, %v7279_v27  ;;  %v3373_v25 = vmax.f32 %v3220_v24, 0.0  ;;  %v3375_v42 = vmax.f32 %v3333_v19, 0.0  ;;  %v3204_v17 = vadd.f32 %v6469_v38, %v7280_v52  ;;  %v4850_v8 = vld [vmem:[%s5240_s23 + $0x68] sm:$0x3f]  ;;  %v4849_v34 = vld [vmem:[%s5240_s23 + $0x60] sm:$0x3f] }
 0x645   : > { %3413 = vmatprep.subr.mxu0 %v3382_v18  ;;  %3484 = vmatprep.subr.mxu1 %v3384_v51  ;;  %v3317_v37 = vadd.f32 %v6471_v10, %v7280_v52  ;;  %v3370_v12 = vmax.f32 %v3216_v48, 0.0  ;;  %v3372_v55 = vmax.f32 %v3329_v39, 0.0  ;;  %v3202_v5 = vadd.f32 %v6465_v14, %v7280_v52  ;;  %v4847_v18 = vld [vmem:[%s5248_s26 + $0x30] sm:$0xff]  ;;  %v4848_v51 = vld [vmem:[%s5248_s26 + $0x38] sm:$0xff]  ;;  %v6535_v24 = vld [vmem:[%s6940_s7] sm:$0x1] }
 0x646   : > { %3414 = vmatpush1.msra.mxu0 %v3381_v32  ;;  %3485 = vmatpush1.msra.mxu1 %v3383_v6  ;;  %v3315_v20 = vadd.f32 %v6467_v3, %v7280_v52  ;;  %v3369_v7 = vmax.f32 %v3214_v28, 0.0  ;;  %v3371_v40 = vmax.f32 %v3327_v30, 0.0  ;;  %v3366_v50 = vmax.f32 %v3210_v21, 0.0  ;;  %7281 = vst [vmem:[#allocation37_spill] sm:$0xff] %v6535_v24  ;;  %v4851_v19 = vld [vmem:[%s5240_s23 + $0x70] sm:$0x3f] }
 0x647   : > { %3415 = vmatprep.subr.mxu0 %v3378_v62  ;;  %3486 = vmatprep.subr.mxu1 %v3380_v22  ;;  %v3368_v58 = vmax.f32 %v3323_v15, 0.0  ;;  %v3365_v38 = vmax.f32 %v3208_v35, 0.0  ;;  %v3367_v10 = vmax.f32 %v3321_v13, 0.0  ;;  %v3362_v14 = vmax.f32 %v3204_v17, 0.0  ;;  %v5009_v48 = vld [vmem:[%s6936_s3] sm:$0xff]  ;;  %v5010_v39 = vld [vmem:[%s6936_s3 + $0x8] sm:$0xff] }
 0x648   : > { %3416 = vmatpush1.msra.mxu0 %v3377_v63  ;;  %3487 = vmatpush1.msra.mxu1 %v3379_v54  ;;  %v3364_v1 = vmax.f32 %v3317_v37, 0.0  ;;  %v3361_v3 = vmax.f32 %v3202_v5, 0.0  ;;  %v3363_v47 = vmax.f32 %v3315_v20, 0.0  ;;  %v3814_v32 = vcombine.high %v4847_v18, %v4847_v18  ;;  %v5011_v62 = vld [vmem:[%s6936_s3 + $0x10] sm:$0xff]  ;;  %v7282_v22 = vld [vmem:[#allocation17_spill] sm:$0xff]  ;;  %v7285_v63 = vld [vmem:[#allocation20_spill] sm:$0xff] }
 0x649   : > { %3417 = vmatprep.subr.mxu0 %v3374_v59  ;;  %3488 = vmatprep.subr.mxu1 %v3376_v23  ;;  %v3815_v6 = vcombine.high %v4848_v51, %v4848_v51  ;;  %v7283_v28 = vld [vmem:[#allocation18_spill] sm:$0xff]  ;;  %v7284_v30 = vld [vmem:[#allocation19_spill] sm:$0xff]  ;;  %v7286_v54 = vld [vmem:[#allocation21_spill] sm:$0xff] }
 0x64a   : > { %3418 = vmatpush1.msra.mxu0 %v3373_v25  ;;  %3489 = vmatpush1.msra.mxu1 %v3375_v42  ;;  %v7287_v21 = vld [vmem:[#allocation22_spill] sm:$0xff]  ;;  %v7288_v15 = vld [vmem:[#allocation13_spill] sm:$0xff]  ;;  %v7290_v23 = vld [vmem:[#allocation15_spill] sm:$0xff] }
 0x64b   : > { %3419 = vmatprep.subr.mxu0 %v3370_v12  ;;  %3490 = vmatprep.subr.mxu1 %v3372_v55  ;;  %v7289_v59 = vld [vmem:[#allocation14_spill] sm:$0xff]  ;;  %v7291_v35 = vld [vmem:[#allocation16_spill] sm:$0xff]  ;;  %v7292_v13 = vld [vmem:[#allocation23_spill] sm:$0xff] }
 0x64c   : > { %3420 = vmatpush1.msra.mxu0 %v3369_v7  ;;  %3491 = vmatpush1.msra.mxu1 %v3371_v40  ;;  %v7293_v25 = vld [vmem:[#allocation24_spill] sm:$0xff]  ;;  %v7294_v42 = vld [vmem:[#allocation33_spill] sm:$0xff]  ;;  %v7295_v5 = vld [vmem:[#allocation10_spill] sm:$0xff] }
 0x64d   : > { %3421 = vmatprep.subr.mxu0 %v3366_v50  ;;  %3492 = vmatprep.subr.mxu1 %v3368_v58 }
 0x64e   : > { %3422 = vmatpush1.msra.mxu0 %v3365_v38  ;;  %3493 = vmatpush1.msra.mxu1 %v3367_v10 }
 0x64f   : > { %3423 = vmatprep.subr.mxu0 %v3362_v14  ;;  %3494 = vmatprep.subr.mxu1 %v3364_v1 }
 0x650   : > { %3424 = vmatpush1.msra.mxu0 %v3361_v3  ;;  %3495 = vmatpush1.msra.mxu1 %v3363_v47  ;;  %v7296_v47 = vld [vmem:[#allocation11_spill] sm:$0xff] }
 0x651   : > { %4844 = vmatmul.mubr.msk.f32.vlgmr.msra.gmra.mxu0 %vm1137_vm4, %v6535_v24  ;;  %4845 = vmatmul.mubr.msk.f32.vlgmr.msra.gmra.mxu1 %vm1137_vm4, %v6535_v24 }
 0x652   : > { %4853 = vmatprep.subr.msk.mxu0 %vm490_vm0, %v4850_v8  ;;  %4863 = vmatprep.subr.msk.mxu1 %vm490_vm0, %v4852_v26 }
 0x653   : > { %4854 = vmatpush1.msk.msra.mxu0 %vm490_vm0, %v4849_v34  ;;  %3650 = vmatprep.mubr.f32.mxu0 %v7265_v4 }
 0x654   : > { %4864 = vmatpush1.msk.msra.mxu1 %vm490_vm0, %v4851_v19  ;;  %3763 = vmatprep.mubr.f32.mxu1 %v7265_v4 }
 0x655   : > { %4855 = vmatmul.mubr.msk.f32.vlgmr.msra.gmra.mxu0 %vm465_vm1, %v5009_v48  ;;  %4865 = vmatmul.mubr.msk.f32.vlgmr.msra.gmra.mxu1 %vm465_vm1, %v5009_v48 }
 0x656   : > { %3656 = vmatprep.mubr.f32.mxu0 %v7265_v4  ;;  %3769 = vmatprep.mubr.f32.mxu1 %v7265_v4 }
 0x657   : > { %4873 = vmatprep.subr.msk.mxu0 %vm758_vm2, %v3814_v32  ;;  %4883 = vmatprep.subr.msk.mxu1 %vm758_vm2, %v3815_v6 }
 0x658   : > { %4874 = vmatpush1.msk.msra.mxu0 %vm758_vm2, %v4847_v18  ;;  %4884 = vmatpush1.msk.msra.mxu1 %vm758_vm2, %v4848_v51 }
 0x659   : > { %4856 = vmatmul.mubr.msk.f32.gmra.mxu0 %vm465_vm1, %v5010_v39  ;;  %4866 = vmatmul.mubr.msk.f32.gmra.mxu1 %vm465_vm1, %v5010_v39 }
 0x65a   : > { %3662 = vmatprep.mubr.f32.mxu0 %v7265_v4  ;;  %3775 = vmatprep.mubr.f32.mxu1 %v7265_v4 }
 0x65d   : > { %4857 = vmatmul.mubr.msk.f32.gmra.mxu0 %vm465_vm1, %v5011_v62  ;;  %4867 = vmatmul.mubr.msk.f32.gmra.mxu1 %vm465_vm1, %v5011_v62 }
 0x65e   : > { %3668 = vmatprep.mubr.f32.mxu0 %v7265_v4  ;;  %3781 = vmatprep.mubr.f32.mxu1 %v7265_v4 }
 0x661   : > { %4858 = vmatmul.mubr.msk.f32.gmra.mxu0 %vm465_vm1, %v7282_v22  ;;  %4868 = vmatmul.mubr.msk.f32.gmra.mxu1 %vm465_vm1, %v7282_v22 }
 0x662   : > { %3674 = vmatprep.mubr.f32.mxu0 %v7265_v4  ;;  %3787 = vmatprep.mubr.f32.mxu1 %v7265_v4 }
 0x665   : > { %4859 = vmatmul.mubr.msk.f32.gmra.mxu0 %vm465_vm1, %v7283_v28  ;;  %4869 = vmatmul.mubr.msk.f32.gmra.mxu1 %vm465_vm1, %v7283_v28 }
 0x666   : > { %3680 = vmatprep.mubr.f32.mxu0 %v7265_v4  ;;  %3793 = vmatprep.mubr.f32.mxu1 %v7265_v4 }
 0x669   : > { %4860 = vmatmul.mubr.msk.f32.gmra.mxu0 %vm465_vm1, %v7284_v30  ;;  %4870 = vmatmul.mubr.msk.f32.gmra.mxu1 %vm465_vm1, %v7284_v30 }
 0x66a   : > { %3686 = vmatprep.mubr.f32.mxu0 %v7265_v4  ;;  %3799 = vmatprep.mubr.f32.mxu1 %v7265_v4 }
 0x66d   : > { %4861 = vmatmul.mubr.msk.f32.gmra.mxu0 %vm465_vm1, %v7285_v63  ;;  %4871 = vmatmul.mubr.msk.f32.gmra.mxu1 %vm465_vm1, %v7285_v63 }
 0x66e   : > { %3692 = vmatprep.mubr.f32.mxu0 %v7265_v4  ;;  %3805 = vmatprep.mubr.f32.mxu1 %v7265_v4 }
 0x671   : > { %4862 = vmatmul.mubr.msk.f32.gmra.mxu0 %vm465_vm1, %v7286_v54  ;;  %4872 = vmatmul.mubr.msk.f32.gmra.mxu1 %vm465_vm1, %v7286_v54 }
 0x672   : > { %3888 = vmatprep.mubr.f32.mxu0 %v7265_v4  ;;  %4001 = vmatprep.mubr.f32.mxu1 %v7265_v4 }
 0x675   : > { %4875 = vmatmul.mubr.msk.f32.vlgmr.msra.gmra.mxu0 %vm733_vm3, %v7287_v21  ;;  %4885 = vmatmul.mubr.msk.f32.vlgmr.msra.gmra.mxu1 %vm733_vm3, %v7287_v21 }
 0x676   : > { %3894 = vmatprep.mubr.f32.mxu0 %v7265_v4  ;;  %4007 = vmatprep.mubr.f32.mxu1 %v7265_v4 }
 0x679   : > { %4876 = vmatmul.mubr.msk.f32.gmra.mxu0 %vm733_vm3, %v7288_v15  ;;  %4886 = vmatmul.mubr.msk.f32.gmra.mxu1 %vm733_vm3, %v7288_v15 }
 0x67a   : > { %3900 = vmatprep.mubr.f32.mxu0 %v7265_v4  ;;  %4013 = vmatprep.mubr.f32.mxu1 %v7265_v4 }
 0x67d   : > { %4877 = vmatmul.mubr.msk.f32.gmra.mxu0 %vm733_vm3, %v7289_v59  ;;  %4887 = vmatmul.mubr.msk.f32.gmra.mxu1 %vm733_vm3, %v7289_v59 }
 0x67e   : > { %3906 = vmatprep.mubr.f32.mxu0 %v7265_v4  ;;  %4019 = vmatprep.mubr.f32.mxu1 %v7265_v4 }
 0x681   : > { %4878 = vmatmul.mubr.msk.f32.gmra.mxu0 %vm733_vm3, %v7290_v23  ;;  %4888 = vmatmul.mubr.msk.f32.gmra.mxu1 %vm733_vm3, %v7290_v23 }
 0x682   : > { %3912 = vmatprep.mubr.f32.mxu0 %v7265_v4  ;;  %4025 = vmatprep.mubr.f32.mxu1 %v7265_v4 }
 0x685   : > { %4879 = vmatmul.mubr.msk.f32.gmra.mxu0 %vm733_vm3, %v7291_v35  ;;  %4889 = vmatmul.mubr.msk.f32.gmra.mxu1 %vm733_vm3, %v7291_v35 }
 0x686   : > { %3918 = vmatprep.mubr.f32.mxu0 %v7265_v4  ;;  %4031 = vmatprep.mubr.f32.mxu1 %v7265_v4 }
 0x689   : > { %4880 = vmatmul.mubr.msk.f32.gmra.mxu0 %vm733_vm3, %v7292_v13  ;;  %4890 = vmatmul.mubr.msk.f32.gmra.mxu1 %vm733_vm3, %v7292_v13 }
 0x68a   : > { %3924 = vmatprep.mubr.f32.mxu0 %v7265_v4  ;;  %4037 = vmatprep.mubr.f32.mxu1 %v7265_v4 }
 0x68d   : > { %4881 = vmatmul.mubr.msk.f32.gmra.mxu0 %vm733_vm3, %v7293_v25  ;;  %4891 = vmatmul.mubr.msk.f32.gmra.mxu1 %vm733_vm3, %v7293_v25 }
 0x68e   : > { %3930 = vmatprep.mubr.f32.mxu0 %v7265_v4  ;;  %4043 = vmatprep.mubr.f32.mxu1 %v7265_v4 }
 0x691   : > { %4882 = vmatmul.mubr.msk.f32.gmra.mxu0 %vm733_vm3, %v7294_v42  ;;  %4892 = vmatmul.mubr.msk.f32.gmra.mxu1 %vm733_vm3, %v7294_v42 }
 0x692   : > { %4178 = vmatprep.mubr.f32.mxu0 %v7265_v4  ;;  %4291 = vmatprep.mubr.f32.mxu1 %v7265_v4 }
 0x711   : > { %v3459_v17 = vpop.f32.mrf.mxu0  ;;  %v3530_v37 = vpop.f32.mrf.mxu1 }
 0x712   : > { %v3460_v20 = vadd.f32 %v3459_v17, %v7295_v5  ;;  %v3531_v7 = vadd.f32 %v3530_v37, %v7295_v5 }
 0x713   : > { %v3461_v12 = vpop.f32.mrf.mxu0  ;;  %v3532_v55 = vpop.f32.mrf.mxu1 }
 0x714   : > { %v3462_v40 = vadd.f32 %v3461_v12, %v7295_v5  ;;  %v3533_v50 = vadd.f32 %v3532_v55, %v7295_v5 }
 0x715   : > { %v6655_v58 = vpop.f32.mrf.mxu0  ;;  %v6657_v38 = vpop.f32.mrf.mxu1 }
 0x716   : > { %v3539_v10 = vcombine.low %v3460_v20, %v3462_v40  ;;  %v3540_v14 = vcombine.low %v3531_v7, %v3533_v50 }
 0x717   : > { %v6659_v1 = vpop.f32.mrf.mxu0  ;;  %v6661_v3 = vpop.f32.mrf.mxu1 }
 0x718   : > { %v3547_v8 = vrot.slane %v3539_v10, %v7296_v47  ;;  %v3554_v26 = vrot.slane %v3540_v14, %v7296_v47 }
 0x719   : > { %v3658_v34 = vpop.f32.mrf.mxu0  ;;  %v3771_v18 = vpop.f32.mrf.mxu1 }
 0x71a   : > { %v3555_v51 = vcombine.low %v3547_v8, %v3554_v26 }
 0x71b   : > { %v3660_v19 = vpop.f32.mrf.mxu0  ;;  %v3773_v32 = vpop.f32.mrf.mxu1 }
 0x71c   : > { %v3562_v6 = vrot.slane %v3555_v51, %v7296_v47 }
 0x71d   : > { %v3664_v48 = vpop.f32.mrf.mxu0  ;;  %v3777_v39 = vpop.f32.mrf.mxu1 }
 0x71e   : > { %4846 = vst.msk [vmem:[%s5905_s15 + $0x8] sm:$0xf] %vm5900_vm5, %v3562_v6 }
 0x71f   : > { %v3666_v22 = vpop.f32.mrf.mxu0  ;;  %v3779_v28 = vpop.f32.mrf.mxu1 }
 0x721   : > { %v3670_v30 = vpop.f32.mrf.mxu0  ;;  %v3783_v63 = vpop.f32.mrf.mxu1 }
 0x723   : > { %v3672_v54 = vpop.f32.mrf.mxu0  ;;  %v3785_v21 = vpop.f32.mrf.mxu1 }
 0x725   : > { %v6669_v15 = vpop.f32.mrf.mxu0  ;;  %v6671_v59 = vpop.f32.mrf.mxu1 }
 0x726   : > { %7298 = vst [vmem:[#allocation17_spill] sm:$0xff] %v6669_v15  ;;  %7299 = vst [vmem:[#allocation18_spill] sm:$0xff] %v6671_v59 }
 0x727   : > { %v3678_v23 = vpop.f32.mrf.mxu0  ;;  %v3791_v35 = vpop.f32.mrf.mxu1 }
 0x729   : > { %v6673_v13 = vpop.f32.mrf.mxu0  ;;  %v6675_v25 = vpop.f32.mrf.mxu1 }
 0x72a   : > { %7300 = vst [vmem:[#allocation19_spill] sm:$0xff] %v6675_v25 }
 0x72b   : > { %v6677_v42 = vpop.f32.mrf.mxu0  ;;  %v6679_v17 = vpop.f32.mrf.mxu1 }
 0x72d   : > { %v3688_v37 = vpop.f32.mrf.mxu0  ;;  %v3801_v12 = vpop.f32.mrf.mxu1 }
 0x72f   : > { %v3690_v55 = vpop.f32.mrf.mxu0  ;;  %v3803_v20 = vpop.f32.mrf.mxu1 }
 0x731   : > { %v3694_v7 = vpop.f32.mrf.mxu0  ;;  %v3807_v40 = vpop.f32.mrf.mxu1 }
 0x733   : > { %v3696_v50 = vpop.f32.mrf.mxu0  ;;  %v3809_v10 = vpop.f32.mrf.mxu1 }
 0x735   : > { %v3890_v14 = vpop.f32.mrf.mxu0  ;;  %v4003_v8 = vpop.f32.mrf.mxu1 }
 0x736   : > { %v6682_v53 = vadd.f32 %v3890_v14, %v6655_v58  ;;  %v6685_v49 = vadd.f32 %v4003_v8, %v6657_v38 }
 0x737   : > { %v3892_v26 = vpop.f32.mrf.mxu0  ;;  %v4005_v51 = vpop.f32.mrf.mxu1 }
 0x738   : > { %7301 = vst [vmem:[#allocation20_spill] sm:$0xff] %v6685_v49  ;;  %v6688_v60 = vadd.f32 %v3892_v26, %v6659_v1  ;;  %v6691_v56 = vadd.f32 %v4005_v51, %v6661_v3 }
 0x739   : > { %v3896_v6 = vpop.f32.mrf.mxu0  ;;  %v4009_v62 = vpop.f32.mrf.mxu1 }
 0x73a   : > { %v6693_v59 = vadd.f32 %v3896_v6, %v3658_v34  ;;  %v6695_v15 = vadd.f32 %v4009_v62, %v3771_v18 }
 0x73b   : > { %v3898_v47 = vpop.f32.mrf.mxu0  ;;  %v4011_v5 = vpop.f32.mrf.mxu1 }
 0x73c   : > { %v6697_v2 = vadd.f32 %v3898_v47, %v3660_v19  ;;  %v6699_v45 = vadd.f32 %v4011_v5, %v3773_v32 }
 0x73d   : > { %v3902_v24 = vpop.f32.mrf.mxu0  ;;  %v4015_v52 = vpop.f32.mrf.mxu1 }
 0x73e   : > { %v6701_v14 = vadd.f32 %v3902_v24, %v3664_v48  ;;  %v6703_v38 = vadd.f32 %v4015_v52, %v3777_v39 }
 0x73f   : > { %v3904_v27 = vpop.f32.mrf.mxu0  ;;  %v4017_v16 = vpop.f32.mrf.mxu1 }
 0x740   : > { %v6705_v8 = vadd.f32 %v3904_v27, %v3666_v22  ;;  %v6707_v1 = vadd.f32 %v4017_v16, %v3779_v28 }
 0x741   : > { %v3908_v46 = vpop.f32.mrf.mxu0  ;;  %v4021_v36 = vpop.f32.mrf.mxu1 }
 0x742   : > { %v3909_v3 = vadd.f32 %v3908_v46, %v3670_v30  ;;  %v4022_v26 = vadd.f32 %v4021_v36, %v3783_v63 }
 0x743   : > { %v3910_v61 = vpop.f32.mrf.mxu0  ;;  %v4023_v33 = vpop.f32.mrf.mxu1 }
 0x744   : > { %v3911_v34 = vadd.f32 %v3910_v61, %v3672_v54  ;;  %v4024_v51 = vadd.f32 %v4023_v33, %v3785_v21  ;;  %v7302_v61 = vld [vmem:[#allocation19_spill] sm:$0xff]  ;;  %v7305_v54 = vld [vmem:[#allocation17_spill] sm:$0xff]  ;;  %v7306_v21 = vld [vmem:[#allocation18_spill] sm:$0xff] }
 0x745   : > { %v3914_v44 = vpop.f32.mrf.mxu0  ;;  %v4027_v11 = vpop.f32.mrf.mxu1 }
 0x747   : > { %v3916_v41 = vpop.f32.mrf.mxu0  ;;  %v4029_v29 = vpop.f32.mrf.mxu1 }
 0x748   : > { %v3917_v47 = vadd.f32 %v3916_v41, %v3678_v23  ;;  %v4030_v19 = vadd.f32 %v4029_v29, %v3791_v35  ;;  %v7303_v41 = vld [vmem:[#allocation29_spill] sm:$0xff]  ;;  %v4028_v23 = vadd.f32 %v4027_v11, %v7306_v21  ;;  %v7307_v35 = vld [vmem:[#allocation30_spill] sm:$0xff] }
 0x749   : > { %v3920_v9 = vpop.f32.mrf.mxu0  ;;  %v4033_v43 = vpop.f32.mrf.mxu1 }
 0x74a   : > { %v3921_v33 = vadd.f32 %v3920_v9, %v6673_v13  ;;  %v4034_v22 = vadd.f32 %v4033_v43, %v7302_v61 }
 0x74b   : > { %v3922_v4 = vpop.f32.mrf.mxu0  ;;  %v4035_v57 = vpop.f32.mrf.mxu1 }
 0x74c   : > { %v3923_v27 = vadd.f32 %v3922_v4, %v6677_v42  ;;  %v4036_v16 = vadd.f32 %v4035_v57, %v6679_v17  ;;  %v3915_v57 = vadd.f32 %v3914_v44, %v7305_v54 }
 0x74d   : > { %v3926_v0 = vpop.f32.mrf.mxu0  ;;  %v4039_v31 = vpop.f32.mrf.mxu1 }
 0x74e   : > { %v3927_v6 = vadd.f32 %v3926_v0, %v3688_v37  ;;  %v4040_v49 = vadd.f32 %v4039_v31, %v3801_v12  ;;  %v7304_v0 = vld [vmem:[#allocation31_spill] sm:$0xff]  ;;  %v4071_v13 = vadd.f32 %v3923_v27, %v7307_v35  ;;  %v4070_v37 = vadd.f32 %v3921_v33, %v7307_v35  ;;  %v7311_v33 = vld [vmem:[#allocation25_spill] sm:$0xff] }
 0x74f   : > { %v3928_v25 = vpop.f32.mrf.mxu0  ;;  %v4041_v58 = vpop.f32.mrf.mxu1  ;;  %v4072_v12 = vadd.f32 %v4034_v22, %v7307_v35 }
 0x750   : > { %v3929_v5 = vadd.f32 %v3928_v25, %v3690_v55  ;;  %v4042_v32 = vadd.f32 %v4041_v58, %v3803_v20  ;;  %v4074_v9 = vadd.f32 %v3927_v6, %v7304_v0  ;;  %v4076_v43 = vadd.f32 %v4040_v49, %v7304_v0 }
 0x751   : > { %v3932_v18 = vpop.f32.mrf.mxu0  ;;  %v4045_v62 = vpop.f32.mrf.mxu1  ;;  %v4073_v25 = vadd.f32 %v4036_v16, %v7307_v35  ;;  %v4103_v6 = vmax.f32 %v4071_v13, 0.0  ;;  %v7315_v35 = vmov 0.0   ;;  %v7316_v13 = vld [vmem:[#allocation47_spill] sm:$0xff] }
 0x752   : > { %v3933_v24 = vadd.f32 %v3932_v18, %v3694_v7  ;;  %v4046_v48 = vadd.f32 %v4045_v62, %v3807_v40  ;;  %v4075_v31 = vadd.f32 %v3929_v5, %v7304_v0  ;;  %v4077_v30 = vadd.f32 %v4042_v32, %v7304_v0  ;;  %v7308_v7 = vld [vmem:[#allocation32_spill] sm:$0xff]  ;;  %v7309_v62 = vld [vmem:[#allocation27_spill] sm:$0xff] }
 0x753   : > { %v3934_v52 = vpop.f32.mrf.mxu0  ;;  %v4047_v39 = vpop.f32.mrf.mxu1  ;;  %v4067_v44 = vadd.f32 %v3917_v47, %v7308_v7  ;;  %v4069_v11 = vadd.f32 %v4030_v19, %v7308_v7  ;;  %v4066_v49 = vadd.f32 %v3915_v57, %v7308_v7  ;;  %v4106_v58 = vmax.f32 %v4074_v9, 0.0 }
 0x754   : > { %v3935_v46 = vadd.f32 %v3934_v52, %v3696_v50  ;;  %v4048_v36 = vadd.f32 %v4047_v39, %v3809_v10  ;;  %v4078_v29 = vadd.f32 %v3933_v24, %v7303_v41  ;;  %v4080_v28 = vadd.f32 %v4046_v48, %v7303_v41  ;;  %v7310_v39 = vld [vmem:[#allocation28_spill] sm:$0xff] }
 0x755   : > { %v4107_v40 = vmax.f32 %v4075_v31, 0.0  ;;  %v4109_v50 = vmax.f32 %v4077_v30, 0.0  ;;  %v4068_v10 = vadd.f32 %v4028_v23, %v7308_v7  ;;  %v4108_v18 = vmax.f32 %v4076_v43, 0.0  ;;  %v7313_v30 = vld [vmem:[#allocation20_spill] sm:$0xff]  ;;  %v7314_v43 = vld [vmem:[#allocation38_spill] sm:$0xff] }
 0x756   : > { %v4079_v63 = vadd.f32 %v3935_v46, %v7303_v41  ;;  %v4081_v4 = vadd.f32 %v4048_v36, %v7303_v41  ;;  %v4110_v55 = vmax.f32 %v4078_v29, 0.0  ;;  %v4112_v20 = vmax.f32 %v4080_v28, 0.0  ;;  %v7312_v28 = vld [vmem:[#allocation26_spill] sm:$0xff] }
 0x757   : > { %v4063_v5 = vadd.f32 %v3911_v34, %v7309_v62  ;;  %v4065_v32 = vadd.f32 %v4024_v51, %v7309_v62  ;;  %v4105_v47 = vmax.f32 %v4073_v25, 0.0  ;;  %v4062_v19 = vadd.f32 %v3909_v3, %v7309_v62  ;;  %v7317_v25 = vld [vmem:[#allocation48_spill] sm:$0xff] }
 0x758   : > { %v4111_v42 = vmax.f32 %v4079_v63, 0.0  ;;  %v4113_v17 = vmax.f32 %v4081_v4, 0.0  ;;  %v4064_v24 = vadd.f32 %v4022_v26, %v7309_v62  ;;  %v4102_v48 = vmax.f32 %v4070_v37, 0.0  ;;  %v7320_v37 = vld [vmem:[#allocation36_spill] sm:$0xff] }
 0x759   : > { %v4104_v52 = vmax.f32 %v4072_v12, 0.0  ;;  %v4059_v27 = vadd.f32 %v6705_v8, %v7310_v39  ;;  %v4061_v34 = vadd.f32 %v6707_v1, %v7310_v39  ;;  %v4099_v16 = vmax.f32 %v4067_v44, 0.0  ;;  %v7321_v12 = vld [vmem:[#allocation34_spill] sm:$0xff] }
 0x75a   : > { %4130 = vmatprep.subr.mxu0 %v4111_v42  ;;  %4243 = vmatprep.subr.mxu1 %v4113_v17  ;;  %v4101_v51 = vmax.f32 %v4069_v11, 0.0  ;;  %v4058_v46 = vadd.f32 %v6701_v14, %v7310_v39  ;;  %v4060_v3 = vadd.f32 %v6703_v38, %v7310_v39  ;;  %v4098_v26 = vmax.f32 %v4066_v49, 0.0  ;;  %v7318_v42 = vld [vmem:[#allocation49_spill] sm:$0xff] }
 0x75b   : > { %4131 = vmatpush1.msra.mxu0 %v4110_v55  ;;  %4244 = vmatpush1.msra.mxu1 %v4112_v20  ;;  %v4100_v36 = vmax.f32 %v4068_v10, 0.0  ;;  %v4055_v8 = vadd.f32 %v6697_v2, %v7311_v33  ;;  %v4057_v1 = vadd.f32 %v6699_v45, %v7311_v33  ;;  %v4095_v61 = vmax.f32 %v4063_v5, 0.0  ;;  %v7319_v17 = vld [vmem:[#allocation9_spill] sm:$0xff]  ;;  %v7322_v55 = vld [vmem:[#allocation35_spill] sm:$0xff] }
 0x75c   : > { %4132 = vmatprep.subr.mxu0 %v4107_v40  ;;  %4245 = vmatprep.subr.mxu1 %v4109_v50  ;;  %v4097_v22 = vmax.f32 %v4065_v32, 0.0  ;;  %v4054_v14 = vadd.f32 %v6693_v59, %v7311_v33  ;;  %v4056_v38 = vadd.f32 %v6695_v15, %v7311_v33  ;;  %v4094_v41 = vmax.f32 %v4062_v19, 0.0 }
 0x75d   : > { %4133 = vmatpush1.msra.mxu0 %v4106_v58  ;;  %4246 = vmatpush1.msra.mxu1 %v4108_v18  ;;  %v4096_v29 = vmax.f32 %v4064_v24, 0.0  ;;  %v4051_v2 = vadd.f32 %v6688_v60, %v7312_v28  ;;  %v4053_v45 = vadd.f32 %v6691_v56, %v7312_v28  ;;  %v4091_v0 = vmax.f32 %v4059_v27, 0.0 }
 0x75e   : > { %4134 = vmatprep.subr.mxu0 %v4103_v6  ;;  %4247 = vmatprep.subr.mxu1 %v4105_v47  ;;  %v4093_v31 = vmax.f32 %v4061_v34, 0.0  ;;  %v4050_v59 = vadd.f32 %v6682_v53, %v7312_v28  ;;  %v4052_v15 = vadd.f32 %v7313_v30, %v7312_v28  ;;  %v4090_v63 = vmax.f32 %v4058_v46, 0.0 }
 0x75f   : > { %4135 = vmatpush1.msra.mxu0 %v4102_v48  ;;  %4248 = vmatpush1.msra.mxu1 %v4104_v52  ;;  %v4092_v4 = vmax.f32 %v4060_v3, 0.0  ;;  %v4087_v54 = vmax.f32 %v4055_v8, 0.0  ;;  %v4089_v57 = vmax.f32 %v4057_v1, 0.0  ;;  %v4086_v60 = vmax.f32 %v4054_v14, 0.0  ;;  %v7323_v1 = vld [vmem:[#allocation39_spill] sm:$0xff] }
 0x760   : > { %4136 = vmatprep.subr.mxu0 %v4099_v16  ;;  %4249 = vmatprep.subr.mxu1 %v4101_v51  ;;  %v4088_v56 = vmax.f32 %v4056_v38, 0.0  ;;  %v4083_v21 = vmax.f32 %v4051_v2, 0.0  ;;  %v4085_v23 = vmax.f32 %v4053_v45, 0.0  ;;  %v4082_v53 = vmax.f32 %v4050_v59, 0.0  ;;  %v7325_v59 = vld [vmem:[#allocation41_spill] sm:$0xff] }
 0x761   : > { %4137 = vmatpush1.msra.mxu0 %v4098_v26  ;;  %4250 = vmatpush1.msra.mxu1 %v4100_v36  ;;  %v4084_v9 = vmax.f32 %v4052_v15, 0.0 }
 0x762   : > { %4138 = vmatprep.subr.mxu0 %v4095_v61  ;;  %4251 = vmatprep.subr.mxu1 %v4097_v22 }
 0x763   : > { %4139 = vmatpush1.msra.mxu0 %v4094_v41  ;;  %4252 = vmatpush1.msra.mxu1 %v4096_v29  ;;  %v7324_v41 = vld [vmem:[#allocation40_spill] sm:$0xff] }
 0x764   : > { %4140 = vmatprep.subr.mxu0 %v4091_v0  ;;  %4253 = vmatprep.subr.mxu1 %v4093_v31 }
 0x765   : > { %4141 = vmatpush1.msra.mxu0 %v4090_v63  ;;  %4254 = vmatpush1.msra.mxu1 %v4092_v4 }
 0x766   : > { %4142 = vmatprep.subr.mxu0 %v4087_v54  ;;  %4255 = vmatprep.subr.mxu1 %v4089_v57 }
 0x767   : > { %4143 = vmatpush1.msra.mxu0 %v4086_v60  ;;  %4256 = vmatpush1.msra.mxu1 %v4088_v56 }
 0x768   : > { %4144 = vmatprep.subr.mxu0 %v4083_v21  ;;  %4257 = vmatprep.subr.mxu1 %v4085_v23  ;;  %v7326_v21 = vld [vmem:[#allocation42_spill] sm:$0xff] }
 0x769   : > { %4145 = vmatpush1.msra.mxu0 %v4082_v53  ;;  %4258 = vmatpush1.msra.mxu1 %v4084_v9 }
 0x76a   : > { %4893 = vmatmul.mubr.msk.f32.vlgmr.msra.gmra.mxu0 %vm1137_vm4, %v7314_v43  ;;  %4901 = vmatmul.mubr.msk.f32.vlgmr.msra.gmra.mxu1 %vm1137_vm4, %v7314_v43 }
 0x76b   : > { %4184 = vmatprep.mubr.f32.mxu0 %v7315_v35  ;;  %4297 = vmatprep.mubr.f32.mxu1 %v7315_v35 }
 0x76e   : > { %4894 = vmatmul.mubr.msk.f32.gmra.mxu0 %vm1137_vm4, %v7316_v13  ;;  %4902 = vmatmul.mubr.msk.f32.gmra.mxu1 %vm1137_vm4, %v7316_v13 }
 0x76f   : > { %4190 = vmatprep.mubr.f32.mxu0 %v7315_v35  ;;  %4303 = vmatprep.mubr.f32.mxu1 %v7315_v35 }
 0x772   : > { %4895 = vmatmul.mubr.msk.f32.gmra.mxu0 %vm1137_vm4, %v7317_v25  ;;  %4903 = vmatmul.mubr.msk.f32.gmra.mxu1 %vm1137_vm4, %v7317_v25 }
 0x773   : > { %4196 = vmatprep.mubr.f32.mxu0 %v7315_v35  ;;  %4309 = vmatprep.mubr.f32.mxu1 %v7315_v35 }
 0x776   : > { %4896 = vmatmul.mubr.msk.f32.gmra.mxu0 %vm1137_vm4, %v7318_v42  ;;  %4904 = vmatmul.mubr.msk.f32.gmra.mxu1 %vm1137_vm4, %v7318_v42 }
 0x777   : > { %4202 = vmatprep.mubr.f32.mxu0 %v7315_v35  ;;  %4315 = vmatprep.mubr.f32.mxu1 %v7315_v35 }
 0x77a   : > { %4897 = vmatmul.mubr.msk.f32.gmra.mxu0 %vm1137_vm4, %v7319_v17  ;;  %4905 = vmatmul.mubr.msk.f32.gmra.mxu1 %vm1137_vm4, %v7319_v17  ;;  %v7327_v17 = vld [vmem:[#allocation43_spill] sm:$0xff] }
 0x77b   : > { %4208 = vmatprep.mubr.f32.mxu0 %v7315_v35  ;;  %4321 = vmatprep.mubr.f32.mxu1 %v7315_v35 }
 0x77e   : > { %4898 = vmatmul.mubr.msk.f32.gmra.mxu0 %vm1137_vm4, %v7320_v37  ;;  %4906 = vmatmul.mubr.msk.f32.gmra.mxu1 %vm1137_vm4, %v7320_v37 }
 0x77f   : > { %4214 = vmatprep.mubr.f32.mxu0 %v7315_v35  ;;  %4327 = vmatprep.mubr.f32.mxu1 %v7315_v35 }
 0x782   : > { %4899 = vmatmul.mubr.msk.f32.gmra.mxu0 %vm1137_vm4, %v7321_v12  ;;  %4907 = vmatmul.mubr.msk.f32.gmra.mxu1 %vm1137_vm4, %v7321_v12 }
 0x783   : > { %4220 = vmatprep.mubr.f32.mxu0 %v7315_v35  ;;  %4333 = vmatprep.mubr.f32.mxu1 %v7315_v35 }
 0x786   : > { %4900 = vmatmul.mubr.msk.f32.gmra.mxu0 %vm1137_vm4, %v7322_v55  ;;  %4908 = vmatmul.mubr.msk.f32.gmra.mxu1 %vm1137_vm4, %v7322_v55 }
 0x787   : > { %4436 = vmatprep.mubr.f32.mxu0 %v7315_v35  ;;  %4507 = vmatprep.mubr.f32.mxu1 %v7315_v35 }
 0x82a   : > { %v6807_v20 = vpop.f32.mrf.mxu0  ;;  %v6809_v7 = vpop.f32.mrf.mxu1 }
 0x82c   : > { %v6811_v44 = vpop.f32.mrf.mxu0  ;;  %v6813_v11 = vpop.f32.mrf.mxu1 }
 0x82e   : > { %v6815_v40 = vpop.f32.mrf.mxu0  ;;  %v6817_v50 = vpop.f32.mrf.mxu1 }
 0x830   : > { %v6819_v49 = vpop.f32.mrf.mxu0  ;;  %v6821_v10 = vpop.f32.mrf.mxu1 }
 0x832   : > { %v6823_v58 = vpop.f32.mrf.mxu0  ;;  %v6825_v18 = vpop.f32.mrf.mxu1 }
 0x834   : > { %v4194_v62 = vpop.f32.mrf.mxu0  ;;  %v4307_v5 = vpop.f32.mrf.mxu1 }
 0x836   : > { %v4198_v32 = vpop.f32.mrf.mxu0  ;;  %v4311_v6 = vpop.f32.mrf.mxu1 }
 0x838   : > { %v4200_v47 = vpop.f32.mrf.mxu0  ;;  %v4313_v19 = vpop.f32.mrf.mxu1 }
 0x839   : > { %v4201_v37 = vadd.f32 %v4200_v47, %v7327_v17  ;;  %v4314_v12 = vadd.f32 %v4313_v19, %v7327_v17 }
 0x83a   : > { %v4204_v24 = vpop.f32.mrf.mxu0  ;;  %v4317_v48 = vpop.f32.mrf.mxu1 }
 0x83b   : > { %v4205_v35 = vadd.f32 %v4204_v24, %v7326_v21  ;;  %v4318_v13 = vadd.f32 %v4317_v48, %v7326_v21  ;;  %v7328_v48 = vld [vmem:[#allocation44_spill] sm:$0xff] }
 0x83c   : > { %v4206_v52 = vpop.f32.mrf.mxu0  ;;  %v4319_v39 = vpop.f32.mrf.mxu1  ;;  %v4193_v19 = vadd.f32 %v6823_v58, %v7328_v48 }
 0x83d   : > { %v4207_v23 = vadd.f32 %v4206_v52, %v7326_v21  ;;  %v4320_v53 = vadd.f32 %v4319_v39, %v7326_v21  ;;  %v4199_v39 = vadd.f32 %v4198_v32, %v7327_v17  ;;  %v4306_v32 = vadd.f32 %v6825_v18, %v7328_v48 }
 0x83e   : > { %v4210_v27 = vpop.f32.mrf.mxu0  ;;  %v4323_v34 = vpop.f32.mrf.mxu1 }
 0x83f   : > { %v4211_v54 = vadd.f32 %v4210_v27, %v7325_v59  ;;  %v4324_v57 = vadd.f32 %v4323_v34, %v7325_v59  ;;  %v4312_v27 = vadd.f32 %v4311_v6, %v7327_v17  ;;  %v4359_v47 = vmax.f32 %v4320_v53, 0.0 }
 0x840   : > { %v4212_v16 = vpop.f32.mrf.mxu0  ;;  %v4325_v51 = vpop.f32.mrf.mxu1  ;;  %v4358_v6 = vmax.f32 %v4318_v13, 0.0 }
 0x841   : > { %v4213_v30 = vadd.f32 %v4212_v16, %v7325_v59  ;;  %v4326_v15 = vadd.f32 %v4325_v51, %v7325_v59  ;;  %v4360_v34 = vmax.f32 %v4211_v54, 0.0  ;;  %v4362_v24 = vmax.f32 %v4324_v57, 0.0 }
 0x842   : > { %v4216_v46 = vpop.f32.mrf.mxu0  ;;  %v4329_v3 = vpop.f32.mrf.mxu1  ;;  %v4195_v16 = vadd.f32 %v4194_v62, %v7328_v48  ;;  %v4308_v51 = vadd.f32 %v4307_v5, %v7328_v48  ;;  %v4353_v5 = vmax.f32 %v4201_v37, 0.0 }
 0x843   : > { %v4217_v0 = vadd.f32 %v4216_v46, %v7324_v41  ;;  %v4330_v31 = vadd.f32 %v4329_v3, %v7324_v41  ;;  %v4361_v55 = vmax.f32 %v4213_v30, 0.0  ;;  %v4363_v52 = vmax.f32 %v4326_v15, 0.0 }
 0x844   : > { %v4218_v26 = vpop.f32.mrf.mxu0  ;;  %v4331_v36 = vpop.f32.mrf.mxu1  ;;  %v4357_v46 = vmax.f32 %v4207_v23, 0.0  ;;  %v4356_v3 = vmax.f32 %v4205_v35, 0.0  ;;  %v7333_v23 = vld [vmem:[#allocation11_spill] sm:$0xff] }
 0x845   : > { %v4219_v29 = vadd.f32 %v4218_v26, %v7324_v41  ;;  %v4332_v28 = vadd.f32 %v4331_v36, %v7324_v41  ;;  %v4364_v25 = vmax.f32 %v4217_v0, 0.0  ;;  %v4366_v42 = vmax.f32 %v4330_v31, 0.0  ;;  %v7329_v26 = vld [vmem:[#allocation45_spill] sm:$0xff] }
 0x846   : > { %v4222_v33 = vpop.f32.mrf.mxu0  ;;  %v4335_v8 = vpop.f32.mrf.mxu1  ;;  %v4189_v36 = vadd.f32 %v6819_v49, %v7329_v26  ;;  %v4302_v62 = vadd.f32 %v6821_v10, %v7329_v26  ;;  %v4187_v58 = vadd.f32 %v6815_v40, %v7329_v26  ;;  %v4300_v18 = vadd.f32 %v6817_v50, %v7329_v26 }
 0x847   : > { %v4223_v61 = vadd.f32 %v4222_v33, %v7323_v1  ;;  %v4336_v22 = vadd.f32 %v4335_v8, %v7323_v1  ;;  %v4365_v9 = vmax.f32 %v4219_v29, 0.0  ;;  %v4367_v43 = vmax.f32 %v4332_v28, 0.0 }
 0x848   : > { %v4224_v14 = vpop.f32.mrf.mxu0  ;;  %v4337_v38 = vpop.f32.mrf.mxu1  ;;  %v4355_v33 = vmax.f32 %v4314_v12, 0.0  ;;  %v4352_v8 = vmax.f32 %v4199_v39, 0.0  ;;  %v4350_v41 = vmax.f32 %v4306_v32, 0.0  ;;  %v4345_v29 = vmax.f32 %v4189_v36, 0.0 }
 0x849   : > { %v4225_v2 = vadd.f32 %v4224_v14, %v7323_v1  ;;  %v4338_v45 = vadd.f32 %v4337_v38, %v7323_v1  ;;  %v4368_v60 = vmax.f32 %v4223_v61, 0.0  ;;  %v4370_v56 = vmax.f32 %v4336_v22, 0.0  ;;  %v7330_v61 = vld [vmem:[#allocation46_spill] sm:$0xff] }
 0x84a   : > { %v4354_v1 = vmax.f32 %v4312_v27, 0.0  ;;  %v4183_v49 = vadd.f32 %v6811_v44, %v7330_v61  ;;  %v4296_v10 = vadd.f32 %v6813_v11, %v7330_v61  ;;  %v4349_v22 = vmax.f32 %v4195_v16, 0.0 }
 0x84b   : > { %v4369_v63 = vmax.f32 %v4225_v2, 0.0  ;;  %v4371_v4 = vmax.f32 %v4338_v45, 0.0  ;;  %v4351_v14 = vmax.f32 %v4308_v51, 0.0  ;;  %v4181_v40 = vadd.f32 %v6807_v20, %v7330_v61 }
 0x84c   : > { %v4294_v50 = vadd.f32 %v6809_v7, %v7330_v61  ;;  %v4348_v38 = vmax.f32 %v4193_v19, 0.0  ;;  %v4347_v28 = vmax.f32 %v4302_v62, 0.0  ;;  %v4344_v44 = vmax.f32 %v4187_v58, 0.0  ;;  %v7331_v7 = vld [vmem:[#allocation37_spill] sm:$0xff] }
 0x84d   : > { %4388 = vmatprep.subr.mxu0 %v4369_v63  ;;  %4459 = vmatprep.subr.mxu1 %v4371_v4  ;;  %v4346_v11 = vmax.f32 %v4300_v18, 0.0  ;;  %v4341_v2 = vmax.f32 %v4183_v49, 0.0  ;;  %v4343_v45 = vmax.f32 %v4296_v10, 0.0  ;;  %v4340_v20 = vmax.f32 %v4181_v40, 0.0  ;;  %v7332_v63 = vld [vmem:[#allocation10_spill] sm:$0xff] }
 0x84e   : > { %4389 = vmatpush1.msra.mxu0 %v4368_v60  ;;  %4460 = vmatpush1.msra.mxu1 %v4370_v56  ;;  %v4342_v0 = vmax.f32 %v4294_v50, 0.0 }
 0x84f   : > { %4390 = vmatprep.subr.mxu0 %v4365_v9  ;;  %4461 = vmatprep.subr.mxu1 %v4367_v43 }
 0x850   : > { %4391 = vmatpush1.msra.mxu0 %v4364_v25  ;;  %4462 = vmatpush1.msra.mxu1 %v4366_v42 }
 0x851   : > { %4392 = vmatprep.subr.mxu0 %v4361_v55  ;;  %4463 = vmatprep.subr.mxu1 %v4363_v52 }
 0x852   : > { %4393 = vmatpush1.msra.mxu0 %v4360_v34  ;;  %4464 = vmatpush1.msra.mxu1 %v4362_v24 }
 0x853   : > { %4394 = vmatprep.subr.mxu0 %v4357_v46  ;;  %4465 = vmatprep.subr.mxu1 %v4359_v47 }
 0x854   : > { %4395 = vmatpush1.msra.mxu0 %v4356_v3  ;;  %4466 = vmatpush1.msra.mxu1 %v4358_v6 }
 0x855   : > { %4396 = vmatprep.subr.mxu0 %v4353_v5  ;;  %4467 = vmatprep.subr.mxu1 %v4355_v33 }
 0x856   : > { %4397 = vmatpush1.msra.mxu0 %v4352_v8  ;;  %4468 = vmatpush1.msra.mxu1 %v4354_v1 }
 0x857   : > { %4398 = vmatprep.subr.mxu0 %v4349_v22  ;;  %4469 = vmatprep.subr.mxu1 %v4351_v14 }
 0x858   : > { %4399 = vmatpush1.msra.mxu0 %v4348_v38  ;;  %4470 = vmatpush1.msra.mxu1 %v4350_v41 }
 0x859   : > { %4400 = vmatprep.subr.mxu0 %v4345_v29  ;;  %4471 = vmatprep.subr.mxu1 %v4347_v28 }
 0x85a   : > { %4401 = vmatpush1.msra.mxu0 %v4344_v44  ;;  %4472 = vmatpush1.msra.mxu1 %v4346_v11 }
 0x85b   : > { %4402 = vmatprep.subr.mxu0 %v4341_v2  ;;  %4473 = vmatprep.subr.mxu1 %v4343_v45 }
 0x85c   : > { %4403 = vmatpush1.msra.mxu0 %v4340_v20  ;;  %4474 = vmatpush1.msra.mxu1 %v4342_v0 }
 0x85d   : > { %4909 = vmatmul.mubr.msk.f32.vlgmr.msra.gmra.mxu0 %vm1137_vm4, %v7331_v7  ;;  %4910 = vmatmul.mubr.msk.f32.vlgmr.msra.gmra.mxu1 %vm1137_vm4, %v7331_v7 }
 0x91d   : > { %v4438_v31 = vpop.f32.mrf.mxu0  ;;  %v4509_v59 = vpop.f32.mrf.mxu1 }
 0x91e   : > { %v4439_v4 = vadd.f32 %v4438_v31, %v7332_v63  ;;  %v4510_v54 = vadd.f32 %v4509_v59, %v7332_v63 }
 0x91f   : > { %v4440_v30 = vpop.f32.mrf.mxu0  ;;  %v4511_v15 = vpop.f32.mrf.mxu1 }
 0x920   : > { %v4441_v57 = vadd.f32 %v4440_v30, %v7332_v63  ;;  %v4512_v60 = vadd.f32 %v4511_v15, %v7332_v63 }
 0x922   : > { %v4518_v56 = vcombine.low %v4439_v4, %v4441_v57  ;;  %v4519_v21 = vcombine.low %v4510_v54, %v4512_v60 }
 0x924   : > { %v4526_v53 = vrot.slane %v4518_v56, %v7333_v23  ;;  %v4533_v9 = vrot.slane %v4519_v21, %v7333_v23 }
 0x926   : > { %v4534_v43 = vcombine.low %v4526_v53, %v4533_v9  ;;  %4552 = sbr.rel (!%p5202_p5) target bundleno = 2373 (0x945), region = 64 }
 0x928   : > { %v4541_v35 = vrot.slane %v4534_v43, %v7333_v23 }
 0x92a   : > { %4911 = vst.msk [vmem:[%s5905_s15 + $0xc] sm:$0xf] %vm5900_vm5, %v4541_v35 }
 0x92b   : > { %s7341_s18 = smov (!%p4555_p8, %s4554_s18), 16 }
 0x92c   : > { %s6890_s22 = sshll.u32 %s7341_s18, 4 }
 0x92d   : > { %s4559_s24 = ssub.s32 256, %s6890_s22 }
 0x92e   : > { %4560 = vsyncadd %s6885_s17, %s4559_s24  ;;  %p4915_p9 = scmp.ne.s32.totalorder %s6890_s22, 0  ;;  %s4919_s29 = sshll.u32 %s5185_s8, 8 }
 0x92f   : > { %s4563_s25 = scalar_lea.hbm %s6942_s9, %s4919_s29  ;;  %s4565_s23 = sshll.u32 %s5905_s15, 4  ;;  %s4566_s23 = int_to_ptr.vmem [resolvable:$true] %s4565_s23 }
 0x930   : > { %s5038_s30 = scalar_lea.vmem %s4566_s23, %s6890_s22  ;;  %s5110_s27 = smov [#allocation6]  }
 0x931   : > { %p5039_p5 = scmp.ne.s32.totalorder %s4566_s23, %s5038_s30  ;;  %s5042_s28 = sshll.u32 %s5110_s27, 4  ;;  %s5043_s28 = int_to_ptr.vmem [resolvable:$false] %s5042_s28 }
 0x932   : > { %s5044_s10 = scalar_lea.vmem %s5043_s28, 512  ;;  %p5045_p12 = scmp.lt.s32.totalorder %s4566_s23, %s5043_s28 }
 0x933   : > { %p5040_p10 = pnand %p5039_p5, %p4915_p9  ;;  %p5046_p13 = scmp.lt.s32.totalorder %s5044_s10, %s5038_s30 }
 0x935   : > { %p5041_p11 = pneg %p5040_p10  ;;  %p5047_p0 = por %p5046_p13, %p5045_p12 }
 0x937   : > { %p5048_p1 = pnand %p5047_p0, %p5041_p11 }
 0x939   : > { %5051 = shalt.err (!%p5048_p1)
}
 0x93a   : > { %s5052_s8 = scalar_lea.hbm %s4563_s25, %s6890_s22  ;;  %s5056_s24 = scalar_lea.hbm %s6942_s9, 320 }
 0x93b   : > { %p5053_p2 = scmp.ne.s32.totalorder %s4563_s25, %s5052_s8  ;;  %p5057_p7 = scmp.lt.s32.totalorder %s4563_s25, %s6942_s9 }
 0x93c   : > { %p5058_p6 = scmp.lt.s32.totalorder %s5056_s24, %s5052_s8 }
 0x93d   : > { %p5054_p3 = pnand %p5053_p2, %p4915_p9 }
 0x93e   : > { %p5059_p8 = por %p5058_p6, %p5057_p7 }
 0x93f   : > { %p5055_p4 = pneg %p5054_p3 }
 0x941   : > { %p5060_p5 = pnand %p5059_p8, %p5055_p4 }
 0x943   : > { %5063 = shalt.err (!%p5060_p5)
}
 0x944   : > { %4568 = dma.vmem_to_hbm [thread:$0]  (%p4915_p9), %s4566_s23, %s6890_s22, %s4563_s25, %s6885_s17  }
 0x945 PF: > { %p4935_p10 = scmp.ge.s32.totalorder %s5102_s14, 2  ;;  %s4577_s20 = sand.u32 1, %s5090_s11  }
 0x946   : > { %p7335_p11 = scmp.ne.s32.totalorder %s7118_s21, 0  ;;  %s4578_s30 = scalar_lea.sflag [#allocation5], %s4577_s20 }
 0x948   : > { %p4930_p12 = pnand %p4935_p10, %p7335_p11 }
 0x94a   : > { %p4931_p13 = pneg %p4930_p12 }
 0x94c   : > { %5085 = dma.done.wait (%p4931_p13), %s4578_s30, 256  }
 0x94d   : > { %5087 = vsyncadd (%p4931_p13), %s4578_s30, 4294967040  ;;  %p22_p0 = scmp.ge.s32.totalorder %s5189_s16, 4   ;;  %s7336_s11 = smov %s5094_s12 }
 0x94e   : > { %s7337_s12 = smov %s5098_s13  ;;  %s7338_s13 = smov %s5200_s19 }
 0x94f   : > { %s7339_s14 = smov %s5189_s16  ;;  %24 = sbr.rel (!%p22_p0) target bundleno = 7 (0x7), region = 108 }
 0x954   :  { %4583 = vsyncpa [#allocation4], 1 }
 0x955   :  { %4585 = vsyncpa [#allocation4 + $0x1], 1 }
 0x956   :  { %4586 = vsyncpa [#allocation5], 1 }
 0x957   :  { %4588 = vsyncpa [#allocation5 + $0x1], 1 }

</bundles_post_ra>
